<compile_context>
chip_gen: v7x
topology: tpu7x:2x2x1
jax: 0.10.0
libtpu: 0.0.40
codegen_flags: <defaults>
</compile_context>

<pallas_src>
import functools

import jax
import jax.numpy as jnp
from jax.experimental import pallas as pl
from jax.experimental.pallas import tpu as pltpu

# ---------------- mini-"BERT" config (small, consistent with the module) ----
VOCAB = 64
HIDDEN = 32
N_HEADS = 4
HEAD_DIM = HIDDEN // N_HEADS
N_LAYERS = 2
INTERMEDIATE = 64
MAX_POS = 16
TYPE_VOCAB = 2
LN_EPS = 1e-12


# ---------------- single fused Pallas kernel --------------------------------
def _fused_forward_kernel(
    ids_ref, mask_ref,
    word_emb_ref, pos_type_ref, emb_g_ref, emb_b_ref,
    wq_ref, wk_ref, wv_ref, bq_ref, bk_ref, bv_ref,
    wo_ref, bo_ref, ln1_g_ref, ln1_b_ref,
    wi_ref, bi_ref, wo2_ref, bo2_ref, ln2_g_ref, ln2_b_ref,
    pool_w_ref, pool_b_ref, cls_wt_ref, cls_b_ref,
    logits_ref, h_scratch, *, batch, seq):
  """Whole TextClassifier forward on one VMEM-resident block."""
  f32 = jnp.float32
  rows = batch * seq
  scale = 1.0 / float(HEAD_DIM) ** 0.5

  def layernorm(x, g, b):
    mu = jnp.mean(x, axis=-1, keepdims=True)
    var = jnp.mean(jnp.square(x - mu), axis=-1, keepdims=True)
    return (x - mu) * jax.lax.rsqrt(var + LN_EPS) * g + b

  # --- embeddings: in-kernel word-embedding gather via one-hot MXU matmul ---
  ids = ids_ref[...]                                              # (B*S, 1) int32
  vocab_iota = jax.lax.broadcasted_iota(jnp.int32, (rows, VOCAB), 1)
  one_hot = (ids == vocab_iota).astype(f32)                       # (B*S, VOCAB)
  word = jnp.dot(one_hot, word_emb_ref[...], preferred_element_type=f32)
  pos_type = jnp.concatenate([pos_type_ref[...]] * batch, axis=0)  # (B*S, H)
  h = layernorm(word + pos_type, emb_g_ref[...], emb_b_ref[...])
  # TODO(synk): embedding/attention/hidden dropouts are identity at inference.

  # BERT-style additive attention mask, computed in-kernel: 0 keep / -10000 pad.
  add_mask = (1.0 - mask_ref[...].astype(f32)) * -10000.0          # (B, S)

  # --- encoder layers (statically unrolled; weights indexed on leading axes) ---
  for l in range(N_LAYERS):
    # Self-attention with per-head weight slabs (split at pack time):
    # no lane-axis activation slicing, no explicit transposes, output
    # projection folded into the head loop.
    attn_rows = [jnp.zeros((seq, HIDDEN), f32) for _ in range(batch)]
    for hd in range(N_HEADS):
      q_h = jnp.dot(h, wq_ref[l, hd], preferred_element_type=f32) + bq_ref[l, hd]
      k_h = jnp.dot(h, wk_ref[l, hd], preferred_element_type=f32) + bk_ref[l, hd]
      v_h = jnp.dot(h, wv_ref[l, hd], preferred_element_type=f32) + bv_ref[l, hd]
      for b in range(batch):
        r0, r1 = b * seq, (b + 1) * seq
        # q @ k^T without an XLU transpose: contract trailing dims of both.
        s = jax.lax.dot_general(
            q_h[r0:r1], k_h[r0:r1], (((1,), (1,)), ((), ())),
            preferred_element_type=f32) * scale + add_mask[b:b + 1, :]
        # Softmax without per-row max subtraction: scores are O(1) after
        # LayerNorm (no exp overflow) and masked scores are exactly -1e4
        # (exp underflows to 0). Assumes >= 1 unmasked token per sequence.
        p = jnp.exp(s)
        p = p * pl.reciprocal(jnp.sum(p, axis=-1, keepdims=True), approx=False)
        ctx = jnp.dot(p, v_h[r0:r1], preferred_element_type=f32)   # (S, Dh)
        attn_rows[b] = attn_rows[b] + jnp.dot(
            ctx, wo_ref[l, hd], preferred_element_type=f32)         # (S, H)
    attn = jnp.concatenate(attn_rows, axis=0) + bo_ref[l]           # (B*S, H)
    h = layernorm(attn + h, ln1_g_ref[l], ln1_b_ref[l])

    # Fused FFN (+GELU) + residual + LayerNorm.
    inter = jnp.dot(h, wi_ref[l], preferred_element_type=f32) + bi_ref[l]
    # TODO(synk): BERT uses exact erf-GELU; tanh approximation used here.
    inter = jax.nn.gelu(inter, approximate=True)
    ffn = jnp.dot(inter, wo2_ref[l], preferred_element_type=f32) + bo2_ref[l]
    h = layernorm(ffn + h, ln2_g_ref[l], ln2_b_ref[l])

  # --- pooler + classifier head ---
  h_scratch[...] = h
  cls_rows = h_scratch[pl.ds(0, batch, stride=seq), :]              # (B, H) strided
  pooled = jnp.tanh(
      jnp.dot(cls_rows, pool_w_ref[...], preferred_element_type=f32)
      + pool_b_ref[...])
  # dropout(0.1): identity at inference (eval mode).
  # Lane-dense logits: (1, B) via contraction of cls_w^T (1,H) with pooled (B,H).
  logits = jax.lax.dot_general(
      cls_wt_ref[...], pooled, (((1,), (1,)), ((), ())),
      preferred_element_type=f32) + cls_b_ref[...]
  logits_ref[...] = logits.astype(logits_ref.dtype)


# ---------------- deterministic parameter init ------------------------------
def init_params(key):
  keys = iter(jax.random.split(key, 256))

  def nrm(shape):
    return jax.random.normal(next(keys), shape, jnp.float32) * 0.02

  params = {
      "word_emb": nrm((VOCAB, HIDDEN)),
      "pos_emb": nrm((MAX_POS, HIDDEN)),
      "type_emb": nrm((TYPE_VOCAB, HIDDEN)),
      "emb_ln_g": jnp.ones((HIDDEN,), jnp.float32),
      "emb_ln_b": jnp.zeros((HIDDEN,), jnp.float32),
      "layers": [],
      "pool_w": nrm((HIDDEN, HIDDEN)),
      "pool_b": jnp.zeros((HIDDEN,), jnp.float32),
      "cls_w": nrm((HIDDEN, 1)),       # nn.Linear(hidden_size, 1)
      "cls_b": jnp.zeros((1,), jnp.float32),
  }
  for _ in range(N_LAYERS):
    params["layers"].append({
        "wq": nrm((HIDDEN, HIDDEN)), "bq": jnp.zeros((HIDDEN,), jnp.float32),
        "wk": nrm((HIDDEN, HIDDEN)), "bk": jnp.zeros((HIDDEN,), jnp.float32),
        "wv": nrm((HIDDEN, HIDDEN)), "bv": jnp.zeros((HIDDEN,), jnp.float32),
        "wo": nrm((HIDDEN, HIDDEN)), "bo": jnp.zeros((HIDDEN,), jnp.float32),
        "ln1_g": jnp.ones((HIDDEN,), jnp.float32),
        "ln1_b": jnp.zeros((HIDDEN,), jnp.float32),
        "wi": nrm((HIDDEN, INTERMEDIATE)),
        "bi": jnp.zeros((INTERMEDIATE,), jnp.float32),
        "wo2": nrm((INTERMEDIATE, HIDDEN)),
        "bo2": jnp.zeros((HIDDEN,), jnp.float32),
        "ln2_g": jnp.ones((HIDDEN,), jnp.float32),
        "ln2_b": jnp.zeros((HIDDEN,), jnp.float32),
    })
  return params


# ---------------- one-time weight packing (hoisted out of the forward) ------
def pack_params(params, seq_len):
  """Per-head splits, pre-summed pos+type embedding, kernel-friendly shapes."""
  L = params["layers"]

  def split_in(w):   # (H, H) -> (NH, H, Dh): per-head output columns
    return w.reshape(HIDDEN, N_HEADS, HEAD_DIM).transpose(1, 0, 2)

  def split_out(w):  # (H, H) -> (NH, Dh, H): per-head input rows
    return w.reshape(N_HEADS, HEAD_DIM, HIDDEN)

  def split_b(b):    # (H,) -> (NH, 1, Dh)
    return b.reshape(N_HEADS, 1, HEAD_DIM)

  return {
      "word_emb": params["word_emb"],
      # position + token-type(=0) embeddings pre-summed into one [S, H] table.
      "pos_type": params["pos_emb"][:seq_len] + params["type_emb"][0][None, :],
      "emb_g": params["emb_ln_g"][None, :], "emb_b": params["emb_ln_b"][None, :],
      "wq": jnp.stack([split_in(l["wq"]) for l in L]),    # (L, NH, H, Dh)
      "wk": jnp.stack([split_in(l["wk"]) for l in L]),
      "wv": jnp.stack([split_in(l["wv"]) for l in L]),
      "bq": jnp.stack([split_b(l["bq"]) for l in L]),     # (L, NH, 1, Dh)
      "bk": jnp.stack([split_b(l["bk"]) for l in L]),
      "bv": jnp.stack([split_b(l["bv"]) for l in L]),
      "wo": jnp.stack([split_out(l["wo"]) for l in L]),   # (L, NH, Dh, H)
      "bo": jnp.stack([l["bo"][None, :] for l in L]),
      "ln1_g": jnp.stack([l["ln1_g"][None, :] for l in L]),
      "ln1_b": jnp.stack([l["ln1_b"][None, :] for l in L]),
      "wi": jnp.stack([l["wi"] for l in L]),
      "bi": jnp.stack([l["bi"][None, :] for l in L]),
      "wo2": jnp.stack([l["wo2"] for l in L]),
      "bo2": jnp.stack([l["bo2"][None, :] for l in L]),
      "ln2_g": jnp.stack([l["ln2_g"][None, :] for l in L]),
      "ln2_b": jnp.stack([l["ln2_b"][None, :] for l in L]),
      "pool_w": params["pool_w"], "pool_b": params["pool_b"][None, :],
      "cls_wt": params["cls_w"].T,                        # (1, H)
      "cls_b": params["cls_b"].reshape(1, 1),
  }


# ---------------- forward pass (TextClassifier.forward) ---------------------
def text_classifier_forward(packed, input_ids, attention_mask):
  B, S = input_ids.shape
  ids = input_ids.reshape(B * S, 1).astype(jnp.int32)

  vmem = pl.BlockSpec(memory_space=pltpu.MemorySpace.VMEM)
  logits_1b = pl.pallas_call(
      functools.partial(_fused_forward_kernel, batch=B, seq=S),
      out_shape=jax.ShapeDtypeStruct((1, B), jnp.float32),
      in_specs=[vmem] * 26,
      out_specs=vmem,
      scratch_shapes=[pltpu.VMEM((B * S, HIDDEN), jnp.float32)],
  )(ids, attention_mask.astype(jnp.int32),
    packed["word_emb"], packed["pos_type"], packed["emb_g"], packed["emb_b"],
    packed["wq"], packed["wk"], packed["wv"],
    packed["bq"], packed["bk"], packed["bv"],
    packed["wo"], packed["bo"], packed["ln1_g"], packed["ln1_b"],
    packed["wi"], packed["bi"], packed["wo2"], packed["bo2"],
    packed["ln2_g"], packed["ln2_b"],
    packed["pool_w"], packed["pool_b"], packed["cls_wt"], packed["cls_b"])
  # (1, B) lane-dense kernel output -> (B, 1) like the PyTorch module.
  return logits_1b.reshape(B, 1)


# ---------------- main -------------------------------------------------------
if __name__ == "__main__":
  B, S = 2, 8
  key = jax.random.PRNGKey(0)
  params = init_params(key)
  packed = pack_params(params, S)   # packed once, reused every call

  input_ids = jax.random.randint(jax.random.fold_in(key, 1), (B, S), 0, VOCAB,
                                 dtype=jnp.int32)
  attention_mask = jnp.ones((B, S), jnp.int32).at[1, 6:].set(0)  # some padding

  fwd = jax.jit(functools.partial(text_classifier_forward, packed))
  logits = fwd(input_ids, attention_mask)
  jax.block_until_ready(logits)
  assert logits.shape == (B, 1) and logits.dtype == jnp.float32
  print("KERNEL_OK")
</pallas_src>

<mosaic_0001>
module attributes {stable_mosaic.version = 11 : i64} {
  func.func @_fused_forward_kernel(%arg0: memref<16x1xi32, #tpu.memory_space<vmem>>, %arg1: memref<2x8xi32, #tpu.memory_space<vmem>>, %arg2: memref<64x32xf32, #tpu.memory_space<vmem>>, %arg3: memref<8x32xf32, #tpu.memory_space<vmem>>, %arg4: memref<1x32xf32, #tpu.memory_space<vmem>>, %arg5: memref<1x32xf32, #tpu.memory_space<vmem>>, %arg6: memref<2x4x32x8xf32, #tpu.memory_space<vmem>>, %arg7: memref<2x4x32x8xf32, #tpu.memory_space<vmem>>, %arg8: memref<2x4x32x8xf32, #tpu.memory_space<vmem>>, %arg9: memref<2x4x1x8xf32, #tpu.memory_space<vmem>>, %arg10: memref<2x4x1x8xf32, #tpu.memory_space<vmem>>, %arg11: memref<2x4x1x8xf32, #tpu.memory_space<vmem>>, %arg12: memref<2x4x8x32xf32, #tpu.memory_space<vmem>>, %arg13: memref<2x1x32xf32, #tpu.memory_space<vmem>>, %arg14: memref<2x1x32xf32, #tpu.memory_space<vmem>>, %arg15: memref<2x1x32xf32, #tpu.memory_space<vmem>>, %arg16: memref<2x32x64xf32, #tpu.memory_space<vmem>>, %arg17: memref<2x1x64xf32, #tpu.memory_space<vmem>>, %arg18: memref<2x64x32xf32, #tpu.memory_space<vmem>>, %arg19: memref<2x1x32xf32, #tpu.memory_space<vmem>>, %arg20: memref<2x1x32xf32, #tpu.memory_space<vmem>>, %arg21: memref<2x1x32xf32, #tpu.memory_space<vmem>>, %arg22: memref<32x32xf32, #tpu.memory_space<vmem>>, %arg23: memref<1x32xf32, #tpu.memory_space<vmem>>, %arg24: memref<1x32xf32, #tpu.memory_space<vmem>>, %arg25: memref<1x1xf32, #tpu.memory_space<vmem>>, %arg26: memref<1x2xf32, #tpu.memory_space<vmem>>, %arg27: memref<16x32xf32, #tpu.memory_space<vmem>>) attributes {dimension_semantics = [], scalar_prefetch = 0 : i64, scratch_operands = 1 : i64, tpu.core_type = #tpu.core_type<tc>} {
    %c0 = arith.constant 0 : index
    %c0_0 = arith.constant 0 : index
    %0 = vector.load %arg0[%c0, %c0_0] : memref<16x1xi32, #tpu.memory_space<vmem>>, vector<16x1xi32>
    %1 = tpu.iota {dimensions = array<i32: 1>} : vector<16x64xi32>
    %2 = vector.broadcast %0 : vector<16x1xi32> to vector<16x64xi32>
    %3 = arith.cmpi eq, %2, %1 : vector<16x64xi32>
    %4 = arith.extui %3 : vector<16x64xi1> to vector<16x64xi32>
    %5 = arith.sitofp %4 : vector<16x64xi32> to vector<16x64xf32>
    %c0_1 = arith.constant 0 : index
    %c0_2 = arith.constant 0 : index
    %6 = vector.load %arg2[%c0_1, %c0_2] : memref<64x32xf32, #tpu.memory_space<vmem>>, vector<64x32xf32>
    %cst = arith.constant dense<0.000000e+00> : vector<16x32xf32>
    %7 = tpu.matmul %5, %6, %cst {dimension_numbers = #tpu.dot_dimension_numbers<[1], [0], [0], [1], [0, 0, 1, 1], [], []>} : vector<16x64xf32>, vector<64x32xf32>, vector<16x32xf32> -> vector<16x32xf32>
    %c0_3 = arith.constant 0 : index
    %c0_4 = arith.constant 0 : index
    %8 = vector.load %arg3[%c0_3, %c0_4] : memref<8x32xf32, #tpu.memory_space<vmem>>, vector<8x32xf32>
    %9 = tpu.concatenate %8, %8 in 0 : vector<8x32xf32>, vector<8x32xf32> -> vector<16x32xf32>
    %10 = arith.addf %7, %9 : vector<16x32xf32>
    %c0_5 = arith.constant 0 : index
    %c0_6 = arith.constant 0 : index
    %11 = vector.load %arg4[%c0_5, %c0_6] : memref<1x32xf32, #tpu.memory_space<vmem>>, vector<1x32xf32>
    %c0_7 = arith.constant 0 : index
    %c0_8 = arith.constant 0 : index
    %12 = vector.load %arg5[%c0_7, %c0_8] : memref<1x32xf32, #tpu.memory_space<vmem>>, vector<1x32xf32>
    %cst_9 = arith.constant dense<0.000000e+00> : vector<16xf32>
    %13 = vector.multi_reduction <add>, %10, %cst_9 [1] : vector<16x32xf32> to vector<16xf32>
    %14 = vector.shape_cast %13 : vector<16xf32> to vector<16x1xf32>
    %cst_10 = arith.constant 3.200000e+01 : f32
    %15 = vector.broadcast %cst_10 : f32 to vector<16x1xf32>
    %16 = arith.divf %14, %15 : vector<16x1xf32>
    %17 = vector.broadcast %16 : vector<16x1xf32> to vector<16x32xf32>
    %18 = arith.subf %10, %17 : vector<16x32xf32>
    %19 = arith.mulf %18, %18 : vector<16x32xf32>
    %cst_11 = arith.constant dense<0.000000e+00> : vector<16xf32>
    %20 = vector.multi_reduction <add>, %19, %cst_11 [1] : vector<16x32xf32> to vector<16xf32>
    %21 = vector.shape_cast %20 : vector<16xf32> to vector<16x1xf32>
    %cst_12 = arith.constant 3.200000e+01 : f32
    %22 = vector.broadcast %cst_12 : f32 to vector<16x1xf32>
    %23 = arith.divf %21, %22 : vector<16x1xf32>
    %24 = vector.broadcast %16 : vector<16x1xf32> to vector<16x32xf32>
    %25 = arith.subf %10, %24 : vector<16x32xf32>
    %cst_13 = arith.constant 9.99999996E-13 : f32
    %26 = vector.broadcast %cst_13 : f32 to vector<16x1xf32>
    %27 = arith.addf %23, %26 : vector<16x1xf32>
    %28 = math.rsqrt %27 : vector<16x1xf32>
    %29 = vector.broadcast %28 : vector<16x1xf32> to vector<16x32xf32>
    %30 = arith.mulf %25, %29 : vector<16x32xf32>
    %31 = vector.broadcast %11 : vector<1x32xf32> to vector<16x32xf32>
    %32 = arith.mulf %30, %31 : vector<16x32xf32>
    %33 = vector.broadcast %12 : vector<1x32xf32> to vector<16x32xf32>
    %34 = arith.addf %32, %33 : vector<16x32xf32>
    %c0_14 = arith.constant 0 : index
    %c0_15 = arith.constant 0 : index
    %35 = vector.load %arg1[%c0_14, %c0_15] : memref<2x8xi32, #tpu.memory_space<vmem>>, vector<2x8xi32>
    %36 = arith.sitofp %35 : vector<2x8xi32> to vector<2x8xf32>
    %cst_16 = arith.constant 1.000000e+00 : f32
    %37 = vector.broadcast %cst_16 : f32 to vector<2x8xf32>
    %38 = arith.subf %37, %36 : vector<2x8xf32>
    %cst_17 = arith.constant -1.000000e+04 : f32
    %39 = vector.broadcast %cst_17 : f32 to vector<2x8xf32>
    %40 = arith.mulf %38, %39 : vector<2x8xf32>
    %cst_18 = arith.constant 0.000000e+00 : f32
    %41 = vector.broadcast %cst_18 : f32 to vector<8x32xf32>
    %cst_19 = arith.constant 0.000000e+00 : f32
    %42 = vector.broadcast %cst_19 : f32 to vector<8x32xf32>
    %c0_20 = arith.constant 0 : index
    %c0_21 = arith.constant 0 : index
    %c0_22 = arith.constant 0 : index
    %c0_23 = arith.constant 0 : index
    %43 = vector.load %arg6[%c0_20, %c0_21, %c0_22, %c0_23] : memref<2x4x32x8xf32, #tpu.memory_space<vmem>>, vector<1x1x32x8xf32>
    %44 = vector.shape_cast %43 : vector<1x1x32x8xf32> to vector<32x8xf32>
    %cst_24 = arith.constant dense<0.000000e+00> : vector<16x8xf32>
    %45 = tpu.matmul %34, %44, %cst_24 {dimension_numbers = #tpu.dot_dimension_numbers<[1], [0], [0], [1], [0, 0, 1, 1], [], []>} : vector<16x32xf32>, vector<32x8xf32>, vector<16x8xf32> -> vector<16x8xf32>
    %c0_25 = arith.constant 0 : index
    %c0_26 = arith.constant 0 : index
    %c0_27 = arith.constant 0 : index
    %c0_28 = arith.constant 0 : index
    %46 = vector.load %arg9[%c0_25, %c0_26, %c0_27, %c0_28] : memref<2x4x1x8xf32, #tpu.memory_space<vmem>>, vector<1x1x1x8xf32>
    %47 = vector.shape_cast %46 : vector<1x1x1x8xf32> to vector<1x8xf32>
    %48 = vector.broadcast %47 : vector<1x8xf32> to vector<16x8xf32>
    %49 = arith.addf %45, %48 : vector<16x8xf32>
    %c0_29 = arith.constant 0 : index
    %c0_30 = arith.constant 0 : index
    %c0_31 = arith.constant 0 : index
    %c0_32 = arith.constant 0 : index
    %50 = vector.load %arg7[%c0_29, %c0_30, %c0_31, %c0_32] : memref<2x4x32x8xf32, #tpu.memory_space<vmem>>, vector<1x1x32x8xf32>
    %51 = vector.shape_cast %50 : vector<1x1x32x8xf32> to vector<32x8xf32>
    %cst_33 = arith.constant dense<0.000000e+00> : vector<16x8xf32>
    %52 = tpu.matmul %34, %51, %cst_33 {dimension_numbers = #tpu.dot_dimension_numbers<[1], [0], [0], [1], [0, 0, 1, 1], [], []>} : vector<16x32xf32>, vector<32x8xf32>, vector<16x8xf32> -> vector<16x8xf32>
    %c0_34 = arith.constant 0 : index
    %c0_35 = arith.constant 0 : index
    %c0_36 = arith.constant 0 : index
    %c0_37 = arith.constant 0 : index
    %53 = vector.load %arg10[%c0_34, %c0_35, %c0_36, %c0_37] : memref<2x4x1x8xf32, #tpu.memory_space<vmem>>, vector<1x1x1x8xf32>
    %54 = vector.shape_cast %53 : vector<1x1x1x8xf32> to vector<1x8xf32>
    %55 = vector.broadcast %54 : vector<1x8xf32> to vector<16x8xf32>
    %56 = arith.addf %52, %55 : vector<16x8xf32>
    %c0_38 = arith.constant 0 : index
    %c0_39 = arith.constant 0 : index
    %c0_40 = arith.constant 0 : index
    %c0_41 = arith.constant 0 : index
    %57 = vector.load %arg8[%c0_38, %c0_39, %c0_40, %c0_41] : memref<2x4x32x8xf32, #tpu.memory_space<vmem>>, vector<1x1x32x8xf32>
    %58 = vector.shape_cast %57 : vector<1x1x32x8xf32> to vector<32x8xf32>
    %cst_42 = arith.constant dense<0.000000e+00> : vector<16x8xf32>
    %59 = tpu.matmul %34, %58, %cst_42 {dimension_numbers = #tpu.dot_dimension_numbers<[1], [0], [0], [1], [0, 0, 1, 1], [], []>} : vector<16x32xf32>, vector<32x8xf32>, vector<16x8xf32> -> vector<16x8xf32>
    %c0_43 = arith.constant 0 : index
    %c0_44 = arith.constant 0 : index
    %c0_45 = arith.constant 0 : index
    %c0_46 = arith.constant 0 : index
    %60 = vector.load %arg11[%c0_43, %c0_44, %c0_45, %c0_46] : memref<2x4x1x8xf32, #tpu.memory_space<vmem>>, vector<1x1x1x8xf32>
    %61 = vector.shape_cast %60 : vector<1x1x1x8xf32> to vector<1x8xf32>
    %62 = vector.broadcast %61 : vector<1x8xf32> to vector<16x8xf32>
    %63 = arith.addf %59, %62 : vector<16x8xf32>
    %64 = vector.extract_strided_slice %49 {offsets = [0, 0], sizes = [8, 8], strides = [1, 1]} : vector<16x8xf32> to vector<8x8xf32>
    %65 = vector.extract_strided_slice %56 {offsets = [0, 0], sizes = [8, 8], strides = [1, 1]} : vector<16x8xf32> to vector<8x8xf32>
    %cst_47 = arith.constant dense<0.000000e+00> : vector<8x8xf32>
    %66 = tpu.matmul %64, %65, %cst_47 {dimension_numbers = #tpu.dot_dimension_numbers<[1], [1], [0], [0], [0, 0, 1, 0], [], []>} : vector<8x8xf32>, vector<8x8xf32>, vector<8x8xf32> -> vector<8x8xf32>
    %cst_48 = arith.constant 0.353553385 : f32
    %67 = vector.broadcast %cst_48 : f32 to vector<8x8xf32>
    %68 = arith.mulf %66, %67 : vector<8x8xf32>
    %69 = vector.extract_strided_slice %40 {offsets = [0, 0], sizes = [1, 8], strides = [1, 1]} : vector<2x8xf32> to vector<1x8xf32>
    %70 = vector.broadcast %69 : vector<1x8xf32> to vector<8x8xf32>
    %71 = arith.addf %68, %70 : vector<8x8xf32>
    %72 = math.exp %71 : vector<8x8xf32>
    %cst_49 = arith.constant dense<0.000000e+00> : vector<8xf32>
    %73 = vector.multi_reduction <add>, %72, %cst_49 [1] : vector<8x8xf32> to vector<8xf32>
    %74 = vector.shape_cast %73 : vector<8xf32> to vector<8x1xf32>
    %75 = tpu.reciprocal %74 : vector<8x1xf32> -> vector<8x1xf32>
    %76 = vector.broadcast %75 : vector<8x1xf32> to vector<8x8xf32>
    %77 = arith.mulf %72, %76 : vector<8x8xf32>
    %78 = vector.extract_strided_slice %63 {offsets = [0, 0], sizes = [8, 8], strides = [1, 1]} : vector<16x8xf32> to vector<8x8xf32>
    %cst_50 = arith.constant dense<0.000000e+00> : vector<8x8xf32>
    %79 = tpu.matmul %77, %78, %cst_50 {dimension_numbers = #tpu.dot_dimension_numbers<[1], [0], [0], [1], [0, 0, 1, 1], [], []>} : vector<8x8xf32>, vector<8x8xf32>, vector<8x8xf32> -> vector<8x8xf32>
    %c0_51 = arith.constant 0 : index
    %c0_52 = arith.constant 0 : index
    %c0_53 = arith.constant 0 : index
    %c0_54 = arith.constant 0 : index
    %80 = vector.load %arg12[%c0_51, %c0_52, %c0_53, %c0_54] : memref<2x4x8x32xf32, #tpu.memory_space<vmem>>, vector<1x1x8x32xf32>
    %81 = vector.shape_cast %80 : vector<1x1x8x32xf32> to vector<8x32xf32>
    %cst_55 = arith.constant dense<0.000000e+00> : vector<8x32xf32>
    %82 = tpu.matmul %79, %81, %cst_55 {dimension_numbers = #tpu.dot_dimension_numbers<[1], [0], [0], [1], [0, 0, 1, 1], [], []>} : vector<8x8xf32>, vector<8x32xf32>, vector<8x32xf32> -> vector<8x32xf32>
    %83 = arith.addf %41, %82 : vector<8x32xf32>
    %84 = vector.extract_strided_slice %49 {offsets = [8, 0], sizes = [8, 8], strides = [1, 1]} : vector<16x8xf32> to vector<8x8xf32>
    %85 = vector.extract_strided_slice %56 {offsets = [8, 0], sizes = [8, 8], strides = [1, 1]} : vector<16x8xf32> to vector<8x8xf32>
    %cst_56 = arith.constant dense<0.000000e+00> : vector<8x8xf32>
    %86 = tpu.matmul %84, %85, %cst_56 {dimension_numbers = #tpu.dot_dimension_numbers<[1], [1], [0], [0], [0, 0, 1, 0], [], []>} : vector<8x8xf32>, vector<8x8xf32>, vector<8x8xf32> -> vector<8x8xf32>
    %cst_57 = arith.constant 0.353553385 : f32
    %87 = vector.broadcast %cst_57 : f32 to vector<8x8xf32>
    %88 = arith.mulf %86, %87 : vector<8x8xf32>
    %89 = vector.extract_strided_slice %40 {offsets = [1, 0], sizes = [1, 8], strides = [1, 1]} : vector<2x8xf32> to vector<1x8xf32>
    %90 = vector.broadcast %89 : vector<1x8xf32> to vector<8x8xf32>
    %91 = arith.addf %88, %90 : vector<8x8xf32>
    %92 = math.exp %91 : vector<8x8xf32>
    %cst_58 = arith.constant dense<0.000000e+00> : vector<8xf32>
    %93 = vector.multi_reduction <add>, %92, %cst_58 [1] : vector<8x8xf32> to vector<8xf32>
    %94 = vector.shape_cast %93 : vector<8xf32> to vector<8x1xf32>
    %95 = tpu.reciprocal %94 : vector<8x1xf32> -> vector<8x1xf32>
    %96 = vector.broadcast %95 : vector<8x1xf32> to vector<8x8xf32>
    %97 = arith.mulf %92, %96 : vector<8x8xf32>
    %98 = vector.extract_strided_slice %63 {offsets = [8, 0], sizes = [8, 8], strides = [1, 1]} : vector<16x8xf32> to vector<8x8xf32>
    %cst_59 = arith.constant dense<0.000000e+00> : vector<8x8xf32>
    %99 = tpu.matmul %97, %98, %cst_59 {dimension_numbers = #tpu.dot_dimension_numbers<[1], [0], [0], [1], [0, 0, 1, 1], [], []>} : vector<8x8xf32>, vector<8x8xf32>, vector<8x8xf32> -> vector<8x8xf32>
    %c0_60 = arith.constant 0 : index
    %c0_61 = arith.constant 0 : index
    %c0_62 = arith.constant 0 : index
    %c0_63 = arith.constant 0 : index
    %100 = vector.load %arg12[%c0_60, %c0_61, %c0_62, %c0_63] : memref<2x4x8x32xf32, #tpu.memory_space<vmem>>, vector<1x1x8x32xf32>
    %101 = vector.shape_cast %100 : vector<1x1x8x32xf32> to vector<8x32xf32>
    %cst_64 = arith.constant dense<0.000000e+00> : vector<8x32xf32>
    %102 = tpu.matmul %99, %101, %cst_64 {dimension_numbers = #tpu.dot_dimension_numbers<[1], [0], [0], [1], [0, 0, 1, 1], [], []>} : vector<8x8xf32>, vector<8x32xf32>, vector<8x32xf32> -> vector<8x32xf32>
    %103 = arith.addf %42, %102 : vector<8x32xf32>
    %c0_65 = arith.constant 0 : index
    %c1 = arith.constant 1 : index
    %c0_66 = arith.constant 0 : index
    %c0_67 = arith.constant 0 : index
    %104 = vector.load %arg6[%c0_65, %c1, %c0_66, %c0_67] : memref<2x4x32x8xf32, #tpu.memory_space<vmem>>, vector<1x1x32x8xf32>
    %105 = vector.shape_cast %104 : vector<1x1x32x8xf32> to vector<32x8xf32>
    %cst_68 = arith.constant dense<0.000000e+00> : vector<16x8xf32>
    %106 = tpu.matmul %34, %105, %cst_68 {dimension_numbers = #tpu.dot_dimension_numbers<[1], [0], [0], [1], [0, 0, 1, 1], [], []>} : vector<16x32xf32>, vector<32x8xf32>, vector<16x8xf32> -> vector<16x8xf32>
    %c0_69 = arith.constant 0 : index
    %c1_70 = arith.constant 1 : index
    %c0_71 = arith.constant 0 : index
    %c0_72 = arith.constant 0 : index
    %107 = vector.load %arg9[%c0_69, %c1_70, %c0_71, %c0_72] : memref<2x4x1x8xf32, #tpu.memory_space<vmem>>, vector<1x1x1x8xf32>
    %108 = vector.shape_cast %107 : vector<1x1x1x8xf32> to vector<1x8xf32>
    %109 = vector.broadcast %108 : vector<1x8xf32> to vector<16x8xf32>
    %110 = arith.addf %106, %109 : vector<16x8xf32>
    %c0_73 = arith.constant 0 : index
    %c1_74 = arith.constant 1 : index
    %c0_75 = arith.constant 0 : index
    %c0_76 = arith.constant 0 : index
    %111 = vector.load %arg7[%c0_73, %c1_74, %c0_75, %c0_76] : memref<2x4x32x8xf32, #tpu.memory_space<vmem>>, vector<1x1x32x8xf32>
    %112 = vector.shape_cast %111 : vector<1x1x32x8xf32> to vector<32x8xf32>
    %cst_77 = arith.constant dense<0.000000e+00> : vector<16x8xf32>
    %113 = tpu.matmul %34, %112, %cst_77 {dimension_numbers = #tpu.dot_dimension_numbers<[1], [0], [0], [1], [0, 0, 1, 1], [], []>} : vector<16x32xf32>, vector<32x8xf32>, vector<16x8xf32> -> vector<16x8xf32>
    %c0_78 = arith.constant 0 : index
    %c1_79 = arith.constant 1 : index
    %c0_80 = arith.constant 0 : index
    %c0_81 = arith.constant 0 : index
    %114 = vector.load %arg10[%c0_78, %c1_79, %c0_80, %c0_81] : memref<2x4x1x8xf32, #tpu.memory_space<vmem>>, vector<1x1x1x8xf32>
    %115 = vector.shape_cast %114 : vector<1x1x1x8xf32> to vector<1x8xf32>
    %116 = vector.broadcast %115 : vector<1x8xf32> to vector<16x8xf32>
    %117 = arith.addf %113, %116 : vector<16x8xf32>
    %c0_82 = arith.constant 0 : index
    %c1_83 = arith.constant 1 : index
    %c0_84 = arith.constant 0 : index
    %c0_85 = arith.constant 0 : index
    %118 = vector.load %arg8[%c0_82, %c1_83, %c0_84, %c0_85] : memref<2x4x32x8xf32, #tpu.memory_space<vmem>>, vector<1x1x32x8xf32>
    %119 = vector.shape_cast %118 : vector<1x1x32x8xf32> to vector<32x8xf32>
    %cst_86 = arith.constant dense<0.000000e+00> : vector<16x8xf32>
    %120 = tpu.matmul %34, %119, %cst_86 {dimension_numbers = #tpu.dot_dimension_numbers<[1], [0], [0], [1], [0, 0, 1, 1], [], []>} : vector<16x32xf32>, vector<32x8xf32>, vector<16x8xf32> -> vector<16x8xf32>
    %c0_87 = arith.constant 0 : index
    %c1_88 = arith.constant 1 : index
    %c0_89 = arith.constant 0 : index
    %c0_90 = arith.constant 0 : index
    %121 = vector.load %arg11[%c0_87, %c1_88, %c0_89, %c0_90] : memref<2x4x1x8xf32, #tpu.memory_space<vmem>>, vector<1x1x1x8xf32>
    %122 = vector.shape_cast %121 : vector<1x1x1x8xf32> to vector<1x8xf32>
    %123 = vector.broadcast %122 : vector<1x8xf32> to vector<16x8xf32>
    %124 = arith.addf %120, %123 : vector<16x8xf32>
    %125 = vector.extract_strided_slice %110 {offsets = [0, 0], sizes = [8, 8], strides = [1, 1]} : vector<16x8xf32> to vector<8x8xf32>
    %126 = vector.extract_strided_slice %117 {offsets = [0, 0], sizes = [8, 8], strides = [1, 1]} : vector<16x8xf32> to vector<8x8xf32>
    %cst_91 = arith.constant dense<0.000000e+00> : vector<8x8xf32>
    %127 = tpu.matmul %125, %126, %cst_91 {dimension_numbers = #tpu.dot_dimension_numbers<[1], [1], [0], [0], [0, 0, 1, 0], [], []>} : vector<8x8xf32>, vector<8x8xf32>, vector<8x8xf32> -> vector<8x8xf32>
    %cst_92 = arith.constant 0.353553385 : f32
    %128 = vector.broadcast %cst_92 : f32 to vector<8x8xf32>
    %129 = arith.mulf %127, %128 : vector<8x8xf32>
    %130 = vector.extract_strided_slice %40 {offsets = [0, 0], sizes = [1, 8], strides = [1, 1]} : vector<2x8xf32> to vector<1x8xf32>
    %131 = vector.broadcast %130 : vector<1x8xf32> to vector<8x8xf32>
    %132 = arith.addf %129, %131 : vector<8x8xf32>
    %133 = math.exp %132 : vector<8x8xf32>
    %cst_93 = arith.constant dense<0.000000e+00> : vector<8xf32>
    %134 = vector.multi_reduction <add>, %133, %cst_93 [1] : vector<8x8xf32> to vector<8xf32>
    %135 = vector.shape_cast %134 : vector<8xf32> to vector<8x1xf32>
    %136 = tpu.reciprocal %135 : vector<8x1xf32> -> vector<8x1xf32>
    %137 = vector.broadcast %136 : vector<8x1xf32> to vector<8x8xf32>
    %138 = arith.mulf %133, %137 : vector<8x8xf32>
    %139 = vector.extract_strided_slice %124 {offsets = [0, 0], sizes = [8, 8], strides = [1, 1]} : vector<16x8xf32> to vector<8x8xf32>
    %cst_94 = arith.constant dense<0.000000e+00> : vector<8x8xf32>
    %140 = tpu.matmul %138, %139, %cst_94 {dimension_numbers = #tpu.dot_dimension_numbers<[1], [0], [0], [1], [0, 0, 1, 1], [], []>} : vector<8x8xf32>, vector<8x8xf32>, vector<8x8xf32> -> vector<8x8xf32>
    %c0_95 = arith.constant 0 : index
    %c1_96 = arith.constant 1 : index
    %c0_97 = arith.constant 0 : index
    %c0_98 = arith.constant 0 : index
    %141 = vector.load %arg12[%c0_95, %c1_96, %c0_97, %c0_98] : memref<2x4x8x32xf32, #tpu.memory_space<vmem>>, vector<1x1x8x32xf32>
    %142 = vector.shape_cast %141 : vector<1x1x8x32xf32> to vector<8x32xf32>
    %cst_99 = arith.constant dense<0.000000e+00> : vector<8x32xf32>
    %143 = tpu.matmul %140, %142, %cst_99 {dimension_numbers = #tpu.dot_dimension_numbers<[1], [0], [0], [1], [0, 0, 1, 1], [], []>} : vector<8x8xf32>, vector<8x32xf32>, vector<8x32xf32> -> vector<8x32xf32>
    %144 = arith.addf %83, %143 : vector<8x32xf32>
    %145 = vector.extract_strided_slice %110 {offsets = [8, 0], sizes = [8, 8], strides = [1, 1]} : vector<16x8xf32> to vector<8x8xf32>
    %146 = vector.extract_strided_slice %117 {offsets = [8, 0], sizes = [8, 8], strides = [1, 1]} : vector<16x8xf32> to vector<8x8xf32>
    %cst_100 = arith.constant dense<0.000000e+00> : vector<8x8xf32>
    %147 = tpu.matmul %145, %146, %cst_100 {dimension_numbers = #tpu.dot_dimension_numbers<[1], [1], [0], [0], [0, 0, 1, 0], [], []>} : vector<8x8xf32>, vector<8x8xf32>, vector<8x8xf32> -> vector<8x8xf32>
    %cst_101 = arith.constant 0.353553385 : f32
    %148 = vector.broadcast %cst_101 : f32 to vector<8x8xf32>
    %149 = arith.mulf %147, %148 : vector<8x8xf32>
    %150 = vector.extract_strided_slice %40 {offsets = [1, 0], sizes = [1, 8], strides = [1, 1]} : vector<2x8xf32> to vector<1x8xf32>
    %151 = vector.broadcast %150 : vector<1x8xf32> to vector<8x8xf32>
    %152 = arith.addf %149, %151 : vector<8x8xf32>
    %153 = math.exp %152 : vector<8x8xf32>
    %cst_102 = arith.constant dense<0.000000e+00> : vector<8xf32>
    %154 = vector.multi_reduction <add>, %153, %cst_102 [1] : vector<8x8xf32> to vector<8xf32>
    %155 = vector.shape_cast %154 : vector<8xf32> to vector<8x1xf32>
    %156 = tpu.reciprocal %155 : vector<8x1xf32> -> vector<8x1xf32>
    %157 = vector.broadcast %156 : vector<8x1xf32> to vector<8x8xf32>
    %158 = arith.mulf %153, %157 : vector<8x8xf32>
    %159 = vector.extract_strided_slice %124 {offsets = [8, 0], sizes = [8, 8], strides = [1, 1]} : vector<16x8xf32> to vector<8x8xf32>
    %cst_103 = arith.constant dense<0.000000e+00> : vector<8x8xf32>
    %160 = tpu.matmul %158, %159, %cst_103 {dimension_numbers = #tpu.dot_dimension_numbers<[1], [0], [0], [1], [0, 0, 1, 1], [], []>} : vector<8x8xf32>, vector<8x8xf32>, vector<8x8xf32> -> vector<8x8xf32>
    %c0_104 = arith.constant 0 : index
    %c1_105 = arith.constant 1 : index
    %c0_106 = arith.constant 0 : index
    %c0_107 = arith.constant 0 : index
    %161 = vector.load %arg12[%c0_104, %c1_105, %c0_106, %c0_107] : memref<2x4x8x32xf32, #tpu.memory_space<vmem>>, vector<1x1x8x32xf32>
    %162 = vector.shape_cast %161 : vector<1x1x8x32xf32> to vector<8x32xf32>
    %cst_108 = arith.constant dense<0.000000e+00> : vector<8x32xf32>
    %163 = tpu.matmul %160, %162, %cst_108 {dimension_numbers = #tpu.dot_dimension_numbers<[1], [0], [0], [1], [0, 0, 1, 1], [], []>} : vector<8x8xf32>, vector<8x32xf32>, vector<8x32xf32> -> vector<8x32xf32>
    %164 = arith.addf %103, %163 : vector<8x32xf32>
    %c0_109 = arith.constant 0 : index
    %c2 = arith.constant 2 : index
    %c0_110 = arith.constant 0 : index
    %c0_111 = arith.constant 0 : index
    %165 = vector.load %arg6[%c0_109, %c2, %c0_110, %c0_111] : memref<2x4x32x8xf32, #tpu.memory_space<vmem>>, vector<1x1x32x8xf32>
    %166 = vector.shape_cast %165 : vector<1x1x32x8xf32> to vector<32x8xf32>
    %cst_112 = arith.constant dense<0.000000e+00> : vector<16x8xf32>
    %167 = tpu.matmul %34, %166, %cst_112 {dimension_numbers = #tpu.dot_dimension_numbers<[1], [0], [0], [1], [0, 0, 1, 1], [], []>} : vector<16x32xf32>, vector<32x8xf32>, vector<16x8xf32> -> vector<16x8xf32>
    %c0_113 = arith.constant 0 : index
    %c2_114 = arith.constant 2 : index
    %c0_115 = arith.constant 0 : index
    %c0_116 = arith.constant 0 : index
    %168 = vector.load %arg9[%c0_113, %c2_114, %c0_115, %c0_116] : memref<2x4x1x8xf32, #tpu.memory_space<vmem>>, vector<1x1x1x8xf32>
    %169 = vector.shape_cast %168 : vector<1x1x1x8xf32> to vector<1x8xf32>
    %170 = vector.broadcast %169 : vector<1x8xf32> to vector<16x8xf32>
    %171 = arith.addf %167, %170 : vector<16x8xf32>
    %c0_117 = arith.constant 0 : index
    %c2_118 = arith.constant 2 : index
    %c0_119 = arith.constant 0 : index
    %c0_120 = arith.constant 0 : index
    %172 = vector.load %arg7[%c0_117, %c2_118, %c0_119, %c0_120] : memref<2x4x32x8xf32, #tpu.memory_space<vmem>>, vector<1x1x32x8xf32>
    %173 = vector.shape_cast %172 : vector<1x1x32x8xf32> to vector<32x8xf32>
    %cst_121 = arith.constant dense<0.000000e+00> : vector<16x8xf32>
    %174 = tpu.matmul %34, %173, %cst_121 {dimension_numbers = #tpu.dot_dimension_numbers<[1], [0], [0], [1], [0, 0, 1, 1], [], []>} : vector<16x32xf32>, vector<32x8xf32>, vector<16x8xf32> -> vector<16x8xf32>
    %c0_122 = arith.constant 0 : index
    %c2_123 = arith.constant 2 : index
    %c0_124 = arith.constant 0 : index
    %c0_125 = arith.constant 0 : index
    %175 = vector.load %arg10[%c0_122, %c2_123, %c0_124, %c0_125] : memref<2x4x1x8xf32, #tpu.memory_space<vmem>>, vector<1x1x1x8xf32>
    %176 = vector.shape_cast %175 : vector<1x1x1x8xf32> to vector<1x8xf32>
    %177 = vector.broadcast %176 : vector<1x8xf32> to vector<16x8xf32>
    %178 = arith.addf %174, %177 : vector<16x8xf32>
    %c0_126 = arith.constant 0 : index
    %c2_127 = arith.constant 2 : index
    %c0_128 = arith.constant 0 : index
    %c0_129 = arith.constant 0 : index
    %179 = vector.load %arg8[%c0_126, %c2_127, %c0_128, %c0_129] : memref<2x4x32x8xf32, #tpu.memory_space<vmem>>, vector<1x1x32x8xf32>
    %180 = vector.shape_cast %179 : vector<1x1x32x8xf32> to vector<32x8xf32>
    %cst_130 = arith.constant dense<0.000000e+00> : vector<16x8xf32>
    %181 = tpu.matmul %34, %180, %cst_130 {dimension_numbers = #tpu.dot_dimension_numbers<[1], [0], [0], [1], [0, 0, 1, 1], [], []>} : vector<16x32xf32>, vector<32x8xf32>, vector<16x8xf32> -> vector<16x8xf32>
    %c0_131 = arith.constant 0 : index
    %c2_132 = arith.constant 2 : index
    %c0_133 = arith.constant 0 : index
    %c0_134 = arith.constant 0 : index
    %182 = vector.load %arg11[%c0_131, %c2_132, %c0_133, %c0_134] : memref<2x4x1x8xf32, #tpu.memory_space<vmem>>, vector<1x1x1x8xf32>
    %183 = vector.shape_cast %182 : vector<1x1x1x8xf32> to vector<1x8xf32>
    %184 = vector.broadcast %183 : vector<1x8xf32> to vector<16x8xf32>
    %185 = arith.addf %181, %184 : vector<16x8xf32>
    %186 = vector.extract_strided_slice %171 {offsets = [0, 0], sizes = [8, 8], strides = [1, 1]} : vector<16x8xf32> to vector<8x8xf32>
    %187 = vector.extract_strided_slice %178 {offsets = [0, 0], sizes = [8, 8], strides = [1, 1]} : vector<16x8xf32> to vector<8x8xf32>
    %cst_135 = arith.constant dense<0.000000e+00> : vector<8x8xf32>
    %188 = tpu.matmul %186, %187, %cst_135 {dimension_numbers = #tpu.dot_dimension_numbers<[1], [1], [0], [0], [0, 0, 1, 0], [], []>} : vector<8x8xf32>, vector<8x8xf32>, vector<8x8xf32> -> vector<8x8xf32>
    %cst_136 = arith.constant 0.353553385 : f32
    %189 = vector.broadcast %cst_136 : f32 to vector<8x8xf32>
    %190 = arith.mulf %188, %189 : vector<8x8xf32>
    %191 = vector.extract_strided_slice %40 {offsets = [0, 0], sizes = [1, 8], strides = [1, 1]} : vector<2x8xf32> to vector<1x8xf32>
    %192 = vector.broadcast %191 : vector<1x8xf32> to vector<8x8xf32>
    %193 = arith.addf %190, %192 : vector<8x8xf32>
    %194 = math.exp %193 : vector<8x8xf32>
    %cst_137 = arith.constant dense<0.000000e+00> : vector<8xf32>
    %195 = vector.multi_reduction <add>, %194, %cst_137 [1] : vector<8x8xf32> to vector<8xf32>
    %196 = vector.shape_cast %195 : vector<8xf32> to vector<8x1xf32>
    %197 = tpu.reciprocal %196 : vector<8x1xf32> -> vector<8x1xf32>
    %198 = vector.broadcast %197 : vector<8x1xf32> to vector<8x8xf32>
    %199 = arith.mulf %194, %198 : vector<8x8xf32>
    %200 = vector.extract_strided_slice %185 {offsets = [0, 0], sizes = [8, 8], strides = [1, 1]} : vector<16x8xf32> to vector<8x8xf32>
    %cst_138 = arith.constant dense<0.000000e+00> : vector<8x8xf32>
    %201 = tpu.matmul %199, %200, %cst_138 {dimension_numbers = #tpu.dot_dimension_numbers<[1], [0], [0], [1], [0, 0, 1, 1], [], []>} : vector<8x8xf32>, vector<8x8xf32>, vector<8x8xf32> -> vector<8x8xf32>
    %c0_139 = arith.constant 0 : index
    %c2_140 = arith.constant 2 : index
    %c0_141 = arith.constant 0 : index
    %c0_142 = arith.constant 0 : index
    %202 = vector.load %arg12[%c0_139, %c2_140, %c0_141, %c0_142] : memref<2x4x8x32xf32, #tpu.memory_space<vmem>>, vector<1x1x8x32xf32>
    %203 = vector.shape_cast %202 : vector<1x1x8x32xf32> to vector<8x32xf32>
    %cst_143 = arith.constant dense<0.000000e+00> : vector<8x32xf32>
    %204 = tpu.matmul %201, %203, %cst_143 {dimension_numbers = #tpu.dot_dimension_numbers<[1], [0], [0], [1], [0, 0, 1, 1], [], []>} : vector<8x8xf32>, vector<8x32xf32>, vector<8x32xf32> -> vector<8x32xf32>
    %205 = arith.addf %144, %204 : vector<8x32xf32>
    %206 = vector.extract_strided_slice %171 {offsets = [8, 0], sizes = [8, 8], strides = [1, 1]} : vector<16x8xf32> to vector<8x8xf32>
    %207 = vector.extract_strided_slice %178 {offsets = [8, 0], sizes = [8, 8], strides = [1, 1]} : vector<16x8xf32> to vector<8x8xf32>
    %cst_144 = arith.constant dense<0.000000e+00> : vector<8x8xf32>
    %208 = tpu.matmul %206, %207, %cst_144 {dimension_numbers = #tpu.dot_dimension_numbers<[1], [1], [0], [0], [0, 0, 1, 0], [], []>} : vector<8x8xf32>, vector<8x8xf32>, vector<8x8xf32> -> vector<8x8xf32>
    %cst_145 = arith.constant 0.353553385 : f32
    %209 = vector.broadcast %cst_145 : f32 to vector<8x8xf32>
    %210 = arith.mulf %208, %209 : vector<8x8xf32>
    %211 = vector.extract_strided_slice %40 {offsets = [1, 0], sizes = [1, 8], strides = [1, 1]} : vector<2x8xf32> to vector<1x8xf32>
    %212 = vector.broadcast %211 : vector<1x8xf32> to vector<8x8xf32>
    %213 = arith.addf %210, %212 : vector<8x8xf32>
    %214 = math.exp %213 : vector<8x8xf32>
    %cst_146 = arith.constant dense<0.000000e+00> : vector<8xf32>
    %215 = vector.multi_reduction <add>, %214, %cst_146 [1] : vector<8x8xf32> to vector<8xf32>
    %216 = vector.shape_cast %215 : vector<8xf32> to vector<8x1xf32>
    %217 = tpu.reciprocal %216 : vector<8x1xf32> -> vector<8x1xf32>
    %218 = vector.broadcast %217 : vector<8x1xf32> to vector<8x8xf32>
    %219 = arith.mulf %214, %218 : vector<8x8xf32>
    %220 = vector.extract_strided_slice %185 {offsets = [8, 0], sizes = [8, 8], strides = [1, 1]} : vector<16x8xf32> to vector<8x8xf32>
    %cst_147 = arith.constant dense<0.000000e+00> : vector<8x8xf32>
    %221 = tpu.matmul %219, %220, %cst_147 {dimension_numbers = #tpu.dot_dimension_numbers<[1], [0], [0], [1], [0, 0, 1, 1], [], []>} : vector<8x8xf32>, vector<8x8xf32>, vector<8x8xf32> -> vector<8x8xf32>
    %c0_148 = arith.constant 0 : index
    %c2_149 = arith.constant 2 : index
    %c0_150 = arith.constant 0 : index
    %c0_151 = arith.constant 0 : index
    %222 = vector.load %arg12[%c0_148, %c2_149, %c0_150, %c0_151] : memref<2x4x8x32xf32, #tpu.memory_space<vmem>>, vector<1x1x8x32xf32>
    %223 = vector.shape_cast %222 : vector<1x1x8x32xf32> to vector<8x32xf32>
    %cst_152 = arith.constant dense<0.000000e+00> : vector<8x32xf32>
    %224 = tpu.matmul %221, %223, %cst_152 {dimension_numbers = #tpu.dot_dimension_numbers<[1], [0], [0], [1], [0, 0, 1, 1], [], []>} : vector<8x8xf32>, vector<8x32xf32>, vector<8x32xf32> -> vector<8x32xf32>
    %225 = arith.addf %164, %224 : vector<8x32xf32>
    %c0_153 = arith.constant 0 : index
    %c3 = arith.constant 3 : index
    %c0_154 = arith.constant 0 : index
    %c0_155 = arith.constant 0 : index
    %226 = vector.load %arg6[%c0_153, %c3, %c0_154, %c0_155] : memref<2x4x32x8xf32, #tpu.memory_space<vmem>>, vector<1x1x32x8xf32>
    %227 = vector.shape_cast %226 : vector<1x1x32x8xf32> to vector<32x8xf32>
    %cst_156 = arith.constant dense<0.000000e+00> : vector<16x8xf32>
    %228 = tpu.matmul %34, %227, %cst_156 {dimension_numbers = #tpu.dot_dimension_numbers<[1], [0], [0], [1], [0, 0, 1, 1], [], []>} : vector<16x32xf32>, vector<32x8xf32>, vector<16x8xf32> -> vector<16x8xf32>
    %c0_157 = arith.constant 0 : index
    %c3_158 = arith.constant 3 : index
    %c0_159 = arith.constant 0 : index
    %c0_160 = arith.constant 0 : index
    %229 = vector.load %arg9[%c0_157, %c3_158, %c0_159, %c0_160] : memref<2x4x1x8xf32, #tpu.memory_space<vmem>>, vector<1x1x1x8xf32>
    %230 = vector.shape_cast %229 : vector<1x1x1x8xf32> to vector<1x8xf32>
    %231 = vector.broadcast %230 : vector<1x8xf32> to vector<16x8xf32>
    %232 = arith.addf %228, %231 : vector<16x8xf32>
    %c0_161 = arith.constant 0 : index
    %c3_162 = arith.constant 3 : index
    %c0_163 = arith.constant 0 : index
    %c0_164 = arith.constant 0 : index
    %233 = vector.load %arg7[%c0_161, %c3_162, %c0_163, %c0_164] : memref<2x4x32x8xf32, #tpu.memory_space<vmem>>, vector<1x1x32x8xf32>
    %234 = vector.shape_cast %233 : vector<1x1x32x8xf32> to vector<32x8xf32>
    %cst_165 = arith.constant dense<0.000000e+00> : vector<16x8xf32>
    %235 = tpu.matmul %34, %234, %cst_165 {dimension_numbers = #tpu.dot_dimension_numbers<[1], [0], [0], [1], [0, 0, 1, 1], [], []>} : vector<16x32xf32>, vector<32x8xf32>, vector<16x8xf32> -> vector<16x8xf32>
    %c0_166 = arith.constant 0 : index
    %c3_167 = arith.constant 3 : index
    %c0_168 = arith.constant 0 : index
    %c0_169 = arith.constant 0 : index
    %236 = vector.load %arg10[%c0_166, %c3_167, %c0_168, %c0_169] : memref<2x4x1x8xf32, #tpu.memory_space<vmem>>, vector<1x1x1x8xf32>
    %237 = vector.shape_cast %236 : vector<1x1x1x8xf32> to vector<1x8xf32>
    %238 = vector.broadcast %237 : vector<1x8xf32> to vector<16x8xf32>
    %239 = arith.addf %235, %238 : vector<16x8xf32>
    %c0_170 = arith.constant 0 : index
    %c3_171 = arith.constant 3 : index
    %c0_172 = arith.constant 0 : index
    %c0_173 = arith.constant 0 : index
    %240 = vector.load %arg8[%c0_170, %c3_171, %c0_172, %c0_173] : memref<2x4x32x8xf32, #tpu.memory_space<vmem>>, vector<1x1x32x8xf32>
    %241 = vector.shape_cast %240 : vector<1x1x32x8xf32> to vector<32x8xf32>
    %cst_174 = arith.constant dense<0.000000e+00> : vector<16x8xf32>
    %242 = tpu.matmul %34, %241, %cst_174 {dimension_numbers = #tpu.dot_dimension_numbers<[1], [0], [0], [1], [0, 0, 1, 1], [], []>} : vector<16x32xf32>, vector<32x8xf32>, vector<16x8xf32> -> vector<16x8xf32>
    %c0_175 = arith.constant 0 : index
    %c3_176 = arith.constant 3 : index
    %c0_177 = arith.constant 0 : index
    %c0_178 = arith.constant 0 : index
    %243 = vector.load %arg11[%c0_175, %c3_176, %c0_177, %c0_178] : memref<2x4x1x8xf32, #tpu.memory_space<vmem>>, vector<1x1x1x8xf32>
    %244 = vector.shape_cast %243 : vector<1x1x1x8xf32> to vector<1x8xf32>
    %245 = vector.broadcast %244 : vector<1x8xf32> to vector<16x8xf32>
    %246 = arith.addf %242, %245 : vector<16x8xf32>
    %247 = vector.extract_strided_slice %232 {offsets = [0, 0], sizes = [8, 8], strides = [1, 1]} : vector<16x8xf32> to vector<8x8xf32>
    %248 = vector.extract_strided_slice %239 {offsets = [0, 0], sizes = [8, 8], strides = [1, 1]} : vector<16x8xf32> to vector<8x8xf32>
    %cst_179 = arith.constant dense<0.000000e+00> : vector<8x8xf32>
    %249 = tpu.matmul %247, %248, %cst_179 {dimension_numbers = #tpu.dot_dimension_numbers<[1], [1], [0], [0], [0, 0, 1, 0], [], []>} : vector<8x8xf32>, vector<8x8xf32>, vector<8x8xf32> -> vector<8x8xf32>
    %cst_180 = arith.constant 0.353553385 : f32
    %250 = vector.broadcast %cst_180 : f32 to vector<8x8xf32>
    %251 = arith.mulf %249, %250 : vector<8x8xf32>
    %252 = vector.extract_strided_slice %40 {offsets = [0, 0], sizes = [1, 8], strides = [1, 1]} : vector<2x8xf32> to vector<1x8xf32>
    %253 = vector.broadcast %252 : vector<1x8xf32> to vector<8x8xf32>
    %254 = arith.addf %251, %253 : vector<8x8xf32>
    %255 = math.exp %254 : vector<8x8xf32>
    %cst_181 = arith.constant dense<0.000000e+00> : vector<8xf32>
    %256 = vector.multi_reduction <add>, %255, %cst_181 [1] : vector<8x8xf32> to vector<8xf32>
    %257 = vector.shape_cast %256 : vector<8xf32> to vector<8x1xf32>
    %258 = tpu.reciprocal %257 : vector<8x1xf32> -> vector<8x1xf32>
    %259 = vector.broadcast %258 : vector<8x1xf32> to vector<8x8xf32>
    %260 = arith.mulf %255, %259 : vector<8x8xf32>
    %261 = vector.extract_strided_slice %246 {offsets = [0, 0], sizes = [8, 8], strides = [1, 1]} : vector<16x8xf32> to vector<8x8xf32>
    %cst_182 = arith.constant dense<0.000000e+00> : vector<8x8xf32>
    %262 = tpu.matmul %260, %261, %cst_182 {dimension_numbers = #tpu.dot_dimension_numbers<[1], [0], [0], [1], [0, 0, 1, 1], [], []>} : vector<8x8xf32>, vector<8x8xf32>, vector<8x8xf32> -> vector<8x8xf32>
    %c0_183 = arith.constant 0 : index
    %c3_184 = arith.constant 3 : index
    %c0_185 = arith.constant 0 : index
    %c0_186 = arith.constant 0 : index
    %263 = vector.load %arg12[%c0_183, %c3_184, %c0_185, %c0_186] : memref<2x4x8x32xf32, #tpu.memory_space<vmem>>, vector<1x1x8x32xf32>
    %264 = vector.shape_cast %263 : vector<1x1x8x32xf32> to vector<8x32xf32>
    %cst_187 = arith.constant dense<0.000000e+00> : vector<8x32xf32>
    %265 = tpu.matmul %262, %264, %cst_187 {dimension_numbers = #tpu.dot_dimension_numbers<[1], [0], [0], [1], [0, 0, 1, 1], [], []>} : vector<8x8xf32>, vector<8x32xf32>, vector<8x32xf32> -> vector<8x32xf32>
    %266 = arith.addf %205, %265 : vector<8x32xf32>
    %267 = vector.extract_strided_slice %232 {offsets = [8, 0], sizes = [8, 8], strides = [1, 1]} : vector<16x8xf32> to vector<8x8xf32>
    %268 = vector.extract_strided_slice %239 {offsets = [8, 0], sizes = [8, 8], strides = [1, 1]} : vector<16x8xf32> to vector<8x8xf32>
    %cst_188 = arith.constant dense<0.000000e+00> : vector<8x8xf32>
    %269 = tpu.matmul %267, %268, %cst_188 {dimension_numbers = #tpu.dot_dimension_numbers<[1], [1], [0], [0], [0, 0, 1, 0], [], []>} : vector<8x8xf32>, vector<8x8xf32>, vector<8x8xf32> -> vector<8x8xf32>
    %cst_189 = arith.constant 0.353553385 : f32
    %270 = vector.broadcast %cst_189 : f32 to vector<8x8xf32>
    %271 = arith.mulf %269, %270 : vector<8x8xf32>
    %272 = vector.extract_strided_slice %40 {offsets = [1, 0], sizes = [1, 8], strides = [1, 1]} : vector<2x8xf32> to vector<1x8xf32>
    %273 = vector.broadcast %272 : vector<1x8xf32> to vector<8x8xf32>
    %274 = arith.addf %271, %273 : vector<8x8xf32>
    %275 = math.exp %274 : vector<8x8xf32>
    %cst_190 = arith.constant dense<0.000000e+00> : vector<8xf32>
    %276 = vector.multi_reduction <add>, %275, %cst_190 [1] : vector<8x8xf32> to vector<8xf32>
    %277 = vector.shape_cast %276 : vector<8xf32> to vector<8x1xf32>
    %278 = tpu.reciprocal %277 : vector<8x1xf32> -> vector<8x1xf32>
    %279 = vector.broadcast %278 : vector<8x1xf32> to vector<8x8xf32>
    %280 = arith.mulf %275, %279 : vector<8x8xf32>
    %281 = vector.extract_strided_slice %246 {offsets = [8, 0], sizes = [8, 8], strides = [1, 1]} : vector<16x8xf32> to vector<8x8xf32>
    %cst_191 = arith.constant dense<0.000000e+00> : vector<8x8xf32>
    %282 = tpu.matmul %280, %281, %cst_191 {dimension_numbers = #tpu.dot_dimension_numbers<[1], [0], [0], [1], [0, 0, 1, 1], [], []>} : vector<8x8xf32>, vector<8x8xf32>, vector<8x8xf32> -> vector<8x8xf32>
    %c0_192 = arith.constant 0 : index
    %c3_193 = arith.constant 3 : index
    %c0_194 = arith.constant 0 : index
    %c0_195 = arith.constant 0 : index
    %283 = vector.load %arg12[%c0_192, %c3_193, %c0_194, %c0_195] : memref<2x4x8x32xf32, #tpu.memory_space<vmem>>, vector<1x1x8x32xf32>
    %284 = vector.shape_cast %283 : vector<1x1x8x32xf32> to vector<8x32xf32>
    %cst_196 = arith.constant dense<0.000000e+00> : vector<8x32xf32>
    %285 = tpu.matmul %282, %284, %cst_196 {dimension_numbers = #tpu.dot_dimension_numbers<[1], [0], [0], [1], [0, 0, 1, 1], [], []>} : vector<8x8xf32>, vector<8x32xf32>, vector<8x32xf32> -> vector<8x32xf32>
    %286 = arith.addf %225, %285 : vector<8x32xf32>
    %287 = tpu.concatenate %266, %286 in 0 : vector<8x32xf32>, vector<8x32xf32> -> vector<16x32xf32>
    %c0_197 = arith.constant 0 : index
    %c0_198 = arith.constant 0 : index
    %c0_199 = arith.constant 0 : index
    %288 = vector.load %arg13[%c0_197, %c0_198, %c0_199] : memref<2x1x32xf32, #tpu.memory_space<vmem>>, vector<1x1x32xf32>
    %289 = vector.shape_cast %288 : vector<1x1x32xf32> to vector<1x32xf32>
    %290 = vector.broadcast %289 : vector<1x32xf32> to vector<16x32xf32>
    %291 = arith.addf %287, %290 : vector<16x32xf32>
    %292 = arith.addf %291, %34 : vector<16x32xf32>
    %c0_200 = arith.constant 0 : index
    %c0_201 = arith.constant 0 : index
    %c0_202 = arith.constant 0 : index
    %293 = vector.load %arg14[%c0_200, %c0_201, %c0_202] : memref<2x1x32xf32, #tpu.memory_space<vmem>>, vector<1x1x32xf32>
    %294 = vector.shape_cast %293 : vector<1x1x32xf32> to vector<1x32xf32>
    %c0_203 = arith.constant 0 : index
    %c0_204 = arith.constant 0 : index
    %c0_205 = arith.constant 0 : index
    %295 = vector.load %arg15[%c0_203, %c0_204, %c0_205] : memref<2x1x32xf32, #tpu.memory_space<vmem>>, vector<1x1x32xf32>
    %296 = vector.shape_cast %295 : vector<1x1x32xf32> to vector<1x32xf32>
    %cst_206 = arith.constant dense<0.000000e+00> : vector<16xf32>
    %297 = vector.multi_reduction <add>, %292, %cst_206 [1] : vector<16x32xf32> to vector<16xf32>
    %298 = vector.shape_cast %297 : vector<16xf32> to vector<16x1xf32>
    %cst_207 = arith.constant 3.200000e+01 : f32
    %299 = vector.broadcast %cst_207 : f32 to vector<16x1xf32>
    %300 = arith.divf %298, %299 : vector<16x1xf32>
    %301 = vector.broadcast %300 : vector<16x1xf32> to vector<16x32xf32>
    %302 = arith.subf %292, %301 : vector<16x32xf32>
    %303 = arith.mulf %302, %302 : vector<16x32xf32>
    %cst_208 = arith.constant dense<0.000000e+00> : vector<16xf32>
    %304 = vector.multi_reduction <add>, %303, %cst_208 [1] : vector<16x32xf32> to vector<16xf32>
    %305 = vector.shape_cast %304 : vector<16xf32> to vector<16x1xf32>
    %cst_209 = arith.constant 3.200000e+01 : f32
    %306 = vector.broadcast %cst_209 : f32 to vector<16x1xf32>
    %307 = arith.divf %305, %306 : vector<16x1xf32>
    %308 = vector.broadcast %300 : vector<16x1xf32> to vector<16x32xf32>
    %309 = arith.subf %292, %308 : vector<16x32xf32>
    %cst_210 = arith.constant 9.99999996E-13 : f32
    %310 = vector.broadcast %cst_210 : f32 to vector<16x1xf32>
    %311 = arith.addf %307, %310 : vector<16x1xf32>
    %312 = math.rsqrt %311 : vector<16x1xf32>
    %313 = vector.broadcast %312 : vector<16x1xf32> to vector<16x32xf32>
    %314 = arith.mulf %309, %313 : vector<16x32xf32>
    %315 = vector.broadcast %294 : vector<1x32xf32> to vector<16x32xf32>
    %316 = arith.mulf %314, %315 : vector<16x32xf32>
    %317 = vector.broadcast %296 : vector<1x32xf32> to vector<16x32xf32>
    %318 = arith.addf %316, %317 : vector<16x32xf32>
    %c0_211 = arith.constant 0 : index
    %c0_212 = arith.constant 0 : index
    %c0_213 = arith.constant 0 : index
    %319 = vector.load %arg16[%c0_211, %c0_212, %c0_213] : memref<2x32x64xf32, #tpu.memory_space<vmem>>, vector<1x32x64xf32>
    %320 = vector.shape_cast %319 : vector<1x32x64xf32> to vector<32x64xf32>
    %cst_214 = arith.constant dense<0.000000e+00> : vector<16x64xf32>
    %321 = tpu.matmul %318, %320, %cst_214 {dimension_numbers = #tpu.dot_dimension_numbers<[1], [0], [0], [1], [0, 0, 1, 1], [], []>} : vector<16x32xf32>, vector<32x64xf32>, vector<16x64xf32> -> vector<16x64xf32>
    %c0_215 = arith.constant 0 : index
    %c0_216 = arith.constant 0 : index
    %c0_217 = arith.constant 0 : index
    %322 = vector.load %arg17[%c0_215, %c0_216, %c0_217] : memref<2x1x64xf32, #tpu.memory_space<vmem>>, vector<1x1x64xf32>
    %323 = vector.shape_cast %322 : vector<1x1x64xf32> to vector<1x64xf32>
    %324 = vector.broadcast %323 : vector<1x64xf32> to vector<16x64xf32>
    %325 = arith.addf %321, %324 : vector<16x64xf32>
    %326 = arith.mulf %325, %325 : vector<16x64xf32>
    %327 = arith.mulf %325, %326 : vector<16x64xf32>
    %cst_218 = arith.constant 4.471500e-02 : f32
    %328 = vector.broadcast %cst_218 : f32 to vector<16x64xf32>
    %329 = arith.mulf %328, %327 : vector<16x64xf32>
    %330 = arith.addf %325, %329 : vector<16x64xf32>
    %cst_219 = arith.constant 0.797884583 : f32
    %331 = vector.broadcast %cst_219 : f32 to vector<16x64xf32>
    %332 = arith.mulf %331, %330 : vector<16x64xf32>
    %333 = math.tanh %332 : vector<16x64xf32>
    %cst_220 = arith.constant 1.000000e+00 : f32
    %334 = vector.broadcast %cst_220 : f32 to vector<16x64xf32>
    %335 = arith.addf %334, %333 : vector<16x64xf32>
    %cst_221 = arith.constant 5.000000e-01 : f32
    %336 = vector.broadcast %cst_221 : f32 to vector<16x64xf32>
    %337 = arith.mulf %336, %335 : vector<16x64xf32>
    %338 = arith.mulf %325, %337 : vector<16x64xf32>
    %c0_222 = arith.constant 0 : index
    %c0_223 = arith.constant 0 : index
    %c0_224 = arith.constant 0 : index
    %339 = vector.load %arg18[%c0_222, %c0_223, %c0_224] : memref<2x64x32xf32, #tpu.memory_space<vmem>>, vector<1x64x32xf32>
    %340 = vector.shape_cast %339 : vector<1x64x32xf32> to vector<64x32xf32>
    %cst_225 = arith.constant dense<0.000000e+00> : vector<16x32xf32>
    %341 = tpu.matmul %338, %340, %cst_225 {dimension_numbers = #tpu.dot_dimension_numbers<[1], [0], [0], [1], [0, 0, 1, 1], [], []>} : vector<16x64xf32>, vector<64x32xf32>, vector<16x32xf32> -> vector<16x32xf32>
    %c0_226 = arith.constant 0 : index
    %c0_227 = arith.constant 0 : index
    %c0_228 = arith.constant 0 : index
    %342 = vector.load %arg19[%c0_226, %c0_227, %c0_228] : memref<2x1x32xf32, #tpu.memory_space<vmem>>, vector<1x1x32xf32>
    %343 = vector.shape_cast %342 : vector<1x1x32xf32> to vector<1x32xf32>
    %344 = vector.broadcast %343 : vector<1x32xf32> to vector<16x32xf32>
    %345 = arith.addf %341, %344 : vector<16x32xf32>
    %346 = arith.addf %345, %318 : vector<16x32xf32>
    %c0_229 = arith.constant 0 : index
    %c0_230 = arith.constant 0 : index
    %c0_231 = arith.constant 0 : index
    %347 = vector.load %arg20[%c0_229, %c0_230, %c0_231] : memref<2x1x32xf32, #tpu.memory_space<vmem>>, vector<1x1x32xf32>
    %348 = vector.shape_cast %347 : vector<1x1x32xf32> to vector<1x32xf32>
    %c0_232 = arith.constant 0 : index
    %c0_233 = arith.constant 0 : index
    %c0_234 = arith.constant 0 : index
    %349 = vector.load %arg21[%c0_232, %c0_233, %c0_234] : memref<2x1x32xf32, #tpu.memory_space<vmem>>, vector<1x1x32xf32>
    %350 = vector.shape_cast %349 : vector<1x1x32xf32> to vector<1x32xf32>
    %cst_235 = arith.constant dense<0.000000e+00> : vector<16xf32>
    %351 = vector.multi_reduction <add>, %346, %cst_235 [1] : vector<16x32xf32> to vector<16xf32>
    %352 = vector.shape_cast %351 : vector<16xf32> to vector<16x1xf32>
    %cst_236 = arith.constant 3.200000e+01 : f32
    %353 = vector.broadcast %cst_236 : f32 to vector<16x1xf32>
    %354 = arith.divf %352, %353 : vector<16x1xf32>
    %355 = vector.broadcast %354 : vector<16x1xf32> to vector<16x32xf32>
    %356 = arith.subf %346, %355 : vector<16x32xf32>
    %357 = arith.mulf %356, %356 : vector<16x32xf32>
    %cst_237 = arith.constant dense<0.000000e+00> : vector<16xf32>
    %358 = vector.multi_reduction <add>, %357, %cst_237 [1] : vector<16x32xf32> to vector<16xf32>
    %359 = vector.shape_cast %358 : vector<16xf32> to vector<16x1xf32>
    %cst_238 = arith.constant 3.200000e+01 : f32
    %360 = vector.broadcast %cst_238 : f32 to vector<16x1xf32>
    %361 = arith.divf %359, %360 : vector<16x1xf32>
    %362 = vector.broadcast %354 : vector<16x1xf32> to vector<16x32xf32>
    %363 = arith.subf %346, %362 : vector<16x32xf32>
    %cst_239 = arith.constant 9.99999996E-13 : f32
    %364 = vector.broadcast %cst_239 : f32 to vector<16x1xf32>
    %365 = arith.addf %361, %364 : vector<16x1xf32>
    %366 = math.rsqrt %365 : vector<16x1xf32>
    %367 = vector.broadcast %366 : vector<16x1xf32> to vector<16x32xf32>
    %368 = arith.mulf %363, %367 : vector<16x32xf32>
    %369 = vector.broadcast %348 : vector<1x32xf32> to vector<16x32xf32>
    %370 = arith.mulf %368, %369 : vector<16x32xf32>
    %371 = vector.broadcast %350 : vector<1x32xf32> to vector<16x32xf32>
    %372 = arith.addf %370, %371 : vector<16x32xf32>
    %cst_240 = arith.constant 0.000000e+00 : f32
    %373 = vector.broadcast %cst_240 : f32 to vector<8x32xf32>
    %cst_241 = arith.constant 0.000000e+00 : f32
    %374 = vector.broadcast %cst_241 : f32 to vector<8x32xf32>
    %c1_242 = arith.constant 1 : index
    %c0_243 = arith.constant 0 : index
    %c0_244 = arith.constant 0 : index
    %c0_245 = arith.constant 0 : index
    %375 = vector.load %arg6[%c1_242, %c0_243, %c0_244, %c0_245] : memref<2x4x32x8xf32, #tpu.memory_space<vmem>>, vector<1x1x32x8xf32>
    %376 = vector.shape_cast %375 : vector<1x1x32x8xf32> to vector<32x8xf32>
    %cst_246 = arith.constant dense<0.000000e+00> : vector<16x8xf32>
    %377 = tpu.matmul %372, %376, %cst_246 {dimension_numbers = #tpu.dot_dimension_numbers<[1], [0], [0], [1], [0, 0, 1, 1], [], []>} : vector<16x32xf32>, vector<32x8xf32>, vector<16x8xf32> -> vector<16x8xf32>
    %c1_247 = arith.constant 1 : index
    %c0_248 = arith.constant 0 : index
    %c0_249 = arith.constant 0 : index
    %c0_250 = arith.constant 0 : index
    %378 = vector.load %arg9[%c1_247, %c0_248, %c0_249, %c0_250] : memref<2x4x1x8xf32, #tpu.memory_space<vmem>>, vector<1x1x1x8xf32>
    %379 = vector.shape_cast %378 : vector<1x1x1x8xf32> to vector<1x8xf32>
    %380 = vector.broadcast %379 : vector<1x8xf32> to vector<16x8xf32>
    %381 = arith.addf %377, %380 : vector<16x8xf32>
    %c1_251 = arith.constant 1 : index
    %c0_252 = arith.constant 0 : index
    %c0_253 = arith.constant 0 : index
    %c0_254 = arith.constant 0 : index
    %382 = vector.load %arg7[%c1_251, %c0_252, %c0_253, %c0_254] : memref<2x4x32x8xf32, #tpu.memory_space<vmem>>, vector<1x1x32x8xf32>
    %383 = vector.shape_cast %382 : vector<1x1x32x8xf32> to vector<32x8xf32>
    %cst_255 = arith.constant dense<0.000000e+00> : vector<16x8xf32>
    %384 = tpu.matmul %372, %383, %cst_255 {dimension_numbers = #tpu.dot_dimension_numbers<[1], [0], [0], [1], [0, 0, 1, 1], [], []>} : vector<16x32xf32>, vector<32x8xf32>, vector<16x8xf32> -> vector<16x8xf32>
    %c1_256 = arith.constant 1 : index
    %c0_257 = arith.constant 0 : index
    %c0_258 = arith.constant 0 : index
    %c0_259 = arith.constant 0 : index
    %385 = vector.load %arg10[%c1_256, %c0_257, %c0_258, %c0_259] : memref<2x4x1x8xf32, #tpu.memory_space<vmem>>, vector<1x1x1x8xf32>
    %386 = vector.shape_cast %385 : vector<1x1x1x8xf32> to vector<1x8xf32>
    %387 = vector.broadcast %386 : vector<1x8xf32> to vector<16x8xf32>
    %388 = arith.addf %384, %387 : vector<16x8xf32>
    %c1_260 = arith.constant 1 : index
    %c0_261 = arith.constant 0 : index
    %c0_262 = arith.constant 0 : index
    %c0_263 = arith.constant 0 : index
    %389 = vector.load %arg8[%c1_260, %c0_261, %c0_262, %c0_263] : memref<2x4x32x8xf32, #tpu.memory_space<vmem>>, vector<1x1x32x8xf32>
    %390 = vector.shape_cast %389 : vector<1x1x32x8xf32> to vector<32x8xf32>
    %cst_264 = arith.constant dense<0.000000e+00> : vector<16x8xf32>
    %391 = tpu.matmul %372, %390, %cst_264 {dimension_numbers = #tpu.dot_dimension_numbers<[1], [0], [0], [1], [0, 0, 1, 1], [], []>} : vector<16x32xf32>, vector<32x8xf32>, vector<16x8xf32> -> vector<16x8xf32>
    %c1_265 = arith.constant 1 : index
    %c0_266 = arith.constant 0 : index
    %c0_267 = arith.constant 0 : index
    %c0_268 = arith.constant 0 : index
    %392 = vector.load %arg11[%c1_265, %c0_266, %c0_267, %c0_268] : memref<2x4x1x8xf32, #tpu.memory_space<vmem>>, vector<1x1x1x8xf32>
    %393 = vector.shape_cast %392 : vector<1x1x1x8xf32> to vector<1x8xf32>
    %394 = vector.broadcast %393 : vector<1x8xf32> to vector<16x8xf32>
    %395 = arith.addf %391, %394 : vector<16x8xf32>
    %396 = vector.extract_strided_slice %381 {offsets = [0, 0], sizes = [8, 8], strides = [1, 1]} : vector<16x8xf32> to vector<8x8xf32>
    %397 = vector.extract_strided_slice %388 {offsets = [0, 0], sizes = [8, 8], strides = [1, 1]} : vector<16x8xf32> to vector<8x8xf32>
    %cst_269 = arith.constant dense<0.000000e+00> : vector<8x8xf32>
    %398 = tpu.matmul %396, %397, %cst_269 {dimension_numbers = #tpu.dot_dimension_numbers<[1], [1], [0], [0], [0, 0, 1, 0], [], []>} : vector<8x8xf32>, vector<8x8xf32>, vector<8x8xf32> -> vector<8x8xf32>
    %cst_270 = arith.constant 0.353553385 : f32
    %399 = vector.broadcast %cst_270 : f32 to vector<8x8xf32>
    %400 = arith.mulf %398, %399 : vector<8x8xf32>
    %401 = vector.extract_strided_slice %40 {offsets = [0, 0], sizes = [1, 8], strides = [1, 1]} : vector<2x8xf32> to vector<1x8xf32>
    %402 = vector.broadcast %401 : vector<1x8xf32> to vector<8x8xf32>
    %403 = arith.addf %400, %402 : vector<8x8xf32>
    %404 = math.exp %403 : vector<8x8xf32>
    %cst_271 = arith.constant dense<0.000000e+00> : vector<8xf32>
    %405 = vector.multi_reduction <add>, %404, %cst_271 [1] : vector<8x8xf32> to vector<8xf32>
    %406 = vector.shape_cast %405 : vector<8xf32> to vector<8x1xf32>
    %407 = tpu.reciprocal %406 : vector<8x1xf32> -> vector<8x1xf32>
    %408 = vector.broadcast %407 : vector<8x1xf32> to vector<8x8xf32>
    %409 = arith.mulf %404, %408 : vector<8x8xf32>
    %410 = vector.extract_strided_slice %395 {offsets = [0, 0], sizes = [8, 8], strides = [1, 1]} : vector<16x8xf32> to vector<8x8xf32>
    %cst_272 = arith.constant dense<0.000000e+00> : vector<8x8xf32>
    %411 = tpu.matmul %409, %410, %cst_272 {dimension_numbers = #tpu.dot_dimension_numbers<[1], [0], [0], [1], [0, 0, 1, 1], [], []>} : vector<8x8xf32>, vector<8x8xf32>, vector<8x8xf32> -> vector<8x8xf32>
    %c1_273 = arith.constant 1 : index
    %c0_274 = arith.constant 0 : index
    %c0_275 = arith.constant 0 : index
    %c0_276 = arith.constant 0 : index
    %412 = vector.load %arg12[%c1_273, %c0_274, %c0_275, %c0_276] : memref<2x4x8x32xf32, #tpu.memory_space<vmem>>, vector<1x1x8x32xf32>
    %413 = vector.shape_cast %412 : vector<1x1x8x32xf32> to vector<8x32xf32>
    %cst_277 = arith.constant dense<0.000000e+00> : vector<8x32xf32>
    %414 = tpu.matmul %411, %413, %cst_277 {dimension_numbers = #tpu.dot_dimension_numbers<[1], [0], [0], [1], [0, 0, 1, 1], [], []>} : vector<8x8xf32>, vector<8x32xf32>, vector<8x32xf32> -> vector<8x32xf32>
    %415 = arith.addf %373, %414 : vector<8x32xf32>
    %416 = vector.extract_strided_slice %381 {offsets = [8, 0], sizes = [8, 8], strides = [1, 1]} : vector<16x8xf32> to vector<8x8xf32>
    %417 = vector.extract_strided_slice %388 {offsets = [8, 0], sizes = [8, 8], strides = [1, 1]} : vector<16x8xf32> to vector<8x8xf32>
    %cst_278 = arith.constant dense<0.000000e+00> : vector<8x8xf32>
    %418 = tpu.matmul %416, %417, %cst_278 {dimension_numbers = #tpu.dot_dimension_numbers<[1], [1], [0], [0], [0, 0, 1, 0], [], []>} : vector<8x8xf32>, vector<8x8xf32>, vector<8x8xf32> -> vector<8x8xf32>
    %cst_279 = arith.constant 0.353553385 : f32
    %419 = vector.broadcast %cst_279 : f32 to vector<8x8xf32>
    %420 = arith.mulf %418, %419 : vector<8x8xf32>
    %421 = vector.extract_strided_slice %40 {offsets = [1, 0], sizes = [1, 8], strides = [1, 1]} : vector<2x8xf32> to vector<1x8xf32>
    %422 = vector.broadcast %421 : vector<1x8xf32> to vector<8x8xf32>
    %423 = arith.addf %420, %422 : vector<8x8xf32>
    %424 = math.exp %423 : vector<8x8xf32>
    %cst_280 = arith.constant dense<0.000000e+00> : vector<8xf32>
    %425 = vector.multi_reduction <add>, %424, %cst_280 [1] : vector<8x8xf32> to vector<8xf32>
    %426 = vector.shape_cast %425 : vector<8xf32> to vector<8x1xf32>
    %427 = tpu.reciprocal %426 : vector<8x1xf32> -> vector<8x1xf32>
    %428 = vector.broadcast %427 : vector<8x1xf32> to vector<8x8xf32>
    %429 = arith.mulf %424, %428 : vector<8x8xf32>
    %430 = vector.extract_strided_slice %395 {offsets = [8, 0], sizes = [8, 8], strides = [1, 1]} : vector<16x8xf32> to vector<8x8xf32>
    %cst_281 = arith.constant dense<0.000000e+00> : vector<8x8xf32>
    %431 = tpu.matmul %429, %430, %cst_281 {dimension_numbers = #tpu.dot_dimension_numbers<[1], [0], [0], [1], [0, 0, 1, 1], [], []>} : vector<8x8xf32>, vector<8x8xf32>, vector<8x8xf32> -> vector<8x8xf32>
    %c1_282 = arith.constant 1 : index
    %c0_283 = arith.constant 0 : index
    %c0_284 = arith.constant 0 : index
    %c0_285 = arith.constant 0 : index
    %432 = vector.load %arg12[%c1_282, %c0_283, %c0_284, %c0_285] : memref<2x4x8x32xf32, #tpu.memory_space<vmem>>, vector<1x1x8x32xf32>
    %433 = vector.shape_cast %432 : vector<1x1x8x32xf32> to vector<8x32xf32>
    %cst_286 = arith.constant dense<0.000000e+00> : vector<8x32xf32>
    %434 = tpu.matmul %431, %433, %cst_286 {dimension_numbers = #tpu.dot_dimension_numbers<[1], [0], [0], [1], [0, 0, 1, 1], [], []>} : vector<8x8xf32>, vector<8x32xf32>, vector<8x32xf32> -> vector<8x32xf32>
    %435 = arith.addf %374, %434 : vector<8x32xf32>
    %c1_287 = arith.constant 1 : index
    %c1_288 = arith.constant 1 : index
    %c0_289 = arith.constant 0 : index
    %c0_290 = arith.constant 0 : index
    %436 = vector.load %arg6[%c1_287, %c1_288, %c0_289, %c0_290] : memref<2x4x32x8xf32, #tpu.memory_space<vmem>>, vector<1x1x32x8xf32>
    %437 = vector.shape_cast %436 : vector<1x1x32x8xf32> to vector<32x8xf32>
    %cst_291 = arith.constant dense<0.000000e+00> : vector<16x8xf32>
    %438 = tpu.matmul %372, %437, %cst_291 {dimension_numbers = #tpu.dot_dimension_numbers<[1], [0], [0], [1], [0, 0, 1, 1], [], []>} : vector<16x32xf32>, vector<32x8xf32>, vector<16x8xf32> -> vector<16x8xf32>
    %c1_292 = arith.constant 1 : index
    %c1_293 = arith.constant 1 : index
    %c0_294 = arith.constant 0 : index
    %c0_295 = arith.constant 0 : index
    %439 = vector.load %arg9[%c1_292, %c1_293, %c0_294, %c0_295] : memref<2x4x1x8xf32, #tpu.memory_space<vmem>>, vector<1x1x1x8xf32>
    %440 = vector.shape_cast %439 : vector<1x1x1x8xf32> to vector<1x8xf32>
    %441 = vector.broadcast %440 : vector<1x8xf32> to vector<16x8xf32>
    %442 = arith.addf %438, %441 : vector<16x8xf32>
    %c1_296 = arith.constant 1 : index
    %c1_297 = arith.constant 1 : index
    %c0_298 = arith.constant 0 : index
    %c0_299 = arith.constant 0 : index
    %443 = vector.load %arg7[%c1_296, %c1_297, %c0_298, %c0_299] : memref<2x4x32x8xf32, #tpu.memory_space<vmem>>, vector<1x1x32x8xf32>
    %444 = vector.shape_cast %443 : vector<1x1x32x8xf32> to vector<32x8xf32>
    %cst_300 = arith.constant dense<0.000000e+00> : vector<16x8xf32>
    %445 = tpu.matmul %372, %444, %cst_300 {dimension_numbers = #tpu.dot_dimension_numbers<[1], [0], [0], [1], [0, 0, 1, 1], [], []>} : vector<16x32xf32>, vector<32x8xf32>, vector<16x8xf32> -> vector<16x8xf32>
    %c1_301 = arith.constant 1 : index
    %c1_302 = arith.constant 1 : index
    %c0_303 = arith.constant 0 : index
    %c0_304 = arith.constant 0 : index
    %446 = vector.load %arg10[%c1_301, %c1_302, %c0_303, %c0_304] : memref<2x4x1x8xf32, #tpu.memory_space<vmem>>, vector<1x1x1x8xf32>
    %447 = vector.shape_cast %446 : vector<1x1x1x8xf32> to vector<1x8xf32>
    %448 = vector.broadcast %447 : vector<1x8xf32> to vector<16x8xf32>
    %449 = arith.addf %445, %448 : vector<16x8xf32>
    %c1_305 = arith.constant 1 : index
    %c1_306 = arith.constant 1 : index
    %c0_307 = arith.constant 0 : index
    %c0_308 = arith.constant 0 : index
    %450 = vector.load %arg8[%c1_305, %c1_306, %c0_307, %c0_308] : memref<2x4x32x8xf32, #tpu.memory_space<vmem>>, vector<1x1x32x8xf32>
    %451 = vector.shape_cast %450 : vector<1x1x32x8xf32> to vector<32x8xf32>
    %cst_309 = arith.constant dense<0.000000e+00> : vector<16x8xf32>
    %452 = tpu.matmul %372, %451, %cst_309 {dimension_numbers = #tpu.dot_dimension_numbers<[1], [0], [0], [1], [0, 0, 1, 1], [], []>} : vector<16x32xf32>, vector<32x8xf32>, vector<16x8xf32> -> vector<16x8xf32>
    %c1_310 = arith.constant 1 : index
    %c1_311 = arith.constant 1 : index
    %c0_312 = arith.constant 0 : index
    %c0_313 = arith.constant 0 : index
    %453 = vector.load %arg11[%c1_310, %c1_311, %c0_312, %c0_313] : memref<2x4x1x8xf32, #tpu.memory_space<vmem>>, vector<1x1x1x8xf32>
    %454 = vector.shape_cast %453 : vector<1x1x1x8xf32> to vector<1x8xf32>
    %455 = vector.broadcast %454 : vector<1x8xf32> to vector<16x8xf32>
    %456 = arith.addf %452, %455 : vector<16x8xf32>
    %457 = vector.extract_strided_slice %442 {offsets = [0, 0], sizes = [8, 8], strides = [1, 1]} : vector<16x8xf32> to vector<8x8xf32>
    %458 = vector.extract_strided_slice %449 {offsets = [0, 0], sizes = [8, 8], strides = [1, 1]} : vector<16x8xf32> to vector<8x8xf32>
    %cst_314 = arith.constant dense<0.000000e+00> : vector<8x8xf32>
    %459 = tpu.matmul %457, %458, %cst_314 {dimension_numbers = #tpu.dot_dimension_numbers<[1], [1], [0], [0], [0, 0, 1, 0], [], []>} : vector<8x8xf32>, vector<8x8xf32>, vector<8x8xf32> -> vector<8x8xf32>
    %cst_315 = arith.constant 0.353553385 : f32
    %460 = vector.broadcast %cst_315 : f32 to vector<8x8xf32>
    %461 = arith.mulf %459, %460 : vector<8x8xf32>
    %462 = vector.extract_strided_slice %40 {offsets = [0, 0], sizes = [1, 8], strides = [1, 1]} : vector<2x8xf32> to vector<1x8xf32>
    %463 = vector.broadcast %462 : vector<1x8xf32> to vector<8x8xf32>
    %464 = arith.addf %461, %463 : vector<8x8xf32>
    %465 = math.exp %464 : vector<8x8xf32>
    %cst_316 = arith.constant dense<0.000000e+00> : vector<8xf32>
    %466 = vector.multi_reduction <add>, %465, %cst_316 [1] : vector<8x8xf32> to vector<8xf32>
    %467 = vector.shape_cast %466 : vector<8xf32> to vector<8x1xf32>
    %468 = tpu.reciprocal %467 : vector<8x1xf32> -> vector<8x1xf32>
    %469 = vector.broadcast %468 : vector<8x1xf32> to vector<8x8xf32>
    %470 = arith.mulf %465, %469 : vector<8x8xf32>
    %471 = vector.extract_strided_slice %456 {offsets = [0, 0], sizes = [8, 8], strides = [1, 1]} : vector<16x8xf32> to vector<8x8xf32>
    %cst_317 = arith.constant dense<0.000000e+00> : vector<8x8xf32>
    %472 = tpu.matmul %470, %471, %cst_317 {dimension_numbers = #tpu.dot_dimension_numbers<[1], [0], [0], [1], [0, 0, 1, 1], [], []>} : vector<8x8xf32>, vector<8x8xf32>, vector<8x8xf32> -> vector<8x8xf32>
    %c1_318 = arith.constant 1 : index
    %c1_319 = arith.constant 1 : index
    %c0_320 = arith.constant 0 : index
    %c0_321 = arith.constant 0 : index
    %473 = vector.load %arg12[%c1_318, %c1_319, %c0_320, %c0_321] : memref<2x4x8x32xf32, #tpu.memory_space<vmem>>, vector<1x1x8x32xf32>
    %474 = vector.shape_cast %473 : vector<1x1x8x32xf32> to vector<8x32xf32>
    %cst_322 = arith.constant dense<0.000000e+00> : vector<8x32xf32>
    %475 = tpu.matmul %472, %474, %cst_322 {dimension_numbers = #tpu.dot_dimension_numbers<[1], [0], [0], [1], [0, 0, 1, 1], [], []>} : vector<8x8xf32>, vector<8x32xf32>, vector<8x32xf32> -> vector<8x32xf32>
    %476 = arith.addf %415, %475 : vector<8x32xf32>
    %477 = vector.extract_strided_slice %442 {offsets = [8, 0], sizes = [8, 8], strides = [1, 1]} : vector<16x8xf32> to vector<8x8xf32>
    %478 = vector.extract_strided_slice %449 {offsets = [8, 0], sizes = [8, 8], strides = [1, 1]} : vector<16x8xf32> to vector<8x8xf32>
    %cst_323 = arith.constant dense<0.000000e+00> : vector<8x8xf32>
    %479 = tpu.matmul %477, %478, %cst_323 {dimension_numbers = #tpu.dot_dimension_numbers<[1], [1], [0], [0], [0, 0, 1, 0], [], []>} : vector<8x8xf32>, vector<8x8xf32>, vector<8x8xf32> -> vector<8x8xf32>
    %cst_324 = arith.constant 0.353553385 : f32
    %480 = vector.broadcast %cst_324 : f32 to vector<8x8xf32>
    %481 = arith.mulf %479, %480 : vector<8x8xf32>
    %482 = vector.extract_strided_slice %40 {offsets = [1, 0], sizes = [1, 8], strides = [1, 1]} : vector<2x8xf32> to vector<1x8xf32>
    %483 = vector.broadcast %482 : vector<1x8xf32> to vector<8x8xf32>
    %484 = arith.addf %481, %483 : vector<8x8xf32>
    %485 = math.exp %484 : vector<8x8xf32>
    %cst_325 = arith.constant dense<0.000000e+00> : vector<8xf32>
    %486 = vector.multi_reduction <add>, %485, %cst_325 [1] : vector<8x8xf32> to vector<8xf32>
    %487 = vector.shape_cast %486 : vector<8xf32> to vector<8x1xf32>
    %488 = tpu.reciprocal %487 : vector<8x1xf32> -> vector<8x1xf32>
    %489 = vector.broadcast %488 : vector<8x1xf32> to vector<8x8xf32>
    %490 = arith.mulf %485, %489 : vector<8x8xf32>
    %491 = vector.extract_strided_slice %456 {offsets = [8, 0], sizes = [8, 8], strides = [1, 1]} : vector<16x8xf32> to vector<8x8xf32>
    %cst_326 = arith.constant dense<0.000000e+00> : vector<8x8xf32>
    %492 = tpu.matmul %490, %491, %cst_326 {dimension_numbers = #tpu.dot_dimension_numbers<[1], [0], [0], [1], [0, 0, 1, 1], [], []>} : vector<8x8xf32>, vector<8x8xf32>, vector<8x8xf32> -> vector<8x8xf32>
    %c1_327 = arith.constant 1 : index
    %c1_328 = arith.constant 1 : index
    %c0_329 = arith.constant 0 : index
    %c0_330 = arith.constant 0 : index
    %493 = vector.load %arg12[%c1_327, %c1_328, %c0_329, %c0_330] : memref<2x4x8x32xf32, #tpu.memory_space<vmem>>, vector<1x1x8x32xf32>
    %494 = vector.shape_cast %493 : vector<1x1x8x32xf32> to vector<8x32xf32>
    %cst_331 = arith.constant dense<0.000000e+00> : vector<8x32xf32>
    %495 = tpu.matmul %492, %494, %cst_331 {dimension_numbers = #tpu.dot_dimension_numbers<[1], [0], [0], [1], [0, 0, 1, 1], [], []>} : vector<8x8xf32>, vector<8x32xf32>, vector<8x32xf32> -> vector<8x32xf32>
    %496 = arith.addf %435, %495 : vector<8x32xf32>
    %c1_332 = arith.constant 1 : index
    %c2_333 = arith.constant 2 : index
    %c0_334 = arith.constant 0 : index
    %c0_335 = arith.constant 0 : index
    %497 = vector.load %arg6[%c1_332, %c2_333, %c0_334, %c0_335] : memref<2x4x32x8xf32, #tpu.memory_space<vmem>>, vector<1x1x32x8xf32>
    %498 = vector.shape_cast %497 : vector<1x1x32x8xf32> to vector<32x8xf32>
    %cst_336 = arith.constant dense<0.000000e+00> : vector<16x8xf32>
    %499 = tpu.matmul %372, %498, %cst_336 {dimension_numbers = #tpu.dot_dimension_numbers<[1], [0], [0], [1], [0, 0, 1, 1], [], []>} : vector<16x32xf32>, vector<32x8xf32>, vector<16x8xf32> -> vector<16x8xf32>
    %c1_337 = arith.constant 1 : index
    %c2_338 = arith.constant 2 : index
    %c0_339 = arith.constant 0 : index
    %c0_340 = arith.constant 0 : index
    %500 = vector.load %arg9[%c1_337, %c2_338, %c0_339, %c0_340] : memref<2x4x1x8xf32, #tpu.memory_space<vmem>>, vector<1x1x1x8xf32>
    %501 = vector.shape_cast %500 : vector<1x1x1x8xf32> to vector<1x8xf32>
    %502 = vector.broadcast %501 : vector<1x8xf32> to vector<16x8xf32>
    %503 = arith.addf %499, %502 : vector<16x8xf32>
    %c1_341 = arith.constant 1 : index
    %c2_342 = arith.constant 2 : index
    %c0_343 = arith.constant 0 : index
    %c0_344 = arith.constant 0 : index
    %504 = vector.load %arg7[%c1_341, %c2_342, %c0_343, %c0_344] : memref<2x4x32x8xf32, #tpu.memory_space<vmem>>, vector<1x1x32x8xf32>
    %505 = vector.shape_cast %504 : vector<1x1x32x8xf32> to vector<32x8xf32>
    %cst_345 = arith.constant dense<0.000000e+00> : vector<16x8xf32>
    %506 = tpu.matmul %372, %505, %cst_345 {dimension_numbers = #tpu.dot_dimension_numbers<[1], [0], [0], [1], [0, 0, 1, 1], [], []>} : vector<16x32xf32>, vector<32x8xf32>, vector<16x8xf32> -> vector<16x8xf32>
    %c1_346 = arith.constant 1 : index
    %c2_347 = arith.constant 2 : index
    %c0_348 = arith.constant 0 : index
    %c0_349 = arith.constant 0 : index
    %507 = vector.load %arg10[%c1_346, %c2_347, %c0_348, %c0_349] : memref<2x4x1x8xf32, #tpu.memory_space<vmem>>, vector<1x1x1x8xf32>
    %508 = vector.shape_cast %507 : vector<1x1x1x8xf32> to vector<1x8xf32>
    %509 = vector.broadcast %508 : vector<1x8xf32> to vector<16x8xf32>
    %510 = arith.addf %506, %509 : vector<16x8xf32>
    %c1_350 = arith.constant 1 : index
    %c2_351 = arith.constant 2 : index
    %c0_352 = arith.constant 0 : index
    %c0_353 = arith.constant 0 : index
    %511 = vector.load %arg8[%c1_350, %c2_351, %c0_352, %c0_353] : memref<2x4x32x8xf32, #tpu.memory_space<vmem>>, vector<1x1x32x8xf32>
    %512 = vector.shape_cast %511 : vector<1x1x32x8xf32> to vector<32x8xf32>
    %cst_354 = arith.constant dense<0.000000e+00> : vector<16x8xf32>
    %513 = tpu.matmul %372, %512, %cst_354 {dimension_numbers = #tpu.dot_dimension_numbers<[1], [0], [0], [1], [0, 0, 1, 1], [], []>} : vector<16x32xf32>, vector<32x8xf32>, vector<16x8xf32> -> vector<16x8xf32>
    %c1_355 = arith.constant 1 : index
    %c2_356 = arith.constant 2 : index
    %c0_357 = arith.constant 0 : index
    %c0_358 = arith.constant 0 : index
    %514 = vector.load %arg11[%c1_355, %c2_356, %c0_357, %c0_358] : memref<2x4x1x8xf32, #tpu.memory_space<vmem>>, vector<1x1x1x8xf32>
    %515 = vector.shape_cast %514 : vector<1x1x1x8xf32> to vector<1x8xf32>
    %516 = vector.broadcast %515 : vector<1x8xf32> to vector<16x8xf32>
    %517 = arith.addf %513, %516 : vector<16x8xf32>
    %518 = vector.extract_strided_slice %503 {offsets = [0, 0], sizes = [8, 8], strides = [1, 1]} : vector<16x8xf32> to vector<8x8xf32>
    %519 = vector.extract_strided_slice %510 {offsets = [0, 0], sizes = [8, 8], strides = [1, 1]} : vector<16x8xf32> to vector<8x8xf32>
    %cst_359 = arith.constant dense<0.000000e+00> : vector<8x8xf32>
    %520 = tpu.matmul %518, %519, %cst_359 {dimension_numbers = #tpu.dot_dimension_numbers<[1], [1], [0], [0], [0, 0, 1, 0], [], []>} : vector<8x8xf32>, vector<8x8xf32>, vector<8x8xf32> -> vector<8x8xf32>
    %cst_360 = arith.constant 0.353553385 : f32
    %521 = vector.broadcast %cst_360 : f32 to vector<8x8xf32>
    %522 = arith.mulf %520, %521 : vector<8x8xf32>
    %523 = vector.extract_strided_slice %40 {offsets = [0, 0], sizes = [1, 8], strides = [1, 1]} : vector<2x8xf32> to vector<1x8xf32>
    %524 = vector.broadcast %523 : vector<1x8xf32> to vector<8x8xf32>
    %525 = arith.addf %522, %524 : vector<8x8xf32>
    %526 = math.exp %525 : vector<8x8xf32>
    %cst_361 = arith.constant dense<0.000000e+00> : vector<8xf32>
    %527 = vector.multi_reduction <add>, %526, %cst_361 [1] : vector<8x8xf32> to vector<8xf32>
    %528 = vector.shape_cast %527 : vector<8xf32> to vector<8x1xf32>
    %529 = tpu.reciprocal %528 : vector<8x1xf32> -> vector<8x1xf32>
    %530 = vector.broadcast %529 : vector<8x1xf32> to vector<8x8xf32>
    %531 = arith.mulf %526, %530 : vector<8x8xf32>
    %532 = vector.extract_strided_slice %517 {offsets = [0, 0], sizes = [8, 8], strides = [1, 1]} : vector<16x8xf32> to vector<8x8xf32>
    %cst_362 = arith.constant dense<0.000000e+00> : vector<8x8xf32>
    %533 = tpu.matmul %531, %532, %cst_362 {dimension_numbers = #tpu.dot_dimension_numbers<[1], [0], [0], [1], [0, 0, 1, 1], [], []>} : vector<8x8xf32>, vector<8x8xf32>, vector<8x8xf32> -> vector<8x8xf32>
    %c1_363 = arith.constant 1 : index
    %c2_364 = arith.constant 2 : index
    %c0_365 = arith.constant 0 : index
    %c0_366 = arith.constant 0 : index
    %534 = vector.load %arg12[%c1_363, %c2_364, %c0_365, %c0_366] : memref<2x4x8x32xf32, #tpu.memory_space<vmem>>, vector<1x1x8x32xf32>
    %535 = vector.shape_cast %534 : vector<1x1x8x32xf32> to vector<8x32xf32>
    %cst_367 = arith.constant dense<0.000000e+00> : vector<8x32xf32>
    %536 = tpu.matmul %533, %535, %cst_367 {dimension_numbers = #tpu.dot_dimension_numbers<[1], [0], [0], [1], [0, 0, 1, 1], [], []>} : vector<8x8xf32>, vector<8x32xf32>, vector<8x32xf32> -> vector<8x32xf32>
    %537 = arith.addf %476, %536 : vector<8x32xf32>
    %538 = vector.extract_strided_slice %503 {offsets = [8, 0], sizes = [8, 8], strides = [1, 1]} : vector<16x8xf32> to vector<8x8xf32>
    %539 = vector.extract_strided_slice %510 {offsets = [8, 0], sizes = [8, 8], strides = [1, 1]} : vector<16x8xf32> to vector<8x8xf32>
    %cst_368 = arith.constant dense<0.000000e+00> : vector<8x8xf32>
    %540 = tpu.matmul %538, %539, %cst_368 {dimension_numbers = #tpu.dot_dimension_numbers<[1], [1], [0], [0], [0, 0, 1, 0], [], []>} : vector<8x8xf32>, vector<8x8xf32>, vector<8x8xf32> -> vector<8x8xf32>
    %cst_369 = arith.constant 0.353553385 : f32
    %541 = vector.broadcast %cst_369 : f32 to vector<8x8xf32>
    %542 = arith.mulf %540, %541 : vector<8x8xf32>
    %543 = vector.extract_strided_slice %40 {offsets = [1, 0], sizes = [1, 8], strides = [1, 1]} : vector<2x8xf32> to vector<1x8xf32>
    %544 = vector.broadcast %543 : vector<1x8xf32> to vector<8x8xf32>
    %545 = arith.addf %542, %544 : vector<8x8xf32>
    %546 = math.exp %545 : vector<8x8xf32>
    %cst_370 = arith.constant dense<0.000000e+00> : vector<8xf32>
    %547 = vector.multi_reduction <add>, %546, %cst_370 [1] : vector<8x8xf32> to vector<8xf32>
    %548 = vector.shape_cast %547 : vector<8xf32> to vector<8x1xf32>
    %549 = tpu.reciprocal %548 : vector<8x1xf32> -> vector<8x1xf32>
    %550 = vector.broadcast %549 : vector<8x1xf32> to vector<8x8xf32>
    %551 = arith.mulf %546, %550 : vector<8x8xf32>
    %552 = vector.extract_strided_slice %517 {offsets = [8, 0], sizes = [8, 8], strides = [1, 1]} : vector<16x8xf32> to vector<8x8xf32>
    %cst_371 = arith.constant dense<0.000000e+00> : vector<8x8xf32>
    %553 = tpu.matmul %551, %552, %cst_371 {dimension_numbers = #tpu.dot_dimension_numbers<[1], [0], [0], [1], [0, 0, 1, 1], [], []>} : vector<8x8xf32>, vector<8x8xf32>, vector<8x8xf32> -> vector<8x8xf32>
    %c1_372 = arith.constant 1 : index
    %c2_373 = arith.constant 2 : index
    %c0_374 = arith.constant 0 : index
    %c0_375 = arith.constant 0 : index
    %554 = vector.load %arg12[%c1_372, %c2_373, %c0_374, %c0_375] : memref<2x4x8x32xf32, #tpu.memory_space<vmem>>, vector<1x1x8x32xf32>
    %555 = vector.shape_cast %554 : vector<1x1x8x32xf32> to vector<8x32xf32>
    %cst_376 = arith.constant dense<0.000000e+00> : vector<8x32xf32>
    %556 = tpu.matmul %553, %555, %cst_376 {dimension_numbers = #tpu.dot_dimension_numbers<[1], [0], [0], [1], [0, 0, 1, 1], [], []>} : vector<8x8xf32>, vector<8x32xf32>, vector<8x32xf32> -> vector<8x32xf32>
    %557 = arith.addf %496, %556 : vector<8x32xf32>
    %c1_377 = arith.constant 1 : index
    %c3_378 = arith.constant 3 : index
    %c0_379 = arith.constant 0 : index
    %c0_380 = arith.constant 0 : index
    %558 = vector.load %arg6[%c1_377, %c3_378, %c0_379, %c0_380] : memref<2x4x32x8xf32, #tpu.memory_space<vmem>>, vector<1x1x32x8xf32>
    %559 = vector.shape_cast %558 : vector<1x1x32x8xf32> to vector<32x8xf32>
    %cst_381 = arith.constant dense<0.000000e+00> : vector<16x8xf32>
    %560 = tpu.matmul %372, %559, %cst_381 {dimension_numbers = #tpu.dot_dimension_numbers<[1], [0], [0], [1], [0, 0, 1, 1], [], []>} : vector<16x32xf32>, vector<32x8xf32>, vector<16x8xf32> -> vector<16x8xf32>
    %c1_382 = arith.constant 1 : index
    %c3_383 = arith.constant 3 : index
    %c0_384 = arith.constant 0 : index
    %c0_385 = arith.constant 0 : index
    %561 = vector.load %arg9[%c1_382, %c3_383, %c0_384, %c0_385] : memref<2x4x1x8xf32, #tpu.memory_space<vmem>>, vector<1x1x1x8xf32>
    %562 = vector.shape_cast %561 : vector<1x1x1x8xf32> to vector<1x8xf32>
    %563 = vector.broadcast %562 : vector<1x8xf32> to vector<16x8xf32>
    %564 = arith.addf %560, %563 : vector<16x8xf32>
    %c1_386 = arith.constant 1 : index
    %c3_387 = arith.constant 3 : index
    %c0_388 = arith.constant 0 : index
    %c0_389 = arith.constant 0 : index
    %565 = vector.load %arg7[%c1_386, %c3_387, %c0_388, %c0_389] : memref<2x4x32x8xf32, #tpu.memory_space<vmem>>, vector<1x1x32x8xf32>
    %566 = vector.shape_cast %565 : vector<1x1x32x8xf32> to vector<32x8xf32>
    %cst_390 = arith.constant dense<0.000000e+00> : vector<16x8xf32>
    %567 = tpu.matmul %372, %566, %cst_390 {dimension_numbers = #tpu.dot_dimension_numbers<[1], [0], [0], [1], [0, 0, 1, 1], [], []>} : vector<16x32xf32>, vector<32x8xf32>, vector<16x8xf32> -> vector<16x8xf32>
    %c1_391 = arith.constant 1 : index
    %c3_392 = arith.constant 3 : index
    %c0_393 = arith.constant 0 : index
    %c0_394 = arith.constant 0 : index
    %568 = vector.load %arg10[%c1_391, %c3_392, %c0_393, %c0_394] : memref<2x4x1x8xf32, #tpu.memory_space<vmem>>, vector<1x1x1x8xf32>
    %569 = vector.shape_cast %568 : vector<1x1x1x8xf32> to vector<1x8xf32>
    %570 = vector.broadcast %569 : vector<1x8xf32> to vector<16x8xf32>
    %571 = arith.addf %567, %570 : vector<16x8xf32>
    %c1_395 = arith.constant 1 : index
    %c3_396 = arith.constant 3 : index
    %c0_397 = arith.constant 0 : index
    %c0_398 = arith.constant 0 : index
    %572 = vector.load %arg8[%c1_395, %c3_396, %c0_397, %c0_398] : memref<2x4x32x8xf32, #tpu.memory_space<vmem>>, vector<1x1x32x8xf32>
    %573 = vector.shape_cast %572 : vector<1x1x32x8xf32> to vector<32x8xf32>
    %cst_399 = arith.constant dense<0.000000e+00> : vector<16x8xf32>
    %574 = tpu.matmul %372, %573, %cst_399 {dimension_numbers = #tpu.dot_dimension_numbers<[1], [0], [0], [1], [0, 0, 1, 1], [], []>} : vector<16x32xf32>, vector<32x8xf32>, vector<16x8xf32> -> vector<16x8xf32>
    %c1_400 = arith.constant 1 : index
    %c3_401 = arith.constant 3 : index
    %c0_402 = arith.constant 0 : index
    %c0_403 = arith.constant 0 : index
    %575 = vector.load %arg11[%c1_400, %c3_401, %c0_402, %c0_403] : memref<2x4x1x8xf32, #tpu.memory_space<vmem>>, vector<1x1x1x8xf32>
    %576 = vector.shape_cast %575 : vector<1x1x1x8xf32> to vector<1x8xf32>
    %577 = vector.broadcast %576 : vector<1x8xf32> to vector<16x8xf32>
    %578 = arith.addf %574, %577 : vector<16x8xf32>
    %579 = vector.extract_strided_slice %564 {offsets = [0, 0], sizes = [8, 8], strides = [1, 1]} : vector<16x8xf32> to vector<8x8xf32>
    %580 = vector.extract_strided_slice %571 {offsets = [0, 0], sizes = [8, 8], strides = [1, 1]} : vector<16x8xf32> to vector<8x8xf32>
    %cst_404 = arith.constant dense<0.000000e+00> : vector<8x8xf32>
    %581 = tpu.matmul %579, %580, %cst_404 {dimension_numbers = #tpu.dot_dimension_numbers<[1], [1], [0], [0], [0, 0, 1, 0], [], []>} : vector<8x8xf32>, vector<8x8xf32>, vector<8x8xf32> -> vector<8x8xf32>
    %cst_405 = arith.constant 0.353553385 : f32
    %582 = vector.broadcast %cst_405 : f32 to vector<8x8xf32>
    %583 = arith.mulf %581, %582 : vector<8x8xf32>
    %584 = vector.extract_strided_slice %40 {offsets = [0, 0], sizes = [1, 8], strides = [1, 1]} : vector<2x8xf32> to vector<1x8xf32>
    %585 = vector.broadcast %584 : vector<1x8xf32> to vector<8x8xf32>
    %586 = arith.addf %583, %585 : vector<8x8xf32>
    %587 = math.exp %586 : vector<8x8xf32>
    %cst_406 = arith.constant dense<0.000000e+00> : vector<8xf32>
    %588 = vector.multi_reduction <add>, %587, %cst_406 [1] : vector<8x8xf32> to vector<8xf32>
    %589 = vector.shape_cast %588 : vector<8xf32> to vector<8x1xf32>
    %590 = tpu.reciprocal %589 : vector<8x1xf32> -> vector<8x1xf32>
    %591 = vector.broadcast %590 : vector<8x1xf32> to vector<8x8xf32>
    %592 = arith.mulf %587, %591 : vector<8x8xf32>
    %593 = vector.extract_strided_slice %578 {offsets = [0, 0], sizes = [8, 8], strides = [1, 1]} : vector<16x8xf32> to vector<8x8xf32>
    %cst_407 = arith.constant dense<0.000000e+00> : vector<8x8xf32>
    %594 = tpu.matmul %592, %593, %cst_407 {dimension_numbers = #tpu.dot_dimension_numbers<[1], [0], [0], [1], [0, 0, 1, 1], [], []>} : vector<8x8xf32>, vector<8x8xf32>, vector<8x8xf32> -> vector<8x8xf32>
    %c1_408 = arith.constant 1 : index
    %c3_409 = arith.constant 3 : index
    %c0_410 = arith.constant 0 : index
    %c0_411 = arith.constant 0 : index
    %595 = vector.load %arg12[%c1_408, %c3_409, %c0_410, %c0_411] : memref<2x4x8x32xf32, #tpu.memory_space<vmem>>, vector<1x1x8x32xf32>
    %596 = vector.shape_cast %595 : vector<1x1x8x32xf32> to vector<8x32xf32>
    %cst_412 = arith.constant dense<0.000000e+00> : vector<8x32xf32>
    %597 = tpu.matmul %594, %596, %cst_412 {dimension_numbers = #tpu.dot_dimension_numbers<[1], [0], [0], [1], [0, 0, 1, 1], [], []>} : vector<8x8xf32>, vector<8x32xf32>, vector<8x32xf32> -> vector<8x32xf32>
    %598 = arith.addf %537, %597 : vector<8x32xf32>
    %599 = vector.extract_strided_slice %564 {offsets = [8, 0], sizes = [8, 8], strides = [1, 1]} : vector<16x8xf32> to vector<8x8xf32>
    %600 = vector.extract_strided_slice %571 {offsets = [8, 0], sizes = [8, 8], strides = [1, 1]} : vector<16x8xf32> to vector<8x8xf32>
    %cst_413 = arith.constant dense<0.000000e+00> : vector<8x8xf32>
    %601 = tpu.matmul %599, %600, %cst_413 {dimension_numbers = #tpu.dot_dimension_numbers<[1], [1], [0], [0], [0, 0, 1, 0], [], []>} : vector<8x8xf32>, vector<8x8xf32>, vector<8x8xf32> -> vector<8x8xf32>
    %cst_414 = arith.constant 0.353553385 : f32
    %602 = vector.broadcast %cst_414 : f32 to vector<8x8xf32>
    %603 = arith.mulf %601, %602 : vector<8x8xf32>
    %604 = vector.extract_strided_slice %40 {offsets = [1, 0], sizes = [1, 8], strides = [1, 1]} : vector<2x8xf32> to vector<1x8xf32>
    %605 = vector.broadcast %604 : vector<1x8xf32> to vector<8x8xf32>
    %606 = arith.addf %603, %605 : vector<8x8xf32>
    %607 = math.exp %606 : vector<8x8xf32>
    %cst_415 = arith.constant dense<0.000000e+00> : vector<8xf32>
    %608 = vector.multi_reduction <add>, %607, %cst_415 [1] : vector<8x8xf32> to vector<8xf32>
    %609 = vector.shape_cast %608 : vector<8xf32> to vector<8x1xf32>
    %610 = tpu.reciprocal %609 : vector<8x1xf32> -> vector<8x1xf32>
    %611 = vector.broadcast %610 : vector<8x1xf32> to vector<8x8xf32>
    %612 = arith.mulf %607, %611 : vector<8x8xf32>
    %613 = vector.extract_strided_slice %578 {offsets = [8, 0], sizes = [8, 8], strides = [1, 1]} : vector<16x8xf32> to vector<8x8xf32>
    %cst_416 = arith.constant dense<0.000000e+00> : vector<8x8xf32>
    %614 = tpu.matmul %612, %613, %cst_416 {dimension_numbers = #tpu.dot_dimension_numbers<[1], [0], [0], [1], [0, 0, 1, 1], [], []>} : vector<8x8xf32>, vector<8x8xf32>, vector<8x8xf32> -> vector<8x8xf32>
    %c1_417 = arith.constant 1 : index
    %c3_418 = arith.constant 3 : index
    %c0_419 = arith.constant 0 : index
    %c0_420 = arith.constant 0 : index
    %615 = vector.load %arg12[%c1_417, %c3_418, %c0_419, %c0_420] : memref<2x4x8x32xf32, #tpu.memory_space<vmem>>, vector<1x1x8x32xf32>
    %616 = vector.shape_cast %615 : vector<1x1x8x32xf32> to vector<8x32xf32>
    %cst_421 = arith.constant dense<0.000000e+00> : vector<8x32xf32>
    %617 = tpu.matmul %614, %616, %cst_421 {dimension_numbers = #tpu.dot_dimension_numbers<[1], [0], [0], [1], [0, 0, 1, 1], [], []>} : vector<8x8xf32>, vector<8x32xf32>, vector<8x32xf32> -> vector<8x32xf32>
    %618 = arith.addf %557, %617 : vector<8x32xf32>
    %619 = tpu.concatenate %598, %618 in 0 : vector<8x32xf32>, vector<8x32xf32> -> vector<16x32xf32>
    %c1_422 = arith.constant 1 : index
    %c0_423 = arith.constant 0 : index
    %c0_424 = arith.constant 0 : index
    %620 = vector.load %arg13[%c1_422, %c0_423, %c0_424] : memref<2x1x32xf32, #tpu.memory_space<vmem>>, vector<1x1x32xf32>
    %621 = vector.shape_cast %620 : vector<1x1x32xf32> to vector<1x32xf32>
    %622 = vector.broadcast %621 : vector<1x32xf32> to vector<16x32xf32>
    %623 = arith.addf %619, %622 : vector<16x32xf32>
    %624 = arith.addf %623, %372 : vector<16x32xf32>
    %c1_425 = arith.constant 1 : index
    %c0_426 = arith.constant 0 : index
    %c0_427 = arith.constant 0 : index
    %625 = vector.load %arg14[%c1_425, %c0_426, %c0_427] : memref<2x1x32xf32, #tpu.memory_space<vmem>>, vector<1x1x32xf32>
    %626 = vector.shape_cast %625 : vector<1x1x32xf32> to vector<1x32xf32>
    %c1_428 = arith.constant 1 : index
    %c0_429 = arith.constant 0 : index
    %c0_430 = arith.constant 0 : index
    %627 = vector.load %arg15[%c1_428, %c0_429, %c0_430] : memref<2x1x32xf32, #tpu.memory_space<vmem>>, vector<1x1x32xf32>
    %628 = vector.shape_cast %627 : vector<1x1x32xf32> to vector<1x32xf32>
    %cst_431 = arith.constant dense<0.000000e+00> : vector<16xf32>
    %629 = vector.multi_reduction <add>, %624, %cst_431 [1] : vector<16x32xf32> to vector<16xf32>
    %630 = vector.shape_cast %629 : vector<16xf32> to vector<16x1xf32>
    %cst_432 = arith.constant 3.200000e+01 : f32
    %631 = vector.broadcast %cst_432 : f32 to vector<16x1xf32>
    %632 = arith.divf %630, %631 : vector<16x1xf32>
    %633 = vector.broadcast %632 : vector<16x1xf32> to vector<16x32xf32>
    %634 = arith.subf %624, %633 : vector<16x32xf32>
    %635 = arith.mulf %634, %634 : vector<16x32xf32>
    %cst_433 = arith.constant dense<0.000000e+00> : vector<16xf32>
    %636 = vector.multi_reduction <add>, %635, %cst_433 [1] : vector<16x32xf32> to vector<16xf32>
    %637 = vector.shape_cast %636 : vector<16xf32> to vector<16x1xf32>
    %cst_434 = arith.constant 3.200000e+01 : f32
    %638 = vector.broadcast %cst_434 : f32 to vector<16x1xf32>
    %639 = arith.divf %637, %638 : vector<16x1xf32>
    %640 = vector.broadcast %632 : vector<16x1xf32> to vector<16x32xf32>
    %641 = arith.subf %624, %640 : vector<16x32xf32>
    %cst_435 = arith.constant 9.99999996E-13 : f32
    %642 = vector.broadcast %cst_435 : f32 to vector<16x1xf32>
    %643 = arith.addf %639, %642 : vector<16x1xf32>
    %644 = math.rsqrt %643 : vector<16x1xf32>
    %645 = vector.broadcast %644 : vector<16x1xf32> to vector<16x32xf32>
    %646 = arith.mulf %641, %645 : vector<16x32xf32>
    %647 = vector.broadcast %626 : vector<1x32xf32> to vector<16x32xf32>
    %648 = arith.mulf %646, %647 : vector<16x32xf32>
    %649 = vector.broadcast %628 : vector<1x32xf32> to vector<16x32xf32>
    %650 = arith.addf %648, %649 : vector<16x32xf32>
    %c1_436 = arith.constant 1 : index
    %c0_437 = arith.constant 0 : index
    %c0_438 = arith.constant 0 : index
    %651 = vector.load %arg16[%c1_436, %c0_437, %c0_438] : memref<2x32x64xf32, #tpu.memory_space<vmem>>, vector<1x32x64xf32>
    %652 = vector.shape_cast %651 : vector<1x32x64xf32> to vector<32x64xf32>
    %cst_439 = arith.constant dense<0.000000e+00> : vector<16x64xf32>
    %653 = tpu.matmul %650, %652, %cst_439 {dimension_numbers = #tpu.dot_dimension_numbers<[1], [0], [0], [1], [0, 0, 1, 1], [], []>} : vector<16x32xf32>, vector<32x64xf32>, vector<16x64xf32> -> vector<16x64xf32>
    %c1_440 = arith.constant 1 : index
    %c0_441 = arith.constant 0 : index
    %c0_442 = arith.constant 0 : index
    %654 = vector.load %arg17[%c1_440, %c0_441, %c0_442] : memref<2x1x64xf32, #tpu.memory_space<vmem>>, vector<1x1x64xf32>
    %655 = vector.shape_cast %654 : vector<1x1x64xf32> to vector<1x64xf32>
    %656 = vector.broadcast %655 : vector<1x64xf32> to vector<16x64xf32>
    %657 = arith.addf %653, %656 : vector<16x64xf32>
    %658 = arith.mulf %657, %657 : vector<16x64xf32>
    %659 = arith.mulf %657, %658 : vector<16x64xf32>
    %cst_443 = arith.constant 4.471500e-02 : f32
    %660 = vector.broadcast %cst_443 : f32 to vector<16x64xf32>
    %661 = arith.mulf %660, %659 : vector<16x64xf32>
    %662 = arith.addf %657, %661 : vector<16x64xf32>
    %cst_444 = arith.constant 0.797884583 : f32
    %663 = vector.broadcast %cst_444 : f32 to vector<16x64xf32>
    %664 = arith.mulf %663, %662 : vector<16x64xf32>
    %665 = math.tanh %664 : vector<16x64xf32>
    %cst_445 = arith.constant 1.000000e+00 : f32
    %666 = vector.broadcast %cst_445 : f32 to vector<16x64xf32>
    %667 = arith.addf %666, %665 : vector<16x64xf32>
    %cst_446 = arith.constant 5.000000e-01 : f32
    %668 = vector.broadcast %cst_446 : f32 to vector<16x64xf32>
    %669 = arith.mulf %668, %667 : vector<16x64xf32>
    %670 = arith.mulf %657, %669 : vector<16x64xf32>
    %c1_447 = arith.constant 1 : index
    %c0_448 = arith.constant 0 : index
    %c0_449 = arith.constant 0 : index
    %671 = vector.load %arg18[%c1_447, %c0_448, %c0_449] : memref<2x64x32xf32, #tpu.memory_space<vmem>>, vector<1x64x32xf32>
    %672 = vector.shape_cast %671 : vector<1x64x32xf32> to vector<64x32xf32>
    %cst_450 = arith.constant dense<0.000000e+00> : vector<16x32xf32>
    %673 = tpu.matmul %670, %672, %cst_450 {dimension_numbers = #tpu.dot_dimension_numbers<[1], [0], [0], [1], [0, 0, 1, 1], [], []>} : vector<16x64xf32>, vector<64x32xf32>, vector<16x32xf32> -> vector<16x32xf32>
    %c1_451 = arith.constant 1 : index
    %c0_452 = arith.constant 0 : index
    %c0_453 = arith.constant 0 : index
    %674 = vector.load %arg19[%c1_451, %c0_452, %c0_453] : memref<2x1x32xf32, #tpu.memory_space<vmem>>, vector<1x1x32xf32>
    %675 = vector.shape_cast %674 : vector<1x1x32xf32> to vector<1x32xf32>
    %676 = vector.broadcast %675 : vector<1x32xf32> to vector<16x32xf32>
    %677 = arith.addf %673, %676 : vector<16x32xf32>
    %678 = arith.addf %677, %650 : vector<16x32xf32>
    %c1_454 = arith.constant 1 : index
    %c0_455 = arith.constant 0 : index
    %c0_456 = arith.constant 0 : index
    %679 = vector.load %arg20[%c1_454, %c0_455, %c0_456] : memref<2x1x32xf32, #tpu.memory_space<vmem>>, vector<1x1x32xf32>
    %680 = vector.shape_cast %679 : vector<1x1x32xf32> to vector<1x32xf32>
    %c1_457 = arith.constant 1 : index
    %c0_458 = arith.constant 0 : index
    %c0_459 = arith.constant 0 : index
    %681 = vector.load %arg21[%c1_457, %c0_458, %c0_459] : memref<2x1x32xf32, #tpu.memory_space<vmem>>, vector<1x1x32xf32>
    %682 = vector.shape_cast %681 : vector<1x1x32xf32> to vector<1x32xf32>
    %cst_460 = arith.constant dense<0.000000e+00> : vector<16xf32>
    %683 = vector.multi_reduction <add>, %678, %cst_460 [1] : vector<16x32xf32> to vector<16xf32>
    %684 = vector.shape_cast %683 : vector<16xf32> to vector<16x1xf32>
    %cst_461 = arith.constant 3.200000e+01 : f32
    %685 = vector.broadcast %cst_461 : f32 to vector<16x1xf32>
    %686 = arith.divf %684, %685 : vector<16x1xf32>
    %687 = vector.broadcast %686 : vector<16x1xf32> to vector<16x32xf32>
    %688 = arith.subf %678, %687 : vector<16x32xf32>
    %689 = arith.mulf %688, %688 : vector<16x32xf32>
    %cst_462 = arith.constant dense<0.000000e+00> : vector<16xf32>
    %690 = vector.multi_reduction <add>, %689, %cst_462 [1] : vector<16x32xf32> to vector<16xf32>
    %691 = vector.shape_cast %690 : vector<16xf32> to vector<16x1xf32>
    %cst_463 = arith.constant 3.200000e+01 : f32
    %692 = vector.broadcast %cst_463 : f32 to vector<16x1xf32>
    %693 = arith.divf %691, %692 : vector<16x1xf32>
    %694 = vector.broadcast %686 : vector<16x1xf32> to vector<16x32xf32>
    %695 = arith.subf %678, %694 : vector<16x32xf32>
    %cst_464 = arith.constant 9.99999996E-13 : f32
    %696 = vector.broadcast %cst_464 : f32 to vector<16x1xf32>
    %697 = arith.addf %693, %696 : vector<16x1xf32>
    %698 = math.rsqrt %697 : vector<16x1xf32>
    %699 = vector.broadcast %698 : vector<16x1xf32> to vector<16x32xf32>
    %700 = arith.mulf %695, %699 : vector<16x32xf32>
    %701 = vector.broadcast %680 : vector<1x32xf32> to vector<16x32xf32>
    %702 = arith.mulf %700, %701 : vector<16x32xf32>
    %703 = vector.broadcast %682 : vector<1x32xf32> to vector<16x32xf32>
    %704 = arith.addf %702, %703 : vector<16x32xf32>
    %c0_465 = arith.constant 0 : index
    %c0_466 = arith.constant 0 : index
    %705 = vector.load %arg27[%c0_465, %c0_466] : memref<16x32xf32, #tpu.memory_space<vmem>>, vector<16x32xf32>
    tpu.vector_store %arg27[%c0_465, %c0_466], %704 {strides = array<i32>} : memref<16x32xf32, #tpu.memory_space<vmem>>, vector<16x32xf32>,
    %c0_467 = arith.constant 0 : index
    %c0_468 = arith.constant 0 : index
    %706 = tpu.strided_load %arg27[%c0_467, %c0_468] {strides = array<i32: 8, 1>} : memref<16x32xf32, #tpu.memory_space<vmem>>, vector<2x32xf32>
    %c0_469 = arith.constant 0 : index
    %c0_470 = arith.constant 0 : index
    %707 = vector.load %arg22[%c0_469, %c0_470] : memref<32x32xf32, #tpu.memory_space<vmem>>, vector<32x32xf32>
    %cst_471 = arith.constant dense<0.000000e+00> : vector<2x32xf32>
    %708 = tpu.matmul %706, %707, %cst_471 {dimension_numbers = #tpu.dot_dimension_numbers<[1], [0], [0], [1], [0, 0, 1, 1], [], []>} : vector<2x32xf32>, vector<32x32xf32>, vector<2x32xf32> -> vector<2x32xf32>
    %c0_472 = arith.constant 0 : index
    %c0_473 = arith.constant 0 : index
    %709 = vector.load %arg23[%c0_472, %c0_473] : memref<1x32xf32, #tpu.memory_space<vmem>>, vector<1x32xf32>
    %710 = vector.broadcast %709 : vector<1x32xf32> to vector<2x32xf32>
    %711 = arith.addf %708, %710 : vector<2x32xf32>
    %712 = math.tanh %711 : vector<2x32xf32>
    %c0_474 = arith.constant 0 : index
    %c0_475 = arith.constant 0 : index
    %713 = vector.load %arg24[%c0_474, %c0_475] : memref<1x32xf32, #tpu.memory_space<vmem>>, vector<1x32xf32>
    %cst_476 = arith.constant dense<0.000000e+00> : vector<1x2xf32>
    %714 = tpu.matmul %713, %712, %cst_476 {dimension_numbers = #tpu.dot_dimension_numbers<[1], [1], [0], [0], [0, 0, 1, 0], [], []>} : vector<1x32xf32>, vector<2x32xf32>, vector<1x2xf32> -> vector<1x2xf32>
    %c0_477 = arith.constant 0 : index
    %c0_478 = arith.constant 0 : index
    %715 = vector.load %arg25[%c0_477, %c0_478] : memref<1x1xf32, #tpu.memory_space<vmem>>, vector<1x1xf32>
    %716 = vector.broadcast %715 : vector<1x1xf32> to vector<1x2xf32>
    %717 = arith.addf %714, %716 : vector<1x2xf32>
    %c0_479 = arith.constant 0 : index
    %c0_480 = arith.constant 0 : index
    %718 = vector.load %arg26[%c0_479, %c0_480] : memref<1x2xf32, #tpu.memory_space<vmem>>, vector<1x2xf32>
    tpu.vector_store %arg26[%c0_479, %c0_480], %717 {strides = array<i32>} : memref<1x2xf32, #tpu.memory_space<vmem>>, vector<1x2xf32>,
    return
  }
}

</mosaic_0001>

<bundles_post_ra>
// kernel: text_classifier_forward.1
= control target key start
LH: loop header
LB: loop body
LE: loop exit
PB: predicated region body
PF: predicated region fallthrough
CT: control target
= control target key end

     0   :  { %s9560_s0 = inlined_call_operand.vmem [shape: s32[16,1], index: 0, kind: input, shape index: {}]   ;;  %s9561_s1 = inlined_call_operand.vmem [shape: s32[2,8], index: 1, kind: input, shape index: {}]   ;;  %s9562_s2 = inlined_call_operand.hbm [shape: f32[64,32], index: 2, kind: input, shape index: {}]   ;;  %s9563_s3 = inlined_call_operand.vmem [shape: f32[8,32], index: 3, kind: input, shape index: {}]   ;;  %s9564_s4 = inlined_call_operand.vmem [shape: f32[1,32], index: 4, kind: input, shape index: {}]   ;;  %s9565_s5 = inlined_call_operand.vmem [shape: f32[1,32], index: 5, kind: input, shape index: {}, may-alias: {5,23}]   ;;  %s9566_s6 = inlined_call_operand.hbm [shape: f32[2,4,32,8], index: 6, kind: input, shape index: {}]   ;;  %s9567_s7 = inlined_call_operand.hbm [shape: f32[2,4,32,8], index: 7, kind: input, shape index: {}]   ;;  %s9568_s8 = inlined_call_operand.hbm [shape: f32[2,4,32,8], index: 8, kind: input, shape index: {}]   ;;  %s9569_s9 = inlined_call_operand.vmem [shape: f32[2,4,1,8], index: 9, kind: input, shape index: {}, may-alias: {9,10,11}]   ;;  %s9570_s10 = inlined_call_operand.vmem [shape: f32[2,4,1,8], index: 10, kind: input, shape index: {}, may-alias: {9,10,11}]   ;;  %s9571_s11 = inlined_call_operand.vmem [shape: f32[2,4,1,8], index: 11, kind: input, shape index: {}, may-alias: {9,10,11}]   ;;  %s9572_s12 = inlined_call_operand.hbm [shape: f32[2,4,8,32], index: 12, kind: input, shape index: {}]   ;;  %s9573_s13 = inlined_call_operand.vmem [shape: f32[2,1,32], index: 13, kind: input, shape index: {}, may-alias: {13,15,19,21}]   ;;  %s9574_s14 = inlined_call_operand.vmem [shape: f32[2,1,32], index: 14, kind: input, shape index: {}, may-alias: {14,20}]   ;;  %s9575_s15 = inlined_call_operand.vmem [shape: f32[2,1,32], index: 15, kind: input, shape index: {}, may-alias: {13,15,19,21}]   ;;  %s9576_s16 = inlined_call_operand.vmem [shape: f32[2,32,64], index: 16, kind: input, shape index: {}]   ;;  %s9577_s17 = inlined_call_operand.vmem [shape: f32[2,1,64], index: 17, kind: input, shape index: {}]   ;;  %s9578_s18 = inlined_call_operand.hbm [shape: f32[2,64,32], index: 18, kind: input, shape index: {}]   ;;  %s9579_s19 = inlined_call_operand.vmem [shape: f32[2,1,32], index: 19, kind: input, shape index: {}, may-alias: {13,15,19,21}]   ;;  %s9580_s20 = inlined_call_operand.vmem [shape: f32[2,1,32], index: 20, kind: input, shape index: {}, may-alias: {14,20}]   ;;  %s9581_s21 = inlined_call_operand.vmem [shape: f32[2,1,32], index: 21, kind: input, shape index: {}, may-alias: {13,15,19,21}]   ;;  %s9582_s22 = inlined_call_operand.hbm [shape: f32[32,32], index: 22, kind: input, shape index: {}]   ;;  %s9583_s23 = inlined_call_operand.vmem [shape: f32[1,32], index: 23, kind: input, shape index: {}, may-alias: {5,23}]   ;;  %s9584_s24 = inlined_call_operand.vmem [shape: f32[1,32], index: 24, kind: input, shape index: {}]   ;;  %s9585_s25 = inlined_call_operand.<no memory space> [shape: f32[1,1], index: 25, kind: input, shape index: {}]   ;;  %s9586_s26 = inlined_call_operand.hbm [shape: f32[1,2], index: 26, kind: output, shape index: {}]  }
   0x1   :  { %9595 = sst [smem:[#allocation22_spill]] %s9560_s0  ;;  %v31_v0 = vstv %s9585_s25 }
   0x2   :  { %9596 = sst [smem:[#allocation23_spill]] %s9561_s1  ;;  %32 = vst [vmem:[#allocation3] sm:$0x1] %v31_v0 }
   0x3   :  { %9597 = sst [smem:[#allocation24_spill]] %s9562_s2 }
   0x4   :  { %9598 = sst [smem:[#allocation25_spill]] %s9563_s3 }
   0x5   :  { %9599 = sst [smem:[#allocation26_spill]] %s9564_s4 }
   0x6   :  { %9600 = sst [smem:[#allocation27_spill]] %s9565_s5 }
   0x7   :  { %9601 = sst [smem:[#allocation28_spill]] %s9566_s6 }
   0x8   :  { %9602 = sst [smem:[#allocation29_spill]] %s9567_s7 }
   0x9   :  { %9603 = sst [smem:[#allocation30_spill]] %s9568_s8 }
   0xa   :  { %9604 = sst [smem:[#allocation31_spill]] %s9569_s9 }
   0xb   :  { %9605 = sst [smem:[#allocation32_spill]] %s9570_s10 }
   0xc   :  { %9606 = sst [smem:[#allocation33_spill]] %s9586_s26 }
   0xd   :  { %33 = vsyncpa [#allocation5], 0 }
   0xe   :  { %34 = vsyncpa [#allocation8], 0 }
   0xf   :  { %35 = vsyncpa [#allocation11], 0 }
  0x10   :  { %36 = vsyncpa [#allocation14], 0 }
  0x11   :  { %37 = vsyncpa [#allocation6], 0  ;;  %s8648_s7 = smov [#allocation7]   ;;  %s8649_s8 = smov [#allocation10]  }
  0x12   :  { %s65_s28 = sshll.u32 %s8648_s7, 4  ;;  %s89_s4 = sshll.u32 %s8649_s8, 4  ;;  %s66_s28 = int_to_ptr.vmem [resolvable:$true] %s65_s28  ;;  %s8800_s4 = int_to_ptr.vmem [resolvable:$true] %s89_s4 }
  0x13   :  { %s9607_s9 = sld [smem:[#allocation28_spill]] }
  0x19   :  { %s8462_s30 = scalar_lea.hbm %s9607_s9, 4096 }
  0x1a   :  { %p8463_p0 = scmp.ne.s32.totalorder %s9607_s9, %s8462_s30  ;;  %p8466_p1 = scmp.lt.u32.totalorder %s8462_s30, %s9607_s9 }
  0x1c   :  { %p8468_p2 = pnand %p8466_p1, %p8463_p0 }
  0x1e   :  { %8471 = shalt.err (!%p8468_p2)
}
  0x1f   :  { %s8472_s6 = scalar_lea.vmem %s66_s28, 4096  ;;  %p8477_p4 = scmp.lt.s32.totalorder %s66_s28, %s66_s28 }
  0x20   :  { %p8473_p3 = scmp.ne.s32.totalorder %s66_s28, %s8472_s6  ;;  %p8478_p5 = scmp.lt.s32.totalorder %s8472_s6, %s8472_s6 }
  0x22   :  { %p8479_p6 = por %p8478_p5, %p8477_p4 }
  0x24   :  { %p8480_p7 = pnand %p8479_p6, %p8473_p3 }
  0x26   :  { %8483 = shalt.err (!%p8480_p7)
}
  0x27   :  { %s8650_s1 = smov 128   ;;  %s8651_s27 = smov 8  }
  0x28   :  { %71 = dma.hbm_to_vmem [thread:$0]  %s9607_s9, 4096, %s66_s28, [#allocation8], %s8650_s1, %s8650_s1, %s8651_s27  }
  0x29   :  { %s9608_s0 = sld [smem:[#allocation30_spill]] }
  0x2f   :  { %s8484_s30 = scalar_lea.hbm %s9608_s0, 4096 }
  0x30   :  { %p8485_p8 = scmp.ne.s32.totalorder %s9608_s0, %s8484_s30  ;;  %p8488_p9 = scmp.lt.u32.totalorder %s8484_s30, %s9608_s0 }
  0x32   :  { %p8490_p10 = pnand %p8488_p9, %p8485_p8 }
  0x34   :  { %8493 = shalt.err (!%p8490_p10)
}
  0x35   :  { %s8494_s6 = scalar_lea.vmem %s8800_s4, 4096  ;;  %p8499_p12 = scmp.lt.s32.totalorder %s8800_s4, %s8800_s4 }
  0x36   :  { %p8495_p11 = scmp.ne.s32.totalorder %s8800_s4, %s8494_s6  ;;  %p8500_p13 = scmp.lt.s32.totalorder %s8494_s6, %s8494_s6 }
  0x38   :  { %p8501_p0 = por %p8500_p13, %p8499_p12 }
  0x3a   :  { %p8502_p1 = pnand %p8501_p0, %p8495_p11 }
  0x3c   :  { %8505 = shalt.err (!%p8502_p1)
}
  0x3d   :  { %95 = dma.hbm_to_vmem [thread:$0]  %s9608_s0, 4096, %s8800_s4, [#allocation11], %s8650_s1, %s8650_s1, %s8651_s27  }
  0x3e   :  { %s8652_s3 = smov [#allocation13]   ;;  %s8653_s8 = smov [#allocation4]  }
  0x3f   :  { %s129_s7 = sshll.u32 %s8652_s3, 4  ;;  %s47_s29 = sshll.u32 %s8653_s8, 4  ;;  %s130_s7 = int_to_ptr.vmem [resolvable:$true] %s129_s7  ;;  %s8837_s29 = int_to_ptr.vmem [resolvable:$true] %s47_s29 }
  0x40   :  { %s8506_s5 = scalar_lea.hbm %s9578_s18, 2048 }
  0x41   :  { %p8507_p2 = scmp.ne.s32.totalorder %s9578_s18, %s8506_s5  ;;  %p8510_p3 = scmp.lt.u32.totalorder %s8506_s5, %s9578_s18 }
  0x43   :  { %p8512_p4 = pnand %p8510_p3, %p8507_p2 }
  0x45   :  { %8515 = shalt.err (!%p8512_p4)
}
  0x46   :  { %s8516_s4 = scalar_lea.vmem %s130_s7, 2048  ;;  %p8521_p6 = scmp.lt.s32.totalorder %s130_s7, %s130_s7 }
  0x47   :  { %p8517_p5 = scmp.ne.s32.totalorder %s130_s7, %s8516_s4  ;;  %p8522_p7 = scmp.lt.s32.totalorder %s8516_s4, %s8516_s4 }
  0x49   :  { %p8523_p8 = por %p8522_p7, %p8521_p6 }
  0x4b   :  { %p8524_p9 = pnand %p8523_p8, %p8517_p5 }
  0x4d   :  { %8527 = shalt.err (!%p8524_p9)
}
  0x4e   :  { %135 = dma.hbm_to_vmem [thread:$0]  %s9578_s18, 2048, %s130_s7, [#allocation14], %s8650_s1, %s8650_s1, %s8651_s27  }
  0x4f   :  { %s9609_s26 = sld [smem:[#allocation24_spill]] }
  0x55   :  { %s8528_s8 = scalar_lea.hbm %s9609_s26, 1024 }
  0x56   :  { %p8529_p10 = scmp.ne.s32.totalorder %s9609_s26, %s8528_s8  ;;  %p8532_p11 = scmp.lt.u32.totalorder %s8528_s8, %s9609_s26 }
  0x58   :  { %p8534_p12 = pnand %p8532_p11, %p8529_p10 }
  0x5a   :  { %8537 = shalt.err (!%p8534_p12)
}
  0x5b   :  { %s8538_s10 = scalar_lea.vmem %s8837_s29, 1024  ;;  %p8543_p0 = scmp.lt.s32.totalorder %s8837_s29, %s8837_s29 }
  0x5c   :  { %p8539_p13 = scmp.ne.s32.totalorder %s8837_s29, %s8538_s10  ;;  %p8544_p1 = scmp.lt.s32.totalorder %s8538_s10, %s8538_s10 }
  0x5e   :  { %p8545_p2 = por %p8544_p1, %p8543_p0 }
  0x60   :  { %p8546_p3 = pnand %p8545_p2, %p8539_p13 }
  0x62   :  { %8549 = shalt.err (!%p8546_p3)
}
  0x63   :  { %53 = dma.hbm_to_vmem [thread:$0]  %s9609_s26, 1024, %s8837_s29, [#allocation5], %s8650_s1, %s8650_s1, %s8651_s27  }
  0x64   :  { %s8654_s6 = smov [#allocation9]   ;;  %s8655_s0 = smov [#allocation12]  }
  0x65   :  { %s77_s4 = sshll.u32 %s8654_s6, 4  ;;  %s107_s28 = sshll.u32 %s8655_s0, 4  ;;  %s78_s4 = int_to_ptr.vmem [resolvable:$true] %s77_s4  ;;  %s8874_s28 = int_to_ptr.vmem [resolvable:$true] %s107_s28 }
  0x66   :  { %s9610_s8 = sld [smem:[#allocation29_spill]] }
  0x6c   :  { %s8550_s30 = scalar_lea.hbm %s9610_s8, 4096 }
  0x6d   :  { %p8551_p4 = scmp.ne.s32.totalorder %s9610_s8, %s8550_s30  ;;  %p8554_p5 = scmp.lt.u32.totalorder %s8550_s30, %s9610_s8 }
  0x6f   :  { %p8556_p6 = pnand %p8554_p5, %p8551_p4 }
  0x71   :  { %8559 = shalt.err (!%p8556_p6)
}
  0x72   :  { %s8560_s29 = scalar_lea.vmem %s78_s4, 4096  ;;  %p8565_p8 = scmp.lt.s32.totalorder %s78_s4, %s78_s4 }
  0x73   :  { %p8561_p7 = scmp.ne.s32.totalorder %s78_s4, %s8560_s29  ;;  %p8566_p9 = scmp.lt.s32.totalorder %s8560_s29, %s8560_s29 }
  0x75   :  { %p8567_p10 = por %p8566_p9, %p8565_p8 }
  0x77   :  { %p8568_p11 = pnand %p8567_p10, %p8561_p7 }
  0x79   :  { %8571 = shalt.err (!%p8568_p11)
}
  0x7a   :  { %83 = dma.hbm_to_vmem [thread:$0]  %s9610_s8, 4096, %s78_s4, [#allocation8], %s8650_s1, %s8650_s1, %s8651_s27  }
  0x7b   :  { %s8572_s0 = scalar_lea.hbm %s9572_s12, 1024 }
  0x7c   :  { %p8573_p12 = scmp.ne.s32.totalorder %s9572_s12, %s8572_s0  ;;  %p8576_p13 = scmp.lt.u32.totalorder %s8572_s0, %s9572_s12 }
  0x7e   :  { %p8578_p0 = pnand %p8576_p13, %p8573_p12 }
  0x80   :  { %8581 = shalt.err (!%p8578_p0)
}
  0x81   :  { %s8582_s5 = scalar_lea.vmem %s8874_s28, 1024  ;;  %p8587_p2 = scmp.lt.s32.totalorder %s8874_s28, %s8874_s28 }
  0x82   :  { %p8583_p1 = scmp.ne.s32.totalorder %s8874_s28, %s8582_s5  ;;  %p8588_p3 = scmp.lt.s32.totalorder %s8582_s5, %s8582_s5 }
  0x84   :  { %p8589_p4 = por %p8588_p3, %p8587_p2 }
  0x86   :  { %p8590_p5 = pnand %p8589_p4, %p8583_p1 }
  0x88   :  { %8593 = shalt.err (!%p8590_p5)
}
  0x89   :  { %113 = dma.hbm_to_vmem [thread:$0]  %s9572_s12, 1024, %s8874_s28, [#allocation11], %s8650_s1, %s8650_s1, %s8651_s27  }
  0x8a   :  { %s8656_s25 = smov [#allocation15]   ;;  %s8594_s18 = scalar_lea.hbm %s9582_s22, 512 }
  0x8b   :  { %s147_s10 = sshll.u32 %s8656_s25, 4  ;;  %p8595_p6 = scmp.ne.s32.totalorder %s9582_s22, %s8594_s18  ;;  %s148_s10 = int_to_ptr.vmem [resolvable:$true] %s147_s10 }
  0x8c   :  { %p8598_p7 = scmp.lt.u32.totalorder %s8594_s18, %s9582_s22 }
  0x8e   :  { %p8600_p8 = pnand %p8598_p7, %p8595_p6 }
  0x90   :  { %8603 = shalt.err (!%p8600_p8)
}
  0x91   :  { %s8604_s3 = scalar_lea.vmem %s148_s10, 512  ;;  %p8609_p10 = scmp.lt.s32.totalorder %s148_s10, %s148_s10 }
  0x92   :  { %p8605_p9 = scmp.ne.s32.totalorder %s148_s10, %s8604_s3  ;;  %p8610_p11 = scmp.lt.s32.totalorder %s8604_s3, %s8604_s3 }
  0x94   :  { %p8611_p12 = por %p8610_p11, %p8609_p10 }
  0x96   :  { %p8612_p13 = pnand %p8611_p12, %p8605_p9 }
  0x98   :  { %8615 = shalt.err (!%p8612_p13)
}
  0x99   :  { %153 = dma.hbm_to_vmem [thread:$0]  %s9582_s22, 512, %s148_s10, [#allocation14], %s8650_s1, %s8650_s1, %s8651_s27  }
  0x9a   :  { %8638 = dma.done.wait [#allocation5], 1024  }
  0x9b   :  { %8639 = vsyncadd [#allocation5], 4294966272 }
  0x9c   :  { %8640 = dma.done.wait [#allocation8], 8192  }
  0x9d   :  { %8641 = vsyncadd [#allocation8], 4294959104 }
  0x9e   :  { %8642 = dma.done.wait [#allocation11], 5120  }
  0x9f   :  { %8643 = vsyncadd [#allocation11], 4294962176 }
  0xa0   :  { %8644 = dma.done.wait [#allocation14], 2560  }
  0xa1   :  { %8645 = vsyncadd [#allocation14], 4294964736  ;;  %v8657_v1 = vmov 0   ;;  %s9611_s5 = sld [smem:[#allocation22_spill]]  ;;  %v197_v3 = vld [vmem:[#allocation4] sm:$0xff]  ;;  %v198_v4 = vld [vmem:[#allocation4 + $0x8] sm:$0xff]  ;;  %v183_v16 = vlaneseq }
  0xa2   :  { %8366 = vset.pattern.permute.xlu0 %v8657_v1  ;;  %8367 = vset.pattern.permute.xlu1 %v8657_v1  ;;  %v199_v5 = vld [vmem:[#allocation4 + $0x10] sm:$0xff]  ;;  %v200_v6 = vld [vmem:[#allocation4 + $0x18] sm:$0xff]  ;;  %v8090_v8 = vpack.c.bf16 %v198_v4, %v197_v3  ;;  %v201_v10 = vld [vmem:[#allocation4 + $0x20] sm:$0xff]  ;;  %vm206_vm0 = vcmask 523264   ;;  %v8658_v19 = vmov 0.0   ;;  %s9612_s8 = sld [smem:[#allocation25_spill]] }
  0xa3   :  { %v8094_v9 = vpack.c.bf16 %v200_v6, %v199_v5  ;;  %v202_v11 = vld [vmem:[#allocation4 + $0x28] sm:$0xff]  ;;  %v203_v13 = vld [vmem:[#allocation4 + $0x30] sm:$0xff]  ;;  %v204_v14 = vld [vmem:[#allocation4 + $0x38] sm:$0xff]  ;;  %v184_v17 = vand.u32 127, %v183_v16  ;;  %vm290_vm3 = vcmask 261120   ;;  %s9613_s29 = sld [smem:[#allocation26_spill]] }
  0xa4   :  { %8091 = vmatprep.subr.bf16.mxu0 %v8090_v8  ;;  %v8098_v12 = vpack.c.bf16 %v202_v11, %v201_v10  ;;  %v8102_v15 = vpack.c.bf16 %v204_v14, %v203_v13  ;;  %v338_v40 = vld [vmem:[#allocation7] sm:$0xff]  ;;  %v339_v41 = vld [vmem:[#allocation7 + $0x8] sm:$0xff]  ;;  %v340_v46 = vld [vmem:[#allocation7 + $0x10] sm:$0xff]  ;;  %s9614_s7 = sld [smem:[#allocation27_spill]]  ;;  %vm8659_vm4 = vmmov 0   ;;  %s9615_s12 = sld [smem:[#allocation32_spill]] }
  0xa5   :  { %8093 = vmatpush3.bf16.msra.mxu0 %v8090_v8  ;;  %v8106_v42 = vpack.c.bf16 %v339_v41, %v338_v40  ;;  %v516_v43 = vld [vmem:[#allocation10] sm:$0xff]  ;;  %v517_v44 = vld [vmem:[#allocation10 + $0x8] sm:$0xff]  ;;  %v341_v47 = vld [vmem:[#allocation7 + $0x18] sm:$0xff]  ;;  %vm602_vm5 = vcmask 64512   ;;  %s9616_s2 = sld [smem:[#allocation31_spill]]  ;;  %s8661_s18 = smov [#allocation16]  }
  0xa6   :  { %8095 = vmatprep.subr.bf16.mxu0 %v8094_v9  ;;  %v8122_v45 = vpack.c.bf16 %v517_v44, %v516_v43  ;;  %v8110_v48 = vpack.c.bf16 %v341_v47, %v340_v46  ;;  %v518_v49 = vld [vmem:[#allocation10 + $0x10] sm:$0xff]  ;;  %v519_v50 = vld [vmem:[#allocation10 + $0x18] sm:$0xff]  ;;  %v430_v52 = vld [vmem:[#allocation9] sm:$0xff]  ;;  %s9617_s1 = sld [smem:[#allocation23_spill]]  ;;  %vm6982_vm6 = vcmask 8192  }
  0xa7   :  { %v181_v2 = vld [vmem:[%s9611_s5] sm:$0xff]  ;;  %v182_v7 = vld [vmem:[%s9611_s5 + $0x8] sm:$0xff]  ;;  %8107 = vmatprep.subr.bf16.mxu1 %v8106_v42  ;;  %v8126_v51 = vpack.c.bf16 %v519_v50, %v518_v49  ;;  %v431_v53 = vld [vmem:[#allocation9 + $0x8] sm:$0xff] }
  0xa8   :  { %186 = vperm.xlu0 %8366, %v181_v2   ;;  %v205_v23 = vld [vmem:[%s9612_s8] sm:$0xff]  ;;  %8109 = vmatpush3.bf16.msra.mxu1 %v8106_v42  ;;  %v8114_v54 = vpack.c.bf16 %v431_v53, %v430_v52  ;;  %v9006_v42 = vshrl.u32 %v183_v16, 7 }
  0xa9   :  { %8097 = vmatpush3.bf16.msra.mxu0 %v8094_v9  ;;  %8111 = vmatprep.subr.bf16.mxu1 %v8110_v48  ;;  %v7006_v62 = vld [vmem:[%s9613_s29] ss:$0 sm:$0xff]  ;;  %v433_v6 = vld [vmem:[#allocation9 + $0x18] sm:$0xff] }
  0xaa   :  { %8099 = vmatprep.subr.bf16.mxu0 %v8098_v12  ;;  %v7007_v0 = vld [vmem:[%s9614_s7] ss:$0 sm:$0xff]  ;;  %v845_v44 = vsub.s32 1, %v9006_v42 }
  0xab   :  { %v432_v5 = vld [vmem:[#allocation9 + $0x10] sm:$0xff] }
  0xac   :  { %189 = vperm.xlu0 %8366, %v182_v7   ;;  %8113 = vmatpush3.bf16.msra.mxu1 %v8110_v48  ;;  %v8118_v9 = vpack.c.bf16 %v433_v6, %v432_v5  ;;  %v7014_v10 = vld [vmem:[%s9571_s11] ss:$0 sm:$0xff] }
  0xad   :  { %8101 = vmatpush3.bf16.msra.mxu0 %v8098_v12  ;;  %8115 = vmatprep.subr.bf16.mxu1 %v8114_v54 }
  0xae   :  { %8103 = vmatprep.subr.bf16.mxu0 %v8102_v15 }
  0xb1   :  { %8105 = vmatpush3.bf16.msra.mxu0 %v8102_v15 }
  0xb2   :  { %8123 = vmatprep.subr.bf16.mxu0 %v8122_v45 }
 0x127   :  { %v187_v18 = vpop.permute.xlu0 %186 }
 0x128   :  { %vm191_vm1 = vcmp.eq.s32.totalorder %v187_v18, %v184_v17  ;;  %v930_v18 = vld [vmem:[#allocation7 + $0x28] sm:$0xff] }
 0x129   :  { %v7002_v20 = vsel %vm191_vm1, 1.0, %v8658_v19 }
 0x12a   :  { %7507 = vmatprep.mubr.msk.f32.mxu0 %vm206_vm0, %v7002_v20  ;;  %v7011_v20 = vld [vmem:[%s9615_s12] ss:$0 sm:$0xff] }
 0x12b   :  { %v190_v21 = vpop.permute.xlu0 %189 }
 0x12c   :  { %vm192_vm2 = vcmp.eq.s32.totalorder %v190_v21, %v184_v17  ;;  %v929_v17 = vld [vmem:[#allocation7 + $0x20] sm:$0xff] }
 0x12d   :  { %v7003_v22 = vsel %vm192_vm2, 1.0, %v8658_v19 }
 0x12e   :  { %7508 = vmatmul.mubr.msk.f32.vlgmr.msra.gmra.mrb[0].mxu0 %vm206_vm0, %v7003_v22  ;;  %v8130_v22 = vpack.c.bf16 %v930_v18, %v929_v17  ;;  %v1020_v17 = vld [vmem:[#allocation9 + $0x38] sm:$0xff] }
 0x12f   :  { %8125 = vmatpush3.bf16.msra.mxu0 %v8122_v45  ;;  %v682_v45 = vsub.s32 0, %v9006_v42 }
 0x130   :  { %8127 = vmatprep.subr.bf16.mxu0 %v8126_v51 }
 0x133   :  { %8129 = vmatpush3.bf16.msra.mxu0 %v8126_v51 }
 0x134   :  { %7553 = vmatprep.subr.mxu0 %v8658_v19 }
 0x201   :  { %v7509_v24 = vpop.f32.mrb[0].mxu0 }
 0x202   :  { %v279_v25 = vpop.f32.mrb[1].mxu0  ;;  %v285_v27 = vadd.f32 %v7509_v24, %v205_v23 }
 0x203   :  { %v280_v26 = vadd.f32 %v279_v25, %v205_v23  ;;  %v7008_v23 = vld [vmem:[%s9616_s2] ss:$0 sm:$0xff] }
 0x204   :  { %v294_v29 = vsel %vm290_vm3, %v285_v27, 0.0 }
 0x205   :  { %v291_v28 = vsel %vm290_vm3, %v280_v26, 0.0 }
 0x206   :  { %292 = vadd.xlane.f32.xlu1 %v291_v28  ;;  %v932_v28 = vld [vmem:[#allocation7 + $0x38] sm:$0xff] }
 0x20a   :  { %295 = vadd.xlane.f32.xlu1 %v294_v29 }
 0x293   :  { %v293_v30 = vpop.xlane.xlu1 %292 }
 0x294   :  { %v298_v31 = vmul.f32 0.03125, %v293_v30 }
 0x296   :  { %v300_v32 = vsub.f32 %v280_v26, %v298_v31 }
 0x297   :  { %v296_v33 = vpop.xlane.xlu1 %295 }
 0x298   :  { %v299_v34 = vmul.f32 0.03125, %v296_v33  ;;  %v302_v35 = vmul.f32 %v300_v32, %v300_v32  ;;  %v1106_v33 = vld [vmem:[#allocation10 + $0x28] sm:$0xff] }
 0x29a   :  { %v301_v36 = vsub.f32 %v285_v27, %v299_v34  ;;  %v304_v37 = vsel %vm290_vm3, %v302_v35, 0.0  ;;  %v931_v27 = vld [vmem:[#allocation7 + $0x30] sm:$0xff] }
 0x29b   :  { %305 = vadd.xlane.f32.xlu0 %v304_v37  ;;  %v8134_v31 = vpack.c.bf16 %v932_v28, %v931_v27  ;;  %v1108_v37 = vld [vmem:[#allocation10 + $0x38] sm:$0xff] }
 0x29c   :  { %v303_v38 = vmul.f32 %v301_v36, %v301_v36 }
 0x29e   :  { %v307_v39 = vsel %vm290_vm3, %v303_v38, 0.0 }
 0x29f   :  { %308 = vadd.xlane.f32.xlu1 %v307_v39  ;;  %v334_v39 = vld [vmem:[%s9617_s1] sm:$0x3] }
 0x2a0   :  { %v335_v40 = vcvt.s32.f32 %v334_v39  ;;  %v1351_v39 = vld [vmem:[#allocation12 + $0x8] sm:$0xff] }
 0x2a2   :  { %v336_v41 = vsub.f32 1.0, %v335_v40 }
 0x2a4   :  { %v337_v43 = vmul.f32 -10000.0, %v336_v41 }
 0x2a6   :  { %v9010_v46 = vrot.slane %v337_v43, %v845_v44  ;;  %v9014_v47 = vrot.slane %v337_v43, %v682_v45  ;;  %v765_v44 = vld [vmem:[#allocation12] sm:$0xff] }
 0x328   :  { %v306_v55 = vpop.xlane.xlu0 %305 }
 0x329   :  { %v310_v56 = vmul.f32 0.03125, %v306_v55 }
 0x32b   :  { %v312_v57 = vadd.f32 1e-12, %v310_v56 }
 0x32c   :  { %v309_v58 = vpop.xlane.xlu1 %308 }
 0x32d   :  { %8368 = vrsqrt.f32 %v312_v57  ;;  %v311_v59 = vmul.f32 0.03125, %v309_v58  ;;  %v7024_v57 = vld [vmem:[%s9616_s2 + $0x1] ss:$0 sm:$0xff] }
 0x32f   :  { %v313_v60 = vadd.f32 1e-12, %v311_v59 }
 0x331   :  { %8370 = vrsqrt.f32 %v313_v60 }
 0x337   :  { %v8369_v61 = vpop.eup %8368 }
 0x338   :  { %v316_v63 = vmul.f32 %v8369_v61, %v300_v32  ;;  %v1105_v32 = vld [vmem:[#allocation10 + $0x20] sm:$0xff]  ;;  %v7032_v61 = vld [vmem:[%s9571_s11 + $0x1] ss:$0 sm:$0xff] }
 0x339   :  { %v8146_v35 = vpack.c.bf16 %v1106_v33, %v1105_v32 }
 0x33a   :  { %v324_v1 = vmul.f32 %v7006_v62, %v316_v63 }
 0x33b   :  { %v8371_v2 = vpop.eup %8370 }
 0x33c   :  { %v8951_v3 = vadd.f32 %v7007_v0, %v324_v1  ;;  %v317_v4 = vmul.f32 %v8371_v2, %v301_v36  ;;  %v1107_v36 = vld [vmem:[#allocation10 + $0x30] sm:$0xff] }
 0x33d   :  { %v8150_v38 = vpack.c.bf16 %v1108_v37, %v1107_v36 }
 0x33e   :  { %v325_v7 = vmul.f32 %v7006_v62, %v317_v4  ;;  %7518 = vmatprep.mubr.msk.f32.mxu1 %vm290_vm3, %v8951_v3  ;;  %7540 = vmatprep.mubr.msk.f32.mxu0 %vm290_vm3, %v8951_v3 }
 0x340   :  { %v8957_v8 = vadd.f32 %v7007_v0, %v325_v7 }
 0x342   :  { %7519 = vmatmul.mubr.msk.f32.vlgmr.msra.gmra.mrb[0].mxu1 %vm290_vm3, %v8957_v8  ;;  %7541 = vmatmul.mubr.msk.f32.vlgmr.msra.gmra.mrb[2].mxu0 %vm290_vm3, %v8957_v8 }
 0x343   :  { %8117 = vmatpush3.bf16.msra.mxu1 %v8114_v54  ;;  %7529 = vmatprep.mubr.msk.f32.mxu1 %vm290_vm3, %v8951_v3 }
 0x344   :  { %8119 = vmatprep.subr.bf16.mxu1 %v8118_v9  ;;  %7555 = vmatprep.mubr.msk.f32.mxu0 %vm8659_vm4, %v8658_v19 }
 0x347   :  { %8121 = vmatpush3.bf16.msra.mxu1 %v8118_v9  ;;  %v1017_v9 = vld [vmem:[#allocation9 + $0x20] sm:$0xff] }
 0x348   :  { %7543 = vmatprep.subr.mxu1 %v8658_v19 }
 0x34a   :  { %7530 = vmatmul.mubr.msk.f32.vlgmr.msra.gmra.mrb[2].mxu1 %vm290_vm3, %v8957_v8 }
 0x34b   :  { %7545 = vmatprep.mubr.msk.f32.mxu1 %vm8659_vm4, %v8658_v19 }
 0x415   :  { %v7520_v11 = vpop.f32.mrb[0].mxu1  ;;  %v7542_v12 = vpop.f32.mrb[2].mxu0 }
 0x416   :  { %v8975_v13 = vadd.f32 %v7542_v12, %v7014_v10  ;;  %v421_v14 = vpop.f32.mrb[1].mxu1  ;;  %v593_v15 = vpop.f32.mrb[3].mxu0  ;;  %v427_v29 = vadd.f32 %v7520_v11, %v7008_v23 }
 0x417   :  { %v422_v30 = vadd.f32 %v7008_v23, %v421_v14  ;;  %v594_v34 = vadd.f32 %v7014_v10, %v593_v15  ;;  %v1018_v10 = vld [vmem:[#allocation9 + $0x28] sm:$0xff]  ;;  %v1019_v15 = vld [vmem:[#allocation9 + $0x30] sm:$0xff] }
 0x418   :  { %v8138_v14 = vpack.c.bf16 %v1018_v10, %v1017_v9  ;;  %v1804_v9 = vld [vmem:[#allocation7 + $0x48] sm:$0xff] }
 0x41d   :  { %v7531_v21 = vpop.f32.mrb[2].mxu1 }
 0x41e   :  { %v513_v24 = vadd.f32 %v7531_v21, %v7011_v20  ;;  %v507_v25 = vpop.f32.mrb[3].mxu1  ;;  %v8142_v21 = vpack.c.bf16 %v1020_v17, %v1019_v15  ;;  %v1979_v17 = vld [vmem:[#allocation10 + $0x40] sm:$0xff] }
 0x41f   :  { %v508_v26 = vadd.f32 %v7011_v20, %v507_v25  ;;  %v7028_v25 = vld [vmem:[%s9615_s12 + $0x1] ss:$0 sm:$0xff] }
 0x420   :  { %7554 = vmatpush3.xpose.msk.msra.mxu0 %vm602_vm5, %v513_v24 }
 0x421   :  { %7544 = vmatpush3.xpose.msk.msra.mxu1 %vm602_vm5, %v508_v26  ;;  %8131 = vmatprep.subr.bf16.mxu0 %v8130_v22 }
 0x422   :  { %7548 = vmatprep.subr.mxu1 %v8658_v19 }
 0x423   :  { %7556 = vmatmul.mubr.msk.f32.vlgmr.msra.gmra.mrb[4].mxu0 %vm602_vm5, %v427_v29 }
 0x424   :  { %7546 = vmatmul.mubr.msk.f32.vlgmr.msra.gmra.mrb[4].mxu1 %vm602_vm5, %v422_v30  ;;  %8133 = vmatpush3.bf16.msra.mxu0 %v8130_v22 }
 0x425   :  { %7571 = vmatprep.mubr.msk.f32.mxu0 %vm290_vm3, %v8951_v3  ;;  %7549 = vmatpush3.msra.mxu1 %v594_v34 }
 0x426   :  { %8135 = vmatprep.subr.bf16.mxu0 %v8134_v31  ;;  %7550 = vmatprep.mubr.msk.f32.mxu1 %vm8659_vm4, %v8658_v19 }
 0x427   :  { %7558 = vmatprep.subr.mxu1 %v8658_v19 }
 0x428   :  { %8137 = vmatpush3.bf16.msra.mxu0 %v8134_v31 }
 0x429   :  { %8147 = vmatprep.subr.bf16.mxu0 %v8146_v35 }
 0x42b   :  { %7572 = vmatmul.mubr.msk.f32.vlgmr.msra.gmra.mrb[6].mxu0 %vm290_vm3, %v8957_v8 }
 0x42c   :  { %8149 = vmatpush3.bf16.msra.mxu0 %v8146_v35  ;;  %7593 = vmatprep.mubr.msk.f32.mxu0 %vm290_vm3, %v8951_v3 }
 0x42d   :  { %8151 = vmatprep.subr.bf16.mxu0 %v8150_v38 }
 0x430   :  { %8153 = vmatpush3.bf16.msra.mxu0 %v8150_v38 }
 0x431   :  { %7606 = vmatprep.subr.mxu0 %v8658_v19 }
 0x433   :  { %7594 = vmatmul.mubr.msk.f32.vlgmr.msra.gmra.mrb[8].mxu0 %vm290_vm3, %v8957_v8 }
 0x434   :  { %7608 = vmatprep.mubr.msk.f32.mxu0 %vm8659_vm4, %v8658_v19  ;;  %7607 = vmatpush3.msra.mxu0 %v1351_v39 }
 0x435   :  { %7616 = vmatprep.subr.mxu0 %v8658_v19 }
 0x4f6   :  { %v838_v48 = vpop.f32.mrb[4].mxu0 }
 0x4f7   :  { %v842_v49 = vmul.f32 0.35355338, %v838_v48  ;;  %v675_v50 = vpop.f32.mrb[4].mxu1  ;;  %v7557_v51 = vpop.f32.mrb[5].mxu0 }
 0x4f8   :  { %v679_v52 = vmul.f32 0.35355338, %v675_v50  ;;  %v7547_v53 = vpop.f32.mrb[5].mxu1 }
 0x4f9   :  { %v847_v16 = vadd.f32 %v9010_v46, %v842_v49 }
 0x4fa   :  { %v684_v54 = vadd.f32 %v9014_v47, %v679_v52 }
 0x4fb   :  { %v848_v55 = vmul.f32 1.442695, %v847_v16 }
 0x4fc   :  { %v685_v56 = vmul.f32 1.442695, %v684_v54 }
 0x4fe   :  { %8372 = vpow2.f32 %v685_v56  ;;  %v7573_v58 = vpop.f32.mrb[6].mxu0 }
 0x4ff   :  { %v9021_v59 = vadd.f32 %v7573_v58, %v7024_v57  ;;  %v1007_v60 = vpop.f32.mrb[7].mxu0  ;;  %8374 = vpow2.f32 %v848_v55 }
 0x500   :  { %v1008_v30 = vadd.f32 %v7024_v57, %v1007_v60 }
 0x506   :  { %v7595_v62 = vpop.f32.mrb[8].mxu0 }
 0x507   :  { %v9026_v63 = vadd.f32 %v7595_v62, %v7032_v61  ;;  %v1183_v0 = vpop.f32.mrb[9].mxu0  ;;  %v1891_v62 = vld [vmem:[#allocation9 + $0x40] sm:$0xff] }
 0x508   :  { %v8373_v1 = vpop.eup %8372  ;;  %v1184_v31 = vadd.f32 %v7032_v61, %v1183_v0 }
 0x509   :  { %v687_v2 = vsel %vm602_vm5, %v8373_v1, 0.0  ;;  %v8375_v4 = vpop.eup %8374 }
 0x50a   :  { %688 = vadd.xlane.f32.xlu1 %v687_v2  ;;  %v850_v5 = vsel %vm602_vm5, %v8375_v4, 0.0 }
 0x50e   :  { %851 = vadd.xlane.f32.xlu1 %v850_v5  ;;  %v1894_v5 = vld [vmem:[#allocation9 + $0x58] sm:$0xff] }
 0x597   :  { %v689_v6 = vpop.xlane.xlu1 %688 }
 0x598   :  { %8376 = vrcp.f32 %v689_v6 }
 0x59b   :  { %v852_v7 = vpop.xlane.xlu1 %851 }
 0x59c   :  { %8378 = vrcp.f32 %v852_v7  ;;  %v1803_v7 = vld [vmem:[#allocation7 + $0x40] sm:$0xff] }
 0x59d   :  { %v8154_v10 = vpack.c.bf16 %v1804_v9, %v1803_v7 }
 0x5a2   :  { %v8377_v11 = vpop.eup %8376 }
 0x5a3   :  { %v691_v12 = vmul.f32 %v8377_v11, %v8373_v1  ;;  %v1805_v11 = vld [vmem:[#allocation7 + $0x50] sm:$0xff] }
 0x5a5   :  { %7551 = vmatmul.mubr.msk.f32.vlgmr.msra.gmra.mrb[6].mxu1 %vm602_vm5, %v691_v12  ;;  %v1806_v12 = vld [vmem:[#allocation7 + $0x58] sm:$0xff] }
 0x5a6   :  { %v8379_v18 = vpop.eup %8378  ;;  %7559 = vmatpush3.msra.mxu1 %v8975_v13  ;;  %7560 = vmatprep.mubr.msk.f32.mxu1 %vm8659_vm4, %v8658_v19 }
 0x5a7   :  { %v854_v20 = vmul.f32 %v8379_v18, %v8375_v4  ;;  %8139 = vmatprep.subr.bf16.mxu1 %v8138_v14  ;;  %v1893_v4 = vld [vmem:[#allocation9 + $0x50] sm:$0xff]  ;;  %v1980_v18 = vld [vmem:[#allocation10 + $0x48] sm:$0xff] }
 0x5a8   :  { %v8166_v6 = vpack.c.bf16 %v1894_v5, %v1893_v4  ;;  %v2533_v5 = vld [vmem:[#allocation7 + $0x60] sm:$0xff] }
 0x5a9   :  { %7561 = vmatmul.mubr.msk.f32.vlgmr.msra.gmra.mrb[8].mxu1 %vm602_vm5, %v854_v20 }
 0x5aa   :  { %8141 = vmatpush3.bf16.msra.mxu1 %v8138_v14  ;;  %7582 = vmatprep.mubr.msk.f32.mxu1 %vm290_vm3, %v8951_v3  ;;  %v8158_v14 = vpack.c.bf16 %v1806_v12, %v1805_v11  ;;  %v2536_v11 = vld [vmem:[#allocation7 + $0x78] sm:$0xff] }
 0x5ab   :  { %8143 = vmatprep.subr.bf16.mxu1 %v8142_v21 }
 0x5ae   :  { %8145 = vmatpush3.bf16.msra.mxu1 %v8142_v21  ;;  %v8170_v21 = vpack.c.bf16 %v1980_v18, %v1979_v17  ;;  %v2709_v17 = vld [vmem:[#allocation10 + $0x60] sm:$0xff]  ;;  %v2710_v18 = vld [vmem:[#allocation10 + $0x68] sm:$0xff] }
 0x5af   :  { %7596 = vmatprep.subr.mxu1 %v8658_v19 }
 0x5b1   :  { %7583 = vmatmul.mubr.msk.f32.vlgmr.msra.gmra.mrb[10].mxu1 %vm290_vm3, %v8957_v8 }
 0x5b2   :  { %7598 = vmatprep.mubr.msk.f32.mxu1 %vm8659_vm4, %v8658_v19 }
 0x678   :  { %v761_v13 = vpop.f32.mrb[6].mxu1 }
 0x679   :  { %v7552_v22 = vpop.f32.mrb[7].mxu1 }
 0x67a   :  { %v1981_v22 = vld [vmem:[#allocation10 + $0x50] sm:$0xff] }
 0x67c   :  { %v9042_v23 = vpop.f32.mrb[8].mxu1 }
 0x67d   :  { %v7562_v24 = vpop.f32.mrb[9].mxu1 }
 0x684   :  { %v7584_v26 = vpop.f32.mrb[10].mxu1 }
 0x685   :  { %v1101_v27 = vadd.f32 %v7584_v26, %v7028_v25  ;;  %v1095_v28 = vpop.f32.mrb[11].mxu1  ;;  %v7050_v26 = vld [vmem:[%s9615_s12 + $0x2] ss:$0 sm:$0xff] }
 0x686   :  { %v1096_v29 = vadd.f32 %v7028_v25, %v1095_v28 }
 0x688   :  { %7597 = vmatpush3.xpose.msk.msra.mxu1 %vm602_vm5, %v1096_v29 }
 0x689   :  { %7601 = vmatprep.subr.mxu1 %v8658_v19 }
 0x68b   :  { %7599 = vmatmul.mubr.msk.f32.vlgmr.msra.gmra.mrb[12].mxu1 %vm602_vm5, %v1008_v30 }
 0x68c   :  { %7602 = vmatpush3.msra.mxu1 %v1184_v31  ;;  %7603 = vmatprep.mubr.msk.f32.mxu1 %vm8659_vm4, %v8658_v19 }
 0x68d   :  { %7611 = vmatprep.subr.mxu1 %v8658_v19 }
 0x75e   :  { %v1264_v32 = vpop.f32.mrb[12].mxu1 }
 0x75f   :  { %v1268_v33 = vmul.f32 0.35355338, %v1264_v32  ;;  %v7600_v34 = vpop.f32.mrb[13].mxu1 }
 0x760   :  { %v7046_v34 = vld [vmem:[%s9616_s2 + $0x2] ss:$0 sm:$0xff] }
 0x761   :  { %v1269_v35 = vadd.f32 %v1268_v33, %v9014_v47 }
 0x763   :  { %v1270_v36 = vmul.f32 1.442695, %v1269_v35 }
 0x765   :  { %8380 = vpow2.f32 %v1270_v36 }
 0x76f   :  { %v8381_v37 = vpop.eup %8380 }
 0x770   :  { %v1272_v38 = vsel %vm602_vm5, %v8381_v37, 0.0 }
 0x771   :  { %1273 = vadd.xlane.f32.xlu1 %v1272_v38 }
 0x7fe   :  { %v1274_v40 = vpop.xlane.xlu1 %1273 }
 0x7ff   :  { %8382 = vrcp.f32 %v1274_v40 }
 0x809   :  { %v8383_v41 = vpop.eup %8382 }
 0x80a   :  { %v1276_v43 = vmul.f32 %v8383_v41, %v8381_v37 }
 0x80c   :  { %7604 = vmatmul.mubr.msk.f32.vlgmr.msra.gmra.mrb[14].mxu1 %vm602_vm5, %v1276_v43 }
 0x80d   :  { %7612 = vmatpush3.msra.mxu1 %v765_v44  ;;  %7613 = vmatprep.mubr.msk.f32.mxu1 %vm8659_vm4, %v8658_v19 }
 0x80e   :  { %7621 = vmatprep.subr.mxu1 %v8658_v19 }
 0x810   :  { %7614 = vmatmul.mubr.msk.f32.vlgmr.msra.gmra.mrb[16].mxu1 %vm602_vm5, %v761_v13 }
 0x811   :  { %7622 = vmatpush3.msra.mxu1 %v9026_v63  ;;  %7623 = vmatprep.mubr.msk.f32.mxu1 %vm8659_vm4, %v8658_v19  ;;  %v1892_v63 = vld [vmem:[#allocation9 + $0x48] sm:$0xff] }
 0x812   :  { %7631 = vmatprep.subr.mxu1 %v8658_v19  ;;  %v8162_v2 = vpack.c.bf16 %v1892_v63, %v1891_v62 }
 0x8df   :  { %v1346_v48 = vpop.f32.mrb[14].mxu1 }
 0x8e0   :  { %v7605_v49 = vpop.f32.mrb[15].mxu1  ;;  %7609 = vmatmul.mubr.msk.f32.vlgmr.msra.gmra.mrb[10].mxu0 %vm602_vm5, %v1346_v48 }
 0x8e1   :  { %7617 = vmatpush3.xpose.msk.msra.mxu0 %vm602_vm5, %v1101_v27  ;;  %7618 = vmatprep.mubr.msk.f32.mxu0 %vm8659_vm4, %v8658_v19 }
 0x8e2   :  { %7626 = vmatprep.subr.mxu0 %v8658_v19 }
 0x8e3   :  { %v1494_v50 = vpop.f32.mrb[16].mxu1 }
 0x8e4   :  { %v7615_v51 = vpop.f32.mrb[17].mxu1  ;;  %7619 = vmatmul.mubr.msk.f32.vlgmr.msra.gmra.mrb[12].mxu0 %vm602_vm5, %v9021_v59 }
 0x8e5   :  { %7627 = vmatpush3.msra.mxu0 %v1351_v39  ;;  %7628 = vmatprep.mubr.msk.f32.mxu0 %vm8659_vm4, %v8658_v19  ;;  %v7054_v39 = vld [vmem:[%s9571_s11 + $0x2] ss:$0 sm:$0xff] }
 0x8e6   :  { %8155 = vmatprep.subr.bf16.mxu0 %v8154_v10 }
 0x9b3   :  { %v1421_v52 = vpop.f32.mrb[10].mxu0 }
 0x9b4   :  { %v9074_v53 = vadd.f32 %v1494_v50, %v1421_v52  ;;  %v7610_v16 = vpop.f32.mrb[11].mxu0 }
 0x9b7   :  { %v1570_v54 = vpop.f32.mrb[12].mxu0 }
 0x9b8   :  { %v1574_v55 = vmul.f32 0.35355338, %v1570_v54  ;;  %v7620_v56 = vpop.f32.mrb[13].mxu0 }
 0x9ba   :  { %v1575_v57 = vadd.f32 %v1574_v55, %v9010_v46  ;;  %v2225_v55 = vld [vmem:[#allocation12 + $0x10] sm:$0xff] }
 0x9bc   :  { %v1576_v58 = vmul.f32 1.442695, %v1575_v57 }
 0x9be   :  { %8384 = vpow2.f32 %v1576_v58 }
 0x9c8   :  { %v8385_v60 = vpop.eup %8384 }
 0x9c9   :  { %v1578_v61 = vsel %vm602_vm5, %v8385_v60, 0.0 }
 0x9ca   :  { %1579 = vadd.xlane.f32.xlu1 %v1578_v61 }
 0xa57   :  { %v1580_v59 = vpop.xlane.xlu1 %1579 }
 0xa58   :  { %8386 = vrcp.f32 %v1580_v59 }
 0xa62   :  { %v8387_v0 = vpop.eup %8386 }
 0xa63   :  { %v1582_v1 = vmul.f32 %v8387_v0, %v8385_v60 }
 0xa65   :  { %7624 = vmatmul.mubr.msk.f32.vlgmr.msra.gmra.mrb[18].mxu1 %vm602_vm5, %v1582_v1 }
 0xa66   :  { %7632 = vmatpush3.msra.mxu1 %v765_v44  ;;  %7633 = vmatprep.mubr.msk.f32.mxu1 %vm8659_vm4, %v8658_v19 }
 0xa67   :  { %8163 = vmatprep.subr.bf16.mxu1 %v8162_v2 }
 0xa69   :  { %7634 = vmatmul.mubr.msk.f32.vlgmr.msra.gmra.mrb[20].mxu1 %vm602_vm5, %v9042_v23  ;;  %v1982_v23 = vld [vmem:[#allocation10 + $0x58] sm:$0xff] }
 0xa6a   :  { %8165 = vmatpush3.bf16.msra.mxu1 %v8162_v2  ;;  %7655 = vmatprep.mubr.msk.f32.mxu1 %vm290_vm3, %v8951_v3  ;;  %v8174_v25 = vpack.c.bf16 %v1982_v23, %v1981_v22 }
 0xa6b   :  { %8167 = vmatprep.subr.bf16.mxu1 %v8166_v6 }
 0xa6e   :  { %8169 = vmatpush3.bf16.msra.mxu1 %v8166_v6  ;;  %v2534_v6 = vld [vmem:[#allocation7 + $0x68] sm:$0xff] }
 0xa6f   :  { %7669 = vmatprep.subr.mxu1 %v8658_v19  ;;  %v8178_v7 = vpack.c.bf16 %v2534_v6, %v2533_v5 }
 0xa71   :  { %7656 = vmatmul.mubr.msk.f32.vlgmr.msra.gmra.mrb[22].mxu1 %vm290_vm3, %v8957_v8 }
 0xa72   :  { %7671 = vmatprep.mubr.msk.f32.mxu1 %vm8659_vm4, %v8658_v19 }
 0xb38   :  { %v1652_v15 = vpop.f32.mrb[18].mxu1 }
 0xb39   :  { %v7625_v20 = vpop.f32.mrb[19].mxu1  ;;  %7629 = vmatmul.mubr.msk.f32.vlgmr.msra.gmra.mrb[14].mxu0 %vm602_vm5, %v1652_v15 }
 0xb3a   :  { %8157 = vmatpush3.bf16.msra.mxu0 %v8154_v10  ;;  %7644 = vmatprep.mubr.msk.f32.mxu0 %vm290_vm3, %v8951_v3  ;;  %v2535_v10 = vld [vmem:[#allocation7 + $0x70] sm:$0xff]  ;;  %v8194_v20 = vpack.c.bf16 %v2710_v18, %v2709_v17 }
 0xb3b   :  { %8159 = vmatprep.subr.bf16.mxu0 %v8158_v14  ;;  %v8182_v15 = vpack.c.bf16 %v2536_v11, %v2535_v10 }
 0xb3c   :  { %v1798_v13 = vpop.f32.mrb[20].mxu1 }
 0xb3d   :  { %v7635_v24 = vpop.f32.mrb[21].mxu1 }
 0xb3e   :  { %8161 = vmatpush3.bf16.msra.mxu0 %v8158_v14 }
 0xb3f   :  { %8171 = vmatprep.subr.bf16.mxu0 %v8170_v21 }
 0xb41   :  { %7645 = vmatmul.mubr.msk.f32.vlgmr.msra.gmra.mrb[16].mxu0 %vm290_vm3, %v8957_v8 }
 0xb42   :  { %8173 = vmatpush3.bf16.msra.mxu0 %v8170_v21  ;;  %7666 = vmatprep.mubr.msk.f32.mxu0 %vm290_vm3, %v8951_v3  ;;  %v2711_v21 = vld [vmem:[#allocation10 + $0x70] sm:$0xff] }
 0xb43   :  { %8175 = vmatprep.subr.bf16.mxu0 %v8174_v25 }
 0xb44   :  { %v7657_v27 = vpop.f32.mrb[22].mxu1 }
 0xb45   :  { %v1975_v28 = vadd.f32 %v7657_v27, %v7050_v26  ;;  %v1969_v29 = vpop.f32.mrb[23].mxu1  ;;  %v2622_v27 = vld [vmem:[#allocation9 + $0x68] sm:$0xff] }
 0xb46   :  { %v1970_v30 = vadd.f32 %v7050_v26, %v1969_v29  ;;  %8177 = vmatpush3.bf16.msra.mxu0 %v8174_v25  ;;  %v2621_v26 = vld [vmem:[#allocation9 + $0x60] sm:$0xff]  ;;  %v2623_v29 = vld [vmem:[#allocation9 + $0x70] sm:$0xff] }
 0xb47   :  { %7679 = vmatprep.subr.mxu0 %v8658_v19 }
 0xb48   :  { %7670 = vmatpush3.xpose.msk.msra.mxu1 %vm602_vm5, %v1970_v30  ;;  %v2624_v30 = vld [vmem:[#allocation9 + $0x78] sm:$0xff] }
 0xb49   :  { %7667 = vmatmul.mubr.msk.f32.vlgmr.msra.gmra.mrb[18].mxu0 %vm290_vm3, %v8957_v8  ;;  %7674 = vmatprep.subr.mxu1 %v8658_v19 }
 0xb4a   :  { %7681 = vmatprep.mubr.msk.f32.mxu0 %vm8659_vm4, %v8658_v19  ;;  %7680 = vmatpush3.msra.mxu0 %v2225_v55 }
 0xb4b   :  { %7689 = vmatprep.subr.mxu0 %v8658_v19 }
 0xc0c   :  { %v1725_v31 = vpop.f32.mrb[14].mxu0 }
 0xc0d   :  { %v9107_v32 = vadd.f32 %v1798_v13, %v1725_v31  ;;  %v7630_v33 = vpop.f32.mrb[15].mxu0  ;;  %v2712_v13 = vld [vmem:[#allocation10 + $0x78] sm:$0xff]  ;;  %v8190_v31 = vpack.c.bf16 %v2624_v30, %v2623_v29 }
 0xc0e   :  { %v8198_v22 = vpack.c.bf16 %v2712_v13, %v2711_v21 }
 0xc14   :  { %v7646_v35 = vpop.f32.mrb[16].mxu0 }
 0xc15   :  { %v1887_v36 = vadd.f32 %v7646_v35, %v7046_v34  ;;  %v1881_v37 = vpop.f32.mrb[17].mxu0 }
 0xc16   :  { %v1882_v38 = vadd.f32 %v7046_v34, %v1881_v37 }
 0xc18   :  { %7672 = vmatmul.mubr.msk.f32.vlgmr.msra.gmra.mrb[24].mxu1 %vm602_vm5, %v1882_v38  ;;  %v7074_v38 = vld [vmem:[%s9571_s11 + $0x3] ss:$0 sm:$0xff] }
 0xc19   :  { %7676 = vmatprep.mubr.msk.f32.mxu1 %vm8659_vm4, %v8658_v19 }
 0xc1c   :  { %v7668_v40 = vpop.f32.mrb[18].mxu0 }
 0xc1d   :  { %v2063_v41 = vadd.f32 %v7668_v40, %v7054_v39  ;;  %v2057_v43 = vpop.f32.mrb[19].mxu0 }
 0xc1e   :  { %v2058_v44 = vadd.f32 %v7054_v39, %v2057_v43 }
 0xc20   :  { %7675 = vmatpush3.msra.mxu1 %v2058_v44 }
 0xc21   :  { %7684 = vmatprep.subr.mxu1 %v8658_v19 }
 0xceb   :  { %v2138_v48 = vpop.f32.mrb[24].mxu1 }
 0xcec   :  { %v2142_v49 = vmul.f32 0.35355338, %v2138_v48  ;;  %v7673_v50 = vpop.f32.mrb[25].mxu1 }
 0xcee   :  { %v2143_v51 = vadd.f32 %v2142_v49, %v9014_v47  ;;  %v7070_v49 = vld [vmem:[%s9615_s12 + $0x3] ss:$0 sm:$0xff] }
 0xcf0   :  { %v2144_v52 = vmul.f32 1.442695, %v2143_v51 }
 0xcf2   :  { %8388 = vpow2.f32 %v2144_v52 }
 0xcfc   :  { %v8389_v16 = vpop.eup %8388 }
 0xcfd   :  { %v2146_v54 = vsel %vm602_vm5, %v8389_v16, 0.0 }
 0xcfe   :  { %2147 = vadd.xlane.f32.xlu1 %v2146_v54 }
 0xd8b   :  { %v2148_v56 = vpop.xlane.xlu1 %2147 }
 0xd8c   :  { %8390 = vrcp.f32 %v2148_v56 }
 0xd96   :  { %v8391_v57 = vpop.eup %8390 }
 0xd97   :  { %v2150_v58 = vmul.f32 %v8391_v57, %v8389_v16 }
 0xd99   :  { %7677 = vmatmul.mubr.msk.f32.vlgmr.msra.gmra.mrb[26].mxu1 %vm602_vm5, %v2150_v58 }
 0xd9a   :  { %7685 = vmatpush3.xpose.msk.msra.mxu1 %vm602_vm5, %v1975_v28  ;;  %7686 = vmatprep.mubr.msk.f32.mxu1 %vm8659_vm4, %v8658_v19  ;;  %v8186_v28 = vpack.c.bf16 %v2622_v27, %v2621_v26 }
 0xd9b   :  { %7694 = vmatprep.subr.mxu1 %v8658_v19 }
 0xd9d   :  { %7687 = vmatmul.mubr.msk.f32.vlgmr.msra.gmra.mrb[28].mxu1 %vm602_vm5, %v1887_v36 }
 0xd9e   :  { %7695 = vmatpush3.msra.mxu1 %v2225_v55  ;;  %7696 = vmatprep.mubr.msk.f32.mxu1 %vm8659_vm4, %v8658_v19 }
 0xd9f   :  { %8187 = vmatprep.subr.bf16.mxu1 %v8186_v28 }
 0xe6c   :  { %v2220_v60 = vpop.f32.mrb[26].mxu1 }
 0xe6d   :  { %v7678_v61 = vpop.f32.mrb[27].mxu1  ;;  %7682 = vmatmul.mubr.msk.f32.vlgmr.msra.gmra.mrb[20].mxu0 %vm602_vm5, %v2220_v60 }
 0xe6e   :  { %7690 = vmatpush3.msra.mxu0 %v2063_v41  ;;  %7691 = vmatprep.mubr.msk.f32.mxu0 %vm8659_vm4, %v8658_v19 }
 0xe6f   :  { %8179 = vmatprep.subr.bf16.mxu0 %v8178_v7 }
 0xe70   :  { %v2372_v59 = vpop.f32.mrb[28].mxu1 }
 0xe71   :  { %v2376_v62 = vmul.f32 0.35355338, %v2372_v59  ;;  %v7688_v63 = vpop.f32.mrb[29].mxu1 }
 0xe73   :  { %v2377_v0 = vadd.f32 %v2376_v62, %v9010_v46  ;;  %v2955_v62 = vld [vmem:[#allocation12 + $0x18] sm:$0xff] }
 0xe75   :  { %v2378_v1 = vmul.f32 1.442695, %v2377_v0 }
 0xe77   :  { %8392 = vpow2.f32 %v2378_v1 }
 0xe81   :  { %v8393_v2 = vpop.eup %8392 }
 0xe82   :  { %v2380_v4 = vsel %vm602_vm5, %v8393_v2, 0.0 }
 0xe83   :  { %2381 = vadd.xlane.f32.xlu1 %v2380_v4 }
 0xf10   :  { %v2382_v9 = vpop.xlane.xlu1 %2381 }
 0xf11   :  { %8394 = vrcp.f32 %v2382_v9 }
 0xf1b   :  { %v8395_v12 = vpop.eup %8394 }
 0xf1c   :  { %v2384_v14 = vmul.f32 %v8395_v12, %v8393_v2 }
 0xf1e   :  { %7692 = vmatmul.mubr.msk.f32.vlgmr.msra.gmra.mrb[22].mxu0 %vm602_vm5, %v2384_v14 }
 0xf1f   :  { %8181 = vmatpush3.bf16.msra.mxu0 %v8178_v7  ;;  %7707 = vmatprep.mubr.msk.f32.mxu0 %vm290_vm3, %v8951_v3 }
 0xf20   :  { %8183 = vmatprep.subr.bf16.mxu0 %v8182_v15 }
 0xf23   :  { %8185 = vmatpush3.bf16.msra.mxu0 %v8182_v15 }
 0xf24   :  { %8195 = vmatprep.subr.bf16.mxu0 %v8194_v20 }
 0xf26   :  { %7708 = vmatmul.mubr.msk.f32.vlgmr.msra.gmra.mrb[24].mxu0 %vm290_vm3, %v8957_v8 }
 0xf27   :  { %8197 = vmatpush3.bf16.msra.mxu0 %v8194_v20  ;;  %7729 = vmatprep.mubr.msk.f32.mxu0 %vm290_vm3, %v8951_v3  ;;  %v7085_v20 = vld [vmem:[%s9573_s13] ss:$0 sm:$0xff] }
 0xf28   :  { %8199 = vmatprep.subr.bf16.mxu0 %v8198_v22 }
 0xf2b   :  { %8201 = vmatpush3.bf16.msra.mxu0 %v8198_v22 }
 0xf2c   :  { %7742 = vmatprep.subr.mxu0 %v8658_v19 }
 0xf2e   :  { %7730 = vmatmul.mubr.msk.f32.vlgmr.msra.gmra.mrb[26].mxu0 %vm290_vm3, %v8957_v8 }
 0xf2f   :  { %7744 = vmatprep.mubr.msk.f32.mxu0 %vm8659_vm4, %v8658_v19  ;;  %7743 = vmatpush3.msra.mxu0 %v2955_v62 }
 0xf30   :  { %7752 = vmatprep.subr.mxu0 %v8658_v19 }
 0xf40   :  { %v2295_v23 = vpop.f32.mrb[20].mxu0 }
 0xf41   :  { %v9148_v24 = vadd.f32 %v2295_v23, %v9074_v53  ;;  %v7683_v25 = vpop.f32.mrb[21].mxu0  ;;  %v7066_v53 = vld [vmem:[%s9616_s2 + $0x3] ss:$0 sm:$0xff] }
 0xff1   :  { %v2454_v33 = vpop.f32.mrb[22].mxu0 }
 0xff2   :  { %v7693_v34 = vpop.f32.mrb[23].mxu0  ;;  %7697 = vmatmul.mubr.msk.f32.vlgmr.msra.gmra.mrb[30].mxu1 %vm602_vm5, %v2454_v33 }
 0xff3   :  { %8189 = vmatpush3.bf16.msra.mxu1 %v8186_v28  ;;  %7718 = vmatprep.mubr.msk.f32.mxu1 %vm290_vm3, %v8951_v3 }
 0xff4   :  { %8191 = vmatprep.subr.bf16.mxu1 %v8190_v31 }
 0xff7   :  { %8193 = vmatpush3.bf16.msra.mxu1 %v8190_v31 }
 0xff8   :  { %7732 = vmatprep.subr.mxu1 %v8658_v19 }
 0xff9   :  { %v7709_v35 = vpop.f32.mrb[24].mxu0 }
 0xffa   :  { %v2617_v36 = vadd.f32 %v7709_v35, %v7066_v53  ;;  %v2611_v37 = vpop.f32.mrb[25].mxu0  ;;  %7719 = vmatmul.mubr.msk.f32.vlgmr.msra.gmra.mrb[32].mxu1 %vm290_vm3, %v8957_v8 }
 0xffb   :  { %7734 = vmatprep.mubr.msk.f32.mxu1 %vm8659_vm4, %v8658_v19  ;;  %v2612_v54 = vadd.f32 %v7066_v53, %v2611_v37  ;;  %v7087_v37 = vld [vmem:[%s9575_s15] ss:$0 sm:$0xff] }
0x1001   :  { %v7731_v39 = vpop.f32.mrb[26].mxu0 }
0x1002   :  { %v2793_v40 = vadd.f32 %v7731_v39, %v7074_v38  ;;  %v2787_v41 = vpop.f32.mrb[27].mxu0 }
0x1003   :  { %v2788_v55 = vadd.f32 %v7074_v38, %v2787_v41 }
0x10c5   :  { %v2527_v43 = vpop.f32.mrb[30].mxu1 }
0x10c6   :  { %v9165_v44 = vadd.f32 %v2527_v43, %v9107_v32  ;;  %v7698_v48 = vpop.f32.mrb[31].mxu1 }
0x10cd   :  { %v7720_v50 = vpop.f32.mrb[32].mxu1 }
0x10ce   :  { %v2705_v51 = vadd.f32 %v7720_v50, %v7070_v49  ;;  %v2699_v52 = vpop.f32.mrb[33].mxu1 }
0x10cf   :  { %v2700_v16 = vadd.f32 %v7070_v49, %v2699_v52 }
0x10d1   :  { %7733 = vmatpush3.xpose.msk.msra.mxu1 %vm602_vm5, %v2700_v16 }
0x10d2   :  { %7737 = vmatprep.subr.mxu1 %v8658_v19 }
0x10d4   :  { %7735 = vmatmul.mubr.msk.f32.vlgmr.msra.gmra.mrb[34].mxu1 %vm602_vm5, %v2612_v54 }
0x10d5   :  { %7738 = vmatpush3.msra.mxu1 %v2788_v55  ;;  %7739 = vmatprep.mubr.msk.f32.mxu1 %vm8659_vm4, %v8658_v19 }
0x10d6   :  { %7747 = vmatprep.subr.mxu1 %v8658_v19 }
0x11a7   :  { %v2868_v32 = vpop.f32.mrb[34].mxu1 }
0x11a8   :  { %v2872_v56 = vmul.f32 0.35355338, %v2868_v32  ;;  %v7736_v57 = vpop.f32.mrb[35].mxu1  ;;  %v3317_v32 = vld [vmem:[%s9576_s16] sm:$0xff] }
0x11a9   :  { %v3320_v57 = vld [vmem:[%s9576_s16 + $0x18] sm:$0xff] }
0x11aa   :  { %v2873_v58 = vadd.f32 %v2872_v56, %v9014_v47 }
0x11ac   :  { %v2874_v60 = vmul.f32 1.442695, %v2873_v58 }
0x11ae   :  { %8396 = vpow2.f32 %v2874_v60 }
0x11b8   :  { %v8397_v61 = vpop.eup %8396 }
0x11b9   :  { %v2876_v59 = vsel %vm602_vm5, %v8397_v61, 0.0 }
0x11ba   :  { %2877 = vadd.xlane.f32.xlu1 %v2876_v59 }
0x1247   :  { %v2878_v63 = vpop.xlane.xlu1 %2877 }
0x1248   :  { %8398 = vrcp.f32 %v2878_v63 }
0x1252   :  { %v8399_v0 = vpop.eup %8398 }
0x1253   :  { %v2880_v1 = vmul.f32 %v8399_v0, %v8397_v61 }
0x1255   :  { %7740 = vmatmul.mubr.msk.f32.vlgmr.msra.gmra.mrb[36].mxu1 %vm602_vm5, %v2880_v1 }
0x1256   :  { %7748 = vmatpush3.xpose.msk.msra.mxu1 %vm602_vm5, %v2705_v51  ;;  %7749 = vmatprep.mubr.msk.f32.mxu1 %vm8659_vm4, %v8658_v19 }
0x1257   :  { %7757 = vmatprep.subr.mxu1 %v8658_v19 }
0x1259   :  { %7750 = vmatmul.mubr.msk.f32.vlgmr.msra.gmra.mrb[38].mxu1 %vm602_vm5, %v2617_v36 }
0x125a   :  { %7758 = vmatpush3.msra.mxu1 %v2955_v62  ;;  %7759 = vmatprep.mubr.msk.f32.mxu1 %vm8659_vm4, %v8658_v19 }
0x1328   :  { %v2950_v2 = vpop.f32.mrb[36].mxu1 }
0x1329   :  { %v7741_v4 = vpop.f32.mrb[37].mxu1  ;;  %7745 = vmatmul.mubr.msk.f32.vlgmr.msra.gmra.mrb[28].mxu0 %vm602_vm5, %v2950_v2  ;;  %v3427_v2 = vld [vmem:[#allocation13] sm:$0xff] }
0x132a   :  { %7753 = vmatpush3.msra.mxu0 %v2793_v40  ;;  %7754 = vmatprep.mubr.msk.f32.mxu0 %vm8659_vm4, %v8658_v19  ;;  %v3428_v4 = vld [vmem:[#allocation13 + $0x8] sm:$0xff] }
0x132c   :  { %v3102_v5 = vpop.f32.mrb[38].mxu1 }
0x132d   :  { %v3106_v6 = vmul.f32 0.35355338, %v3102_v5  ;;  %v7751_v7 = vpop.f32.mrb[39].mxu1  ;;  %v8210_v5 = vpack.c.bf16 %v3428_v4, %v3427_v2  ;;  %v3572_v4 = vld [vmem:[#allocation7 + $0x90] sm:$0xff] }
0x132e   :  { %v3430_v7 = vld [vmem:[#allocation13 + $0x18] sm:$0xff] }
0x132f   :  { %v3107_v9 = vadd.f32 %v3106_v6, %v9010_v46  ;;  %8211 = vmatprep.subr.bf16.mxu1 %v8210_v5  ;;  %v3429_v6 = vld [vmem:[#allocation13 + $0x10] sm:$0xff] }
0x1331   :  { %v3108_v10 = vmul.f32 1.442695, %v3107_v9  ;;  %v8214_v9 = vpack.c.bf16 %v3430_v7, %v3429_v6  ;;  %v3754_v7 = vld [vmem:[#allocation10 + $0x90] sm:$0xff] }
0x1333   :  { %8400 = vpow2.f32 %v3108_v10  ;;  %v3431_v10 = vld [vmem:[#allocation13 + $0x20] sm:$0xff] }
0x133d   :  { %v8401_v11 = vpop.eup %8400 }
0x133e   :  { %v3110_v12 = vsel %vm602_vm5, %v8401_v11, 0.0 }
0x133f   :  { %3111 = vadd.xlane.f32.xlu0 %v3110_v12 }
0x13cc   :  { %v3112_v14 = vpop.xlane.xlu0 %3111 }
0x13cd   :  { %8402 = vrcp.f32 %v3112_v14  ;;  %v3433_v14 = vld [vmem:[#allocation13 + $0x30] sm:$0xff] }
0x13d7   :  { %v8403_v15 = vpop.eup %8402 }
0x13d8   :  { %v3114_v17 = vmul.f32 %v8403_v15, %v8401_v11  ;;  %v3432_v11 = vld [vmem:[#allocation13 + $0x28] sm:$0xff]  ;;  %v3434_v15 = vld [vmem:[#allocation13 + $0x38] sm:$0xff] }
0x13d9   :  { %v8218_v12 = vpack.c.bf16 %v3432_v11, %v3431_v10  ;;  %v3664_v11 = vld [vmem:[#allocation9 + $0x80] sm:$0xff] }
0x13da   :  { %7755 = vmatmul.mubr.msk.f32.vlgmr.msra.gmra.mrb[30].mxu0 %vm602_vm5, %v3114_v17  ;;  %v8222_v17 = vpack.c.bf16 %v3434_v15, %v3433_v14 }
0x13fc   :  { %v3025_v18 = vpop.f32.mrb[28].mxu0 }
0x13fd   :  { %v3029_v21 = vadd.f32 %v3025_v18, %v9148_v24  ;;  %v7746_v13 = vpop.f32.mrb[29].mxu0  ;;  %v7088_v18 = vld [vmem:[%s9577_s17] ss:$0 sm:$0xff] }
0x13ff   :  { %v3269_v22 = vadd.f32 %v7085_v20, %v3029_v21 }
0x1401   :  { %v3271_v23 = vadd.f32 %v3269_v22, %v8951_v3  ;;  %v7086_v3 = vld [vmem:[%s9574_s14] ss:$0 sm:$0xff] }
0x1403   :  { %v3275_v25 = vsel %vm290_vm3, %v3271_v23, 0.0 }
0x1404   :  { %3276 = vadd.xlane.f32.xlu1 %v3275_v25 }
0x1491   :  { %v3277_v26 = vpop.xlane.xlu1 %3276 }
0x1492   :  { %v3281_v27 = vmul.f32 0.03125, %v3277_v26 }
0x1494   :  { %v3283_v28 = vsub.f32 %v3271_v23, %v3281_v27 }
0x1496   :  { %v3285_v29 = vmul.f32 %v3283_v28, %v3283_v28 }
0x1498   :  { %v3287_v30 = vsel %vm290_vm3, %v3285_v29, 0.0 }
0x1499   :  { %3288 = vadd.xlane.f32.xlu1 %v3287_v30 }
0x14ad   :  { %v3184_v31 = vpop.f32.mrb[30].mxu0 }
0x14ae   :  { %v7756_v33 = vpop.f32.mrb[31].mxu0  ;;  %7760 = vmatmul.mubr.msk.f32.vlgmr.msra.gmra.mrb[40].mxu1 %vm602_vm5, %v3184_v31 }
0x14af   :  { %8213 = vmatpush3.bf16.msra.mxu1 %v8210_v5  ;;  %v3573_v5 = vld [vmem:[#allocation7 + $0x98] sm:$0xff] }
0x14b0   :  { %8215 = vmatprep.subr.bf16.mxu1 %v8214_v9  ;;  %v8230_v6 = vpack.c.bf16 %v3573_v5, %v3572_v4 }
0x14b3   :  { %8217 = vmatpush3.bf16.msra.mxu1 %v8214_v9  ;;  %v3755_v9 = vld [vmem:[#allocation10 + $0x98] sm:$0xff] }
0x14b4   :  { %8219 = vmatprep.subr.bf16.mxu1 %v8218_v12  ;;  %v8246_v10 = vpack.c.bf16 %v3755_v9, %v3754_v7 }
0x14b7   :  { %8221 = vmatpush3.bf16.msra.mxu1 %v8218_v12  ;;  %v3665_v12 = vld [vmem:[#allocation9 + $0x88] sm:$0xff] }
0x14b8   :  { %8223 = vmatprep.subr.bf16.mxu1 %v8222_v17  ;;  %v8234_v14 = vpack.c.bf16 %v3665_v12, %v3664_v11  ;;  %v7115_v11 = vld [vmem:[%s9616_s2 + $0x5] ss:$0 sm:$0xff] }
0x14bb   :  { %8225 = vmatpush3.bf16.msra.mxu1 %v8222_v17 }
0x1526   :  { %v3289_v34 = vpop.xlane.xlu1 %3288 }
0x1527   :  { %v3293_v24 = vmul.f32 0.03125, %v3289_v34 }
0x1529   :  { %v3295_v53 = vadd.f32 1e-12, %v3293_v24 }
0x152b   :  { %8404 = vrsqrt.f32 %v3295_v53 }
0x1535   :  { %v8405_v35 = vpop.eup %8404 }
0x1536   :  { %v3299_v36 = vmul.f32 %v8405_v35, %v3283_v28 }
0x1538   :  { %v3307_v38 = vmul.f32 %v7086_v3, %v3299_v36 }
0x153a   :  { %v9207_v39 = vadd.f32 %v7087_v37, %v3307_v38 }
0x153c   :  { %7770 = vmatprep.mubr.msk.f32.mxu0 %vm290_vm3, %v9207_v39 }
0x1581   :  { %v3257_v40 = vpop.f32.mrb[40].mxu1 }
0x1582   :  { %v3261_v41 = vadd.f32 %v3257_v40, %v9165_v44  ;;  %v7761_v43 = vpop.f32.mrb[41].mxu1  ;;  %v3318_v44 = vld [vmem:[%s9576_s16 + $0x8] sm:$0xff] }
0x1583   :  { %v8202_v56 = vpack.c.bf16 %v3318_v44, %v3317_v32 }
0x1584   :  { %v3270_v48 = vadd.f32 %v7085_v20, %v3261_v41  ;;  %v7091_v41 = vld [vmem:[%s9579_s19] ss:$0 sm:$0xff] }
0x1585   :  { %8203 = vmatprep.subr.bf16.mxu0 %v8202_v56 }
0x1586   :  { %v3272_v49 = vadd.f32 %v3270_v48, %v8957_v8  ;;  %8205 = vmatpush3.bf16.msra.mxu0 %v8202_v56  ;;  %v3319_v8 = vld [vmem:[%s9576_s16 + $0x10] sm:$0xff] }
0x1587   :  { %v8206_v58 = vpack.c.bf16 %v3320_v57, %v3319_v8 }
0x1588   :  { %v3278_v50 = vsel %vm290_vm3, %v3272_v49, 0.0 }
0x1589   :  { %3279 = vadd.xlane.f32.xlu0 %v3278_v50  ;;  %8207 = vmatprep.subr.bf16.mxu0 %v8206_v58 }
0x158a   :  { %8209 = vmatpush3.bf16.msra.mxu0 %v8206_v58 }
0x1616   :  { %v3280_v51 = vpop.xlane.xlu0 %3279 }
0x1617   :  { %v3282_v52 = vmul.f32 0.03125, %v3280_v51 }
0x1619   :  { %v3284_v16 = vsub.f32 %v3272_v49, %v3282_v52 }
0x161b   :  { %v3286_v54 = vmul.f32 %v3284_v16, %v3284_v16 }
0x161d   :  { %v3290_v55 = vsel %vm290_vm3, %v3286_v54, 0.0 }
0x161e   :  { %3291 = vadd.xlane.f32.xlu0 %v3290_v55 }
0x16ab   :  { %v3292_v60 = vpop.xlane.xlu0 %3291 }
0x16ac   :  { %v3294_v61 = vmul.f32 0.03125, %v3292_v60 }
0x16ae   :  { %v3296_v59 = vadd.f32 1e-12, %v3294_v61 }
0x16b0   :  { %8406 = vrsqrt.f32 %v3296_v59 }
0x16ba   :  { %v8407_v62 = vpop.eup %8406 }
0x16bb   :  { %v3300_v63 = vmul.f32 %v8407_v62, %v3284_v16  ;;  %v3571_v62 = vld [vmem:[#allocation7 + $0x88] sm:$0xff] }
0x16bd   :  { %v3308_v0 = vmul.f32 %v7086_v3, %v3300_v63 }
0x16bf   :  { %v3316_v1 = vadd.f32 %v7087_v37, %v3308_v0  ;;  %v3752_v0 = vld [vmem:[#allocation10 + $0x80] sm:$0xff] }
0x16c1   :  { %7771 = vmatmul.mubr.msk.f32.vlgmr.msra.gmra.mrb[32].mxu0 %vm290_vm3, %v3316_v1 }
0x1794   :  { %v7772_v20 = vpop.f32.mrb[32].mxu0 }
0x1795   :  { %v3406_v21 = vadd.f32 %v7772_v20, %v7088_v18  ;;  %v3400_v13 = vpop.f32.mrb[33].mxu0 }
0x1796   :  { %v3401_v22 = vadd.f32 %v7088_v18, %v3400_v13 }
0x1797   :  { %v3410_v23 = vmul.f32 %v3406_v21, %v3406_v21 }
0x1798   :  { %v3409_v25 = vmul.f32 %v3401_v22, %v3401_v22 }
0x1799   :  { %v3412_v26 = vmul.f32 %v3410_v23, %v3406_v21  ;;  %v7094_v23 = vld [vmem:[%s9580_s20] ss:$0 sm:$0xff] }
0x179a   :  { %v3411_v27 = vmul.f32 %v3409_v25, %v3401_v22 }
0x179b   :  { %v3414_v28 = vmul.f32 0.044715, %v3412_v26 }
0x179c   :  { %v3413_v29 = vmul.f32 0.044715, %v3411_v27 }
0x179d   :  { %v3416_v30 = vadd.f32 %v3414_v28, %v3406_v21  ;;  %v7095_v28 = vld [vmem:[%s9581_s21] ss:$0 sm:$0xff] }
0x179e   :  { %v3415_v31 = vadd.f32 %v3413_v29, %v3401_v22 }
0x179f   :  { %v3418_v33 = vmul.f32 0.7978846, %v3416_v30 }
0x17a0   :  { %v3417_v34 = vmul.f32 0.7978846, %v3415_v31  ;;  %v3666_v31 = vld [vmem:[#allocation9 + $0x90] sm:$0xff] }
0x17a1   :  { %8408 = vtanh.f32 %v3418_v33  ;;  %v3667_v33 = vld [vmem:[#allocation9 + $0x98] sm:$0xff] }
0x17a2   :  { %8410 = vtanh.f32 %v3417_v34 }
0x17ab   :  { %v8409_v24 = vpop.eup %8408 }
0x17ac   :  { %v8411_v53 = vpop.eup %8410  ;;  %v3422_v35 = vadd.f32 1.0, %v8409_v24 }
0x17ad   :  { %v3421_v3 = vadd.f32 1.0, %v8411_v53  ;;  %v8238_v53 = vpack.c.bf16 %v3667_v33, %v3666_v31 }
0x17ae   :  { %v3424_v36 = vmul.f32 0.5, %v3422_v35  ;;  %v7105_v35 = vld [vmem:[%s9571_s11 + $0x4] ss:$0 sm:$0xff] }
0x17af   :  { %v3423_v37 = vmul.f32 0.5, %v3421_v3 }
0x17b0   :  { %v3426_v40 = vmul.f32 %v3424_v36, %v3406_v21 }
0x17b1   :  { %v3425_v38 = vmul.f32 %v3423_v37, %v3401_v22 }
0x17b3   :  { %7789 = vmatprep.mubr.msk.f32.mxu1 %vm206_vm0, %v3425_v38 }
0x17b4   :  { %7790 = vmatmul.mubr.msk.f32.vlgmr.msra.gmra.mrb[42].mxu1 %vm206_vm0, %v3426_v40 }
0x1887   :  { %v7791_v43 = vpop.f32.mrb[42].mxu1 }
0x1888   :  { %v3520_v48 = vadd.f32 %v7791_v43, %v7091_v41  ;;  %v3514_v49 = vpop.f32.mrb[43].mxu1  ;;  %v7101_v43 = vld [vmem:[%s9615_s12 + $0x4] ss:$0 sm:$0xff] }
0x1889   :  { %v3515_v50 = vadd.f32 %v7091_v41, %v3514_v49 }
0x188a   :  { %v3524_v51 = vadd.f32 %v3520_v48, %v3316_v1  ;;  %v3753_v1 = vld [vmem:[#allocation10 + $0x88] sm:$0xff] }
0x188b   :  { %v3523_v52 = vadd.f32 %v3515_v50, %v9207_v39  ;;  %v3570_v39 = vld [vmem:[#allocation7 + $0x80] sm:$0xff]  ;;  %v8242_v2 = vpack.c.bf16 %v3753_v1, %v3752_v0  ;;  %v7097_v50 = vld [vmem:[%s9616_s2 + $0x4] ss:$0 sm:$0xff] }
0x188c   :  { %v3530_v16 = vsel %vm290_vm3, %v3524_v51, 0.0  ;;  %v8226_v63 = vpack.c.bf16 %v3571_v62, %v3570_v39  ;;  %v4337_v39 = vld [vmem:[#allocation10 + $0xb8] sm:$0xff] }
0x188d   :  { %3531 = vadd.xlane.f32.xlu0 %v3530_v16  ;;  %v3527_v54 = vsel %vm290_vm3, %v3523_v52, 0.0  ;;  %8243 = vmatprep.subr.bf16.mxu1 %v8242_v2  ;;  %v4159_v16 = vld [vmem:[#allocation7 + $0xa8] sm:$0xff] }
0x188e   :  { %3528 = vadd.xlane.f32.xlu1 %v3527_v54  ;;  %8227 = vmatprep.subr.bf16.mxu0 %v8226_v63 }
0x188f   :  { %8229 = vmatpush3.bf16.msra.mxu0 %v8226_v63  ;;  %8245 = vmatpush3.bf16.msra.mxu1 %v8242_v2 }
0x1890   :  { %8231 = vmatprep.subr.bf16.mxu0 %v8230_v6  ;;  %8247 = vmatprep.subr.bf16.mxu1 %v8246_v10 }
0x1893   :  { %8233 = vmatpush3.bf16.msra.mxu0 %v8230_v6  ;;  %8249 = vmatpush3.bf16.msra.mxu1 %v8246_v10 }
0x1894   :  { %7830 = vmatprep.subr.mxu1 %v8658_v19  ;;  %8235 = vmatprep.subr.bf16.mxu0 %v8234_v14 }
0x191a   :  { %v3532_v55 = vpop.xlane.xlu0 %3531 }
0x191b   :  { %v3534_v32 = vmul.f32 0.03125, %v3532_v55  ;;  %v3529_v44 = vpop.xlane.xlu1 %3528 }
0x191c   :  { %v3533_v56 = vmul.f32 0.03125, %v3529_v44  ;;  %v4160_v44 = vld [vmem:[#allocation7 + $0xb0] sm:$0xff] }
0x191d   :  { %v3536_v8 = vsub.f32 %v3524_v51, %v3534_v32 }
0x191e   :  { %v3535_v57 = vsub.f32 %v3523_v52, %v3533_v56  ;;  %v4158_v52 = vld [vmem:[#allocation7 + $0xa0] sm:$0xff]  ;;  %v4161_v56 = vld [vmem:[#allocation7 + $0xb8] sm:$0xff] }
0x191f   :  { %v3538_v58 = vmul.f32 %v3536_v8, %v3536_v8  ;;  %v8250_v55 = vpack.c.bf16 %v4159_v16, %v4158_v52 }
0x1920   :  { %v3537_v60 = vmul.f32 %v3535_v57, %v3535_v57 }
0x1921   :  { %v3542_v61 = vsel %vm290_vm3, %v3538_v58, 0.0  ;;  %v4334_v58 = vld [vmem:[#allocation10 + $0xa0] sm:$0xff] }
0x1922   :  { %3543 = vadd.xlane.f32.xlu0 %v3542_v61  ;;  %v3539_v59 = vsel %vm290_vm3, %v3537_v60, 0.0  ;;  %v4335_v60 = vld [vmem:[#allocation10 + $0xa8] sm:$0xff] }
0x1923   :  { %3540 = vadd.xlane.f32.xlu1 %v3539_v59  ;;  %v8266_v61 = vpack.c.bf16 %v4335_v60, %v4334_v58  ;;  %v4336_v59 = vld [vmem:[#allocation10 + $0xb0] sm:$0xff]  ;;  %v4580_v60 = vld [vmem:[#allocation12 + $0x28] sm:$0xff] }
0x1924   :  { %v8270_v62 = vpack.c.bf16 %v4337_v39, %v4336_v59 }
0x19af   :  { %v3544_v15 = vpop.xlane.xlu0 %3543 }
0x19b0   :  { %v3546_v17 = vmul.f32 0.03125, %v3544_v15  ;;  %v3541_v18 = vpop.xlane.xlu1 %3540 }
0x19b1   :  { %v3545_v20 = vmul.f32 0.03125, %v3541_v18 }
0x19b2   :  { %v3548_v21 = vadd.f32 1e-12, %v3546_v17 }
0x19b3   :  { %v3547_v13 = vadd.f32 1e-12, %v3545_v20  ;;  %v7123_v20 = vld [vmem:[%s9571_s11 + $0x5] ss:$0 sm:$0xff] }
0x19b4   :  { %8412 = vrsqrt.f32 %v3548_v21 }
0x19b5   :  { %8414 = vrsqrt.f32 %v3547_v13 }
0x19be   :  { %v8413_v22 = vpop.eup %8412 }
0x19bf   :  { %v8415_v25 = vpop.eup %8414  ;;  %v3552_v26 = vmul.f32 %v8413_v22, %v3536_v8 }
0x19c0   :  { %v3551_v27 = vmul.f32 %v8415_v25, %v3535_v57  ;;  %v8254_v57 = vpack.c.bf16 %v4161_v56, %v4160_v44 }
0x19c1   :  { %v3560_v29 = vmul.f32 %v7094_v23, %v3552_v26 }
0x19c2   :  { %v3559_v30 = vmul.f32 %v7094_v23, %v3551_v27 }
0x19c3   :  { %v9250_v24 = vadd.f32 %v7095_v28, %v3560_v29  ;;  %v4247_v29 = vld [vmem:[#allocation9 + $0xa8] sm:$0xff] }
0x19c4   :  { %v9248_v34 = vadd.f32 %v7095_v28, %v3559_v30  ;;  %v4246_v28 = vld [vmem:[#allocation9 + $0xa0] sm:$0xff] }
0x19c5   :  { %v8258_v33 = vpack.c.bf16 %v4247_v29, %v4246_v28  ;;  %v5033_v28 = vld [vmem:[#allocation7 + $0xc8] sm:$0xff] }
0x19c6   :  { %7800 = vmatprep.mubr.msk.f32.mxu0 %vm290_vm3, %v9248_v34  ;;  %7822 = vmatprep.mubr.msk.f32.mxu1 %vm290_vm3, %v9248_v34 }
0x19c7   :  { %7801 = vmatmul.mubr.msk.f32.vlgmr.msra.gmra.mrb[34].mxu0 %vm290_vm3, %v9250_v24  ;;  %7823 = vmatmul.mubr.msk.f32.vlgmr.msra.gmra.mrb[44].mxu1 %vm290_vm3, %v9250_v24 }
0x19c8   :  { %8237 = vmatpush3.bf16.msra.mxu0 %v8234_v14  ;;  %7811 = vmatprep.mubr.msk.f32.mxu0 %vm290_vm3, %v9248_v34 }
0x19c9   :  { %8239 = vmatprep.subr.bf16.mxu0 %v8238_v53  ;;  %7832 = vmatprep.mubr.msk.f32.mxu1 %vm8659_vm4, %v8658_v19 }
0x19cc   :  { %8241 = vmatpush3.bf16.msra.mxu0 %v8238_v53  ;;  %v4248_v53 = vld [vmem:[#allocation9 + $0xb0] sm:$0xff] }
0x19cd   :  { %7825 = vmatprep.subr.mxu0 %v8658_v19 }
0x19cf   :  { %7812 = vmatmul.mubr.msk.f32.vlgmr.msra.gmra.mrb[36].mxu0 %vm290_vm3, %v9250_v24 }
0x19d0   :  { %7827 = vmatprep.mubr.msk.f32.mxu0 %vm8659_vm4, %v8658_v19 }
0x1a9a   :  { %v7802_v3 = vpop.f32.mrb[34].mxu0  ;;  %v7824_v36 = vpop.f32.mrb[44].mxu1 }
0x1a9b   :  { %v9272_v37 = vadd.f32 %v7824_v36, %v7105_v35  ;;  %v3654_v38 = vpop.f32.mrb[35].mxu0  ;;  %v3830_v40 = vpop.f32.mrb[45].mxu1  ;;  %v3660_v8 = vadd.f32 %v7802_v3, %v7097_v50 }
0x1a9c   :  { %v3831_v41 = vadd.f32 %v7105_v35, %v3830_v40  ;;  %v3655_v54 = vadd.f32 %v7097_v50, %v3654_v38  ;;  %v4249_v35 = vld [vmem:[#allocation9 + $0xb8] sm:$0xff] }
0x1a9d   :  { %v8262_v38 = vpack.c.bf16 %v4249_v35, %v4248_v53  ;;  %v5208_v35 = vld [vmem:[#allocation10 + $0xc0] sm:$0xff] }
0x1a9e   :  { %7831 = vmatpush3.msra.mxu1 %v3831_v41 }
0x1a9f   :  { %7840 = vmatprep.subr.mxu1 %v8658_v19 }
0x1aa2   :  { %v7813_v48 = vpop.f32.mrb[36].mxu0 }
0x1aa3   :  { %v3742_v49 = vpop.f32.mrb[37].mxu0  ;;  %v3748_v32 = vadd.f32 %v7813_v48, %v7101_v43  ;;  %v7119_v48 = vld [vmem:[%s9615_s12 + $0x5] ss:$0 sm:$0xff] }
0x1aa4   :  { %v3743_v51 = vadd.f32 %v7101_v43, %v3742_v49 }
0x1aa6   :  { %7826 = vmatpush3.xpose.msk.msra.mxu0 %vm602_vm5, %v3743_v51 }
0x1aa7   :  { %7835 = vmatprep.subr.mxu0 %v8658_v19 }
0x1aa9   :  { %7828 = vmatmul.mubr.msk.f32.vlgmr.msra.gmra.mrb[38].mxu0 %vm602_vm5, %v3655_v54 }
0x1aaa   :  { %7836 = vmatpush3.xpose.msk.msra.mxu0 %vm602_vm5, %v3748_v32  ;;  %7837 = vmatprep.mubr.msk.f32.mxu0 %vm8659_vm4, %v8658_v19 }
0x1aab   :  { %8251 = vmatprep.subr.bf16.mxu0 %v8250_v55 }
0x1aad   :  { %7838 = vmatmul.mubr.msk.f32.vlgmr.msra.gmra.mrb[40].mxu0 %vm602_vm5, %v3660_v8 }
0x1aae   :  { %8253 = vmatpush3.bf16.msra.mxu0 %v8250_v55  ;;  %7853 = vmatprep.mubr.msk.f32.mxu0 %vm290_vm3, %v9248_v34 }
0x1aaf   :  { %8255 = vmatprep.subr.bf16.mxu0 %v8254_v57 }
0x1ab2   :  { %8257 = vmatpush3.bf16.msra.mxu0 %v8254_v57 }
0x1ab3   :  { %8267 = vmatprep.subr.bf16.mxu0 %v8266_v61 }
0x1ab5   :  { %7854 = vmatmul.mubr.msk.f32.vlgmr.msra.gmra.mrb[42].mxu0 %vm290_vm3, %v9250_v24 }
0x1ab6   :  { %8269 = vmatpush3.bf16.msra.mxu0 %v8266_v61  ;;  %7875 = vmatprep.mubr.msk.f32.mxu0 %vm290_vm3, %v9248_v34 }
0x1ab7   :  { %8271 = vmatprep.subr.bf16.mxu0 %v8270_v62 }
0x1aba   :  { %8273 = vmatpush3.bf16.msra.mxu0 %v8270_v62  ;;  %v3998_v62 = vld [vmem:[#allocation12 + $0x20] sm:$0xff] }
0x1abb   :  { %7888 = vmatprep.subr.mxu0 %v8658_v19 }
0x1abd   :  { %7876 = vmatmul.mubr.msk.f32.vlgmr.msra.gmra.mrb[44].mxu0 %vm290_vm3, %v9250_v24 }
0x1abe   :  { %7890 = vmatprep.mubr.msk.f32.mxu0 %vm8659_vm4, %v8658_v19  ;;  %7889 = vmatpush3.msra.mxu0 %v4580_v60 }
0x1abf   :  { %7898 = vmatprep.subr.mxu0 %v8658_v19 }
0x1b7c   :  { %v3911_v63 = vpop.f32.mrb[38].mxu0 }
0x1b7d   :  { %v3915_v0 = vmul.f32 0.35355338, %v3911_v63  ;;  %v7829_v1 = vpop.f32.mrb[39].mxu0 }
0x1b7f   :  { %v3916_v2 = vadd.f32 %v3915_v0, %v9014_v47 }
0x1b80   :  { %v4071_v4 = vpop.f32.mrb[40].mxu0 }
0x1b81   :  { %v3917_v5 = vmul.f32 1.442695, %v3916_v2  ;;  %v4075_v6 = vmul.f32 0.35355338, %v4071_v4  ;;  %v7839_v7 = vpop.f32.mrb[41].mxu0 }
0x1b83   :  { %8416 = vpow2.f32 %v3917_v5  ;;  %v4076_v9 = vadd.f32 %v4075_v6, %v9010_v46 }
0x1b85   :  { %v4077_v10 = vmul.f32 1.442695, %v4076_v9 }
0x1b87   :  { %8418 = vpow2.f32 %v4077_v10 }
0x1b88   :  { %v7855_v12 = vpop.f32.mrb[42].mxu0 }
0x1b89   :  { %v9304_v14 = vadd.f32 %v7855_v12, %v7115_v11  ;;  %v4236_v15 = vpop.f32.mrb[43].mxu0 }
0x1b8a   :  { %v4237_v16 = vadd.f32 %v7115_v11, %v4236_v15 }
0x1b8d   :  { %v8417_v17 = vpop.eup %8416 }
0x1b8e   :  { %v3919_v18 = vsel %vm602_vm5, %v8417_v17, 0.0 }
0x1b8f   :  { %3920 = vadd.xlane.f32.xlu1 %v3919_v18  ;;  %v5120_v18 = vld [vmem:[#allocation9 + $0xc0] sm:$0xff] }
0x1b90   :  { %v7877_v21 = vpop.f32.mrb[44].mxu0 }
0x1b91   :  { %v8419_v13 = vpop.eup %8418  ;;  %v9310_v22 = vadd.f32 %v7877_v21, %v7123_v20  ;;  %v4412_v23 = vpop.f32.mrb[45].mxu0 }
0x1b92   :  { %v4079_v25 = vsel %vm602_vm5, %v8419_v13, 0.0  ;;  %v4413_v54 = vadd.f32 %v7123_v20, %v4412_v23  ;;  %v5121_v20 = vld [vmem:[#allocation9 + $0xc8] sm:$0xff]  ;;  %v5122_v23 = vld [vmem:[#allocation9 + $0xd0] sm:$0xff] }
0x1b93   :  { %4080 = vadd.xlane.f32.xlu0 %v4079_v25  ;;  %v5123_v25 = vld [vmem:[#allocation9 + $0xd8] sm:$0xff] }
0x1c1c   :  { %v3921_v26 = vpop.xlane.xlu1 %3920 }
0x1c1d   :  { %8420 = vrcp.f32 %v3921_v26  ;;  %v8286_v26 = vpack.c.bf16 %v5123_v25, %v5122_v23  ;;  %v5762_v25 = vld [vmem:[#allocation7 + $0xe0] sm:$0xff] }
0x1c20   :  { %v4081_v27 = vpop.xlane.xlu0 %4080 }
0x1c21   :  { %8422 = vrcp.f32 %v4081_v27  ;;  %v5032_v27 = vld [vmem:[#allocation7 + $0xc0] sm:$0xff] }
0x1c22   :  { %v8274_v29 = vpack.c.bf16 %v5033_v28, %v5032_v27 }
0x1c27   :  { %v8421_v30 = vpop.eup %8420 }
0x1c28   :  { %v3923_v31 = vmul.f32 %v8421_v30, %v8417_v17  ;;  %v5034_v30 = vld [vmem:[#allocation7 + $0xd0] sm:$0xff] }
0x1c2a   :  { %7833 = vmatmul.mubr.msk.f32.vlgmr.msra.gmra.mrb[46].mxu1 %vm602_vm5, %v3923_v31  ;;  %v5035_v31 = vld [vmem:[#allocation7 + $0xd8] sm:$0xff] }
0x1c2b   :  { %v8423_v3 = vpop.eup %8422  ;;  %7841 = vmatpush3.msra.mxu1 %v9272_v37  ;;  %7842 = vmatprep.mubr.msk.f32.mxu1 %vm8659_vm4, %v8658_v19 }
0x1c2c   :  { %v4083_v36 = vmul.f32 %v8423_v3, %v8419_v13  ;;  %8259 = vmatprep.subr.bf16.mxu1 %v8258_v33  ;;  %v5209_v3 = vld [vmem:[#allocation10 + $0xc8] sm:$0xff] }
0x1c2e   :  { %7843 = vmatmul.mubr.msk.f32.vlgmr.msra.gmra.mrb[48].mxu1 %vm602_vm5, %v4083_v36 }
0x1c2f   :  { %8261 = vmatpush3.bf16.msra.mxu1 %v8258_v33  ;;  %7864 = vmatprep.mubr.msk.f32.mxu1 %vm290_vm3, %v9248_v34  ;;  %v8278_v33 = vpack.c.bf16 %v5035_v31, %v5034_v30  ;;  %v5765_v30 = vld [vmem:[#allocation7 + $0xf8] sm:$0xff] }
0x1c30   :  { %8263 = vmatprep.subr.bf16.mxu1 %v8262_v38 }
0x1c33   :  { %8265 = vmatpush3.bf16.msra.mxu1 %v8262_v38  ;;  %v8290_v38 = vpack.c.bf16 %v5209_v3, %v5208_v35  ;;  %v5938_v35 = vld [vmem:[#allocation10 + $0xe0] sm:$0xff]  ;;  %v5939_v3 = vld [vmem:[#allocation10 + $0xe8] sm:$0xff] }
0x1c34   :  { %7878 = vmatprep.subr.mxu1 %v8658_v19 }
0x1c36   :  { %7865 = vmatmul.mubr.msk.f32.vlgmr.msra.gmra.mrb[50].mxu1 %vm290_vm3, %v9250_v24 }
0x1c37   :  { %7880 = vmatprep.mubr.msk.f32.mxu1 %vm8659_vm4, %v8658_v19 }
0x1cfd   :  { %v3993_v37 = vpop.f32.mrb[46].mxu1 }
0x1cfe   :  { %v7834_v40 = vpop.f32.mrb[47].mxu1 }
0x1cff   :  { %v5210_v40 = vld [vmem:[#allocation10 + $0xd0] sm:$0xff] }
0x1d01   :  { %v9325_v41 = vpop.f32.mrb[48].mxu1 }
0x1d02   :  { %v7844_v43 = vpop.f32.mrb[49].mxu1 }
0x1d09   :  { %v7866_v49 = vpop.f32.mrb[50].mxu1 }
0x1d0a   :  { %v4330_v50 = vadd.f32 %v7866_v49, %v7119_v48  ;;  %v4324_v51 = vpop.f32.mrb[51].mxu1  ;;  %v7141_v49 = vld [vmem:[%s9615_s12 + $0x6] ss:$0 sm:$0xff] }
0x1d0b   :  { %v4325_v52 = vadd.f32 %v7119_v48, %v4324_v51 }
0x1d0d   :  { %7879 = vmatpush3.xpose.msk.msra.mxu1 %vm602_vm5, %v4325_v52 }
0x1d0e   :  { %7883 = vmatprep.subr.mxu1 %v8658_v19 }
0x1d10   :  { %7881 = vmatmul.mubr.msk.f32.vlgmr.msra.gmra.mrb[52].mxu1 %vm602_vm5, %v4237_v16 }
0x1d11   :  { %7884 = vmatpush3.msra.mxu1 %v4413_v54  ;;  %7885 = vmatprep.mubr.msk.f32.mxu1 %vm8659_vm4, %v8658_v19 }
0x1d12   :  { %7893 = vmatprep.subr.mxu1 %v8658_v19 }
0x1de3   :  { %v4493_v55 = vpop.f32.mrb[52].mxu1 }
0x1de4   :  { %v4497_v32 = vmul.f32 0.35355338, %v4493_v55  ;;  %v7882_v44 = vpop.f32.mrb[53].mxu1 }
0x1de5   :  { %v7137_v44 = vld [vmem:[%s9616_s2 + $0x6] ss:$0 sm:$0xff] }
0x1de6   :  { %v4498_v56 = vadd.f32 %v4497_v32, %v9014_v47 }
0x1de8   :  { %v4499_v8 = vmul.f32 1.442695, %v4498_v56 }
0x1dea   :  { %8424 = vpow2.f32 %v4499_v8 }
0x1df4   :  { %v8425_v57 = vpop.eup %8424 }
0x1df5   :  { %v4501_v58 = vsel %vm602_vm5, %v8425_v57, 0.0 }
0x1df6   :  { %4502 = vadd.xlane.f32.xlu1 %v4501_v58 }
0x1e83   :  { %v4503_v61 = vpop.xlane.xlu1 %4502 }
0x1e84   :  { %8426 = vrcp.f32 %v4503_v61 }
0x1e8e   :  { %v8427_v59 = vpop.eup %8426 }
0x1e8f   :  { %v4505_v39 = vmul.f32 %v8427_v59, %v8425_v57 }
0x1e91   :  { %7886 = vmatmul.mubr.msk.f32.vlgmr.msra.gmra.mrb[54].mxu1 %vm602_vm5, %v4505_v39 }
0x1e92   :  { %7894 = vmatpush3.msra.mxu1 %v3998_v62  ;;  %7895 = vmatprep.mubr.msk.f32.mxu1 %vm8659_vm4, %v8658_v19 }
0x1e93   :  { %7903 = vmatprep.subr.mxu1 %v8658_v19 }
0x1e95   :  { %7896 = vmatmul.mubr.msk.f32.vlgmr.msra.gmra.mrb[56].mxu1 %vm602_vm5, %v3993_v37 }
0x1e96   :  { %7904 = vmatpush3.msra.mxu1 %v9310_v22  ;;  %7905 = vmatprep.mubr.msk.f32.mxu1 %vm8659_vm4, %v8658_v19  ;;  %v8282_v22 = vpack.c.bf16 %v5121_v20, %v5120_v18 }
0x1e97   :  { %7913 = vmatprep.subr.mxu1 %v8658_v19 }
0x1f64   :  { %v4575_v63 = vpop.f32.mrb[54].mxu1 }
0x1f65   :  { %v7887_v0 = vpop.f32.mrb[55].mxu1  ;;  %7891 = vmatmul.mubr.msk.f32.vlgmr.msra.gmra.mrb[46].mxu0 %vm602_vm5, %v4575_v63 }
0x1f66   :  { %7899 = vmatpush3.xpose.msk.msra.mxu0 %vm602_vm5, %v4330_v50  ;;  %7900 = vmatprep.mubr.msk.f32.mxu0 %vm8659_vm4, %v8658_v19 }
0x1f67   :  { %7908 = vmatprep.subr.mxu0 %v8658_v19 }
0x1f68   :  { %v4723_v1 = vpop.f32.mrb[56].mxu1 }
0x1f69   :  { %v7897_v2 = vpop.f32.mrb[57].mxu1  ;;  %7901 = vmatmul.mubr.msk.f32.vlgmr.msra.gmra.mrb[48].mxu0 %vm602_vm5, %v9304_v14 }
0x1f6a   :  { %7909 = vmatpush3.msra.mxu0 %v4580_v60  ;;  %7910 = vmatprep.mubr.msk.f32.mxu0 %vm8659_vm4, %v8658_v19  ;;  %v7145_v60 = vld [vmem:[%s9571_s11 + $0x6] ss:$0 sm:$0xff] }
0x1f6b   :  { %8275 = vmatprep.subr.bf16.mxu0 %v8274_v29 }
0x2038   :  { %v4650_v4 = vpop.f32.mrb[46].mxu0 }
0x2039   :  { %v9357_v5 = vadd.f32 %v4723_v1, %v4650_v4  ;;  %v7892_v6 = vpop.f32.mrb[47].mxu0 }
0x203c   :  { %v4799_v7 = vpop.f32.mrb[48].mxu0 }
0x203d   :  { %v4803_v9 = vmul.f32 0.35355338, %v4799_v7  ;;  %v7902_v10 = vpop.f32.mrb[49].mxu0 }
0x203f   :  { %v4804_v11 = vadd.f32 %v4803_v9, %v9010_v46  ;;  %v5454_v9 = vld [vmem:[#allocation12 + $0x30] sm:$0xff] }
0x2041   :  { %v4805_v12 = vmul.f32 1.442695, %v4804_v11 }
0x2043   :  { %8428 = vpow2.f32 %v4805_v12 }
0x204d   :  { %v8429_v15 = vpop.eup %8428 }
0x204e   :  { %v4807_v17 = vsel %vm602_vm5, %v8429_v15, 0.0 }
0x204f   :  { %4808 = vadd.xlane.f32.xlu0 %v4807_v17 }
0x20dc   :  { %v4809_v14 = vpop.xlane.xlu0 %4808 }
0x20dd   :  { %8430 = vrcp.f32 %v4809_v14 }
0x20e7   :  { %v8431_v21 = vpop.eup %8430 }
0x20e8   :  { %v4811_v13 = vmul.f32 %v8431_v21, %v8429_v15 }
0x20ea   :  { %7906 = vmatmul.mubr.msk.f32.vlgmr.msra.gmra.mrb[58].mxu1 %vm602_vm5, %v4811_v13 }
0x20eb   :  { %7914 = vmatpush3.msra.mxu1 %v3998_v62  ;;  %7915 = vmatprep.mubr.msk.f32.mxu1 %vm8659_vm4, %v8658_v19 }
0x20ec   :  { %8283 = vmatprep.subr.bf16.mxu1 %v8282_v22 }
0x20ee   :  { %7916 = vmatmul.mubr.msk.f32.vlgmr.msra.gmra.mrb[60].mxu1 %vm602_vm5, %v9325_v41  ;;  %v5211_v41 = vld [vmem:[#allocation10 + $0xd8] sm:$0xff] }
0x20ef   :  { %8285 = vmatpush3.bf16.msra.mxu1 %v8282_v22  ;;  %7937 = vmatprep.mubr.msk.f32.mxu1 %vm290_vm3, %v9248_v34  ;;  %v8294_v48 = vpack.c.bf16 %v5211_v41, %v5210_v40 }
0x20f0   :  { %8287 = vmatprep.subr.bf16.mxu1 %v8286_v26 }
0x20f3   :  { %8289 = vmatpush3.bf16.msra.mxu1 %v8286_v26  ;;  %v5763_v26 = vld [vmem:[#allocation7 + $0xe8] sm:$0xff] }
0x20f4   :  { %7951 = vmatprep.subr.mxu1 %v8658_v19  ;;  %v8298_v27 = vpack.c.bf16 %v5763_v26, %v5762_v25 }
0x20f6   :  { %7938 = vmatmul.mubr.msk.f32.vlgmr.msra.gmra.mrb[62].mxu1 %vm290_vm3, %v9250_v24 }
0x20f7   :  { %7953 = vmatprep.mubr.msk.f32.mxu1 %vm8659_vm4, %v8658_v19 }
0x21bd   :  { %v4881_v53 = vpop.f32.mrb[58].mxu1 }
0x21be   :  { %v7907_v36 = vpop.f32.mrb[59].mxu1  ;;  %7911 = vmatmul.mubr.msk.f32.vlgmr.msra.gmra.mrb[50].mxu0 %vm602_vm5, %v4881_v53 }
0x21bf   :  { %8277 = vmatpush3.bf16.msra.mxu0 %v8274_v29  ;;  %7926 = vmatprep.mubr.msk.f32.mxu0 %vm290_vm3, %v9248_v34  ;;  %v5764_v29 = vld [vmem:[#allocation7 + $0xf0] sm:$0xff]  ;;  %v8314_v36 = vpack.c.bf16 %v5939_v3, %v5938_v35  ;;  %v7177_v3 = vld [vmem:[%s9573_s13 + $0x1] ss:$0 sm:$0xff] }
0x21c0   :  { %8279 = vmatprep.subr.bf16.mxu0 %v8278_v33  ;;  %v8302_v53 = vpack.c.bf16 %v5765_v30, %v5764_v29 }
0x21c1   :  { %v5027_v37 = vpop.f32.mrb[60].mxu1 }
0x21c2   :  { %v7917_v43 = vpop.f32.mrb[61].mxu1 }
0x21c3   :  { %8281 = vmatpush3.bf16.msra.mxu0 %v8278_v33 }
0x21c4   :  { %8291 = vmatprep.subr.bf16.mxu0 %v8290_v38 }
0x21c6   :  { %7927 = vmatmul.mubr.msk.f32.vlgmr.msra.gmra.mrb[52].mxu0 %vm290_vm3, %v9250_v24 }
0x21c7   :  { %8293 = vmatpush3.bf16.msra.mxu0 %v8290_v38  ;;  %7948 = vmatprep.mubr.msk.f32.mxu0 %vm290_vm3, %v9248_v34  ;;  %v5940_v38 = vld [vmem:[#allocation10 + $0xf0] sm:$0xff] }
0x21c8   :  { %8295 = vmatprep.subr.bf16.mxu0 %v8294_v48 }
0x21c9   :  { %v7939_v50 = vpop.f32.mrb[62].mxu1 }
0x21ca   :  { %v5204_v51 = vadd.f32 %v7939_v50, %v7141_v49  ;;  %v5198_v52 = vpop.f32.mrb[63].mxu1  ;;  %v5851_v50 = vld [vmem:[#allocation9 + $0xe8] sm:$0xff] }
0x21cb   :  { %v5199_v16 = vadd.f32 %v7141_v49, %v5198_v52  ;;  %8297 = vmatpush3.bf16.msra.mxu0 %v8294_v48  ;;  %v5850_v49 = vld [vmem:[#allocation9 + $0xe0] sm:$0xff]  ;;  %v5852_v52 = vld [vmem:[#allocation9 + $0xf0] sm:$0xff] }
0x21cc   :  { %7961 = vmatprep.subr.mxu0 %v8658_v19 }
0x21cd   :  { %7952 = vmatpush3.xpose.msk.msra.mxu1 %vm602_vm5, %v5199_v16  ;;  %v5853_v16 = vld [vmem:[#allocation9 + $0xf8] sm:$0xff] }
0x21ce   :  { %7949 = vmatmul.mubr.msk.f32.vlgmr.msra.gmra.mrb[54].mxu0 %vm290_vm3, %v9250_v24  ;;  %7956 = vmatprep.subr.mxu1 %v8658_v19 }
0x21cf   :  { %7963 = vmatprep.mubr.msk.f32.mxu0 %vm8659_vm4, %v8658_v19  ;;  %7962 = vmatpush3.msra.mxu0 %v5454_v9 }
0x21d0   :  { %7971 = vmatprep.subr.mxu0 %v8658_v19 }
0x2291   :  { %v4954_v54 = vpop.f32.mrb[50].mxu0 }
0x2292   :  { %v9390_v55 = vadd.f32 %v5027_v37, %v4954_v54  ;;  %v7912_v32 = vpop.f32.mrb[51].mxu0  ;;  %v5941_v37 = vld [vmem:[#allocation10 + $0xf8] sm:$0xff]  ;;  %v8310_v54 = vpack.c.bf16 %v5853_v16, %v5852_v52 }
0x2293   :  { %v8318_v40 = vpack.c.bf16 %v5941_v37, %v5940_v38 }
0x2299   :  { %v7928_v56 = vpop.f32.mrb[52].mxu0 }
0x229a   :  { %v5116_v8 = vadd.f32 %v7928_v56, %v7137_v44  ;;  %v5110_v57 = vpop.f32.mrb[53].mxu0 }
0x229b   :  { %v5111_v58 = vadd.f32 %v7137_v44, %v5110_v57 }
0x229d   :  { %7954 = vmatmul.mubr.msk.f32.vlgmr.msra.gmra.mrb[64].mxu1 %vm602_vm5, %v5111_v58  ;;  %v7165_v58 = vld [vmem:[%s9571_s11 + $0x7] ss:$0 sm:$0xff] }
0x229e   :  { %7958 = vmatprep.mubr.msk.f32.mxu1 %vm8659_vm4, %v8658_v19 }
0x22a1   :  { %v7950_v61 = vpop.f32.mrb[54].mxu0 }
0x22a2   :  { %v5292_v59 = vadd.f32 %v7950_v61, %v7145_v60  ;;  %v5286_v39 = vpop.f32.mrb[55].mxu0 }
0x22a3   :  { %v5287_v62 = vadd.f32 %v7145_v60, %v5286_v39 }
0x22a5   :  { %7957 = vmatpush3.msra.mxu1 %v5287_v62 }
0x22a6   :  { %7966 = vmatprep.subr.mxu1 %v8658_v19 }
0x2370   :  { %v5367_v63 = vpop.f32.mrb[64].mxu1 }
0x2371   :  { %v5371_v0 = vmul.f32 0.35355338, %v5367_v63  ;;  %v7955_v1 = vpop.f32.mrb[65].mxu1 }
0x2373   :  { %v5372_v2 = vadd.f32 %v5371_v0, %v9014_v47  ;;  %v7161_v0 = vld [vmem:[%s9615_s12 + $0x7] ss:$0 sm:$0xff] }
0x2375   :  { %v5373_v4 = vmul.f32 1.442695, %v5372_v2 }
0x2377   :  { %8432 = vpow2.f32 %v5373_v4 }
0x2381   :  { %v8433_v6 = vpop.eup %8432 }
0x2382   :  { %v5375_v7 = vsel %vm602_vm5, %v8433_v6, 0.0 }
0x2383   :  { %5376 = vadd.xlane.f32.xlu1 %v5375_v7 }
0x2410   :  { %v5377_v10 = vpop.xlane.xlu1 %5376 }
0x2411   :  { %8434 = vrcp.f32 %v5377_v10 }
0x241b   :  { %v8435_v11 = vpop.eup %8434 }
0x241c   :  { %v5379_v12 = vmul.f32 %v8435_v11, %v8433_v6 }
0x241e   :  { %7959 = vmatmul.mubr.msk.f32.vlgmr.msra.gmra.mrb[66].mxu1 %vm602_vm5, %v5379_v12 }
0x241f   :  { %7967 = vmatpush3.xpose.msk.msra.mxu1 %vm602_vm5, %v5204_v51  ;;  %7968 = vmatprep.mubr.msk.f32.mxu1 %vm8659_vm4, %v8658_v19  ;;  %v8306_v51 = vpack.c.bf16 %v5851_v50, %v5850_v49 }
0x2420   :  { %7976 = vmatprep.subr.mxu1 %v8658_v19 }
0x2422   :  { %7969 = vmatmul.mubr.msk.f32.vlgmr.msra.gmra.mrb[68].mxu1 %vm602_vm5, %v5116_v8 }
0x2423   :  { %7977 = vmatpush3.msra.mxu1 %v5454_v9  ;;  %7978 = vmatprep.mubr.msk.f32.mxu1 %vm8659_vm4, %v8658_v19 }
0x2424   :  { %8307 = vmatprep.subr.bf16.mxu1 %v8306_v51 }
0x24f1   :  { %v5449_v15 = vpop.f32.mrb[66].mxu1 }
0x24f2   :  { %v7960_v17 = vpop.f32.mrb[67].mxu1  ;;  %7964 = vmatmul.mubr.msk.f32.vlgmr.msra.gmra.mrb[56].mxu0 %vm602_vm5, %v5449_v15 }
0x24f3   :  { %7972 = vmatpush3.msra.mxu0 %v5292_v59  ;;  %7973 = vmatprep.mubr.msk.f32.mxu0 %vm8659_vm4, %v8658_v19 }
0x24f4   :  { %8299 = vmatprep.subr.bf16.mxu0 %v8298_v27 }
0x24f5   :  { %v5601_v14 = vpop.f32.mrb[68].mxu1 }
0x24f6   :  { %v5605_v18 = vmul.f32 0.35355338, %v5601_v14  ;;  %v7970_v20 = vpop.f32.mrb[69].mxu1 }
0x24f8   :  { %v5606_v21 = vadd.f32 %v5605_v18, %v9010_v46  ;;  %v6184_v18 = vld [vmem:[#allocation12 + $0x38] sm:$0xff] }
0x24fa   :  { %v5607_v13 = vmul.f32 1.442695, %v5606_v21 }
0x24fc   :  { %8436 = vpow2.f32 %v5607_v13 }
0x2506   :  { %v8437_v22 = vpop.eup %8436 }
0x2507   :  { %v5609_v23 = vsel %vm602_vm5, %v8437_v22, 0.0 }
0x2508   :  { %5610 = vadd.xlane.f32.xlu0 %v5609_v23 }
0x2595   :  { %v5611_v28 = vpop.xlane.xlu0 %5610 }
0x2596   :  { %8438 = vrcp.f32 %v5611_v28 }
0x25a0   :  { %v8439_v31 = vpop.eup %8438 }
0x25a1   :  { %v5613_v33 = vmul.f32 %v8439_v31, %v8437_v22 }
0x25a3   :  { %7974 = vmatmul.mubr.msk.f32.vlgmr.msra.gmra.mrb[58].mxu0 %vm602_vm5, %v5613_v33 }
0x25a4   :  { %8301 = vmatpush3.bf16.msra.mxu0 %v8298_v27  ;;  %7989 = vmatprep.mubr.msk.f32.mxu0 %vm290_vm3, %v9248_v34 }
0x25a5   :  { %8303 = vmatprep.subr.bf16.mxu0 %v8302_v53 }
0x25a8   :  { %8305 = vmatpush3.bf16.msra.mxu0 %v8302_v53 }
0x25a9   :  { %8315 = vmatprep.subr.bf16.mxu0 %v8314_v36 }
0x25ab   :  { %7990 = vmatmul.mubr.msk.f32.vlgmr.msra.gmra.mrb[60].mxu0 %vm290_vm3, %v9250_v24 }
0x25ac   :  { %8317 = vmatpush3.bf16.msra.mxu0 %v8314_v36  ;;  %8011 = vmatprep.mubr.msk.f32.mxu0 %vm290_vm3, %v9248_v34 }
0x25ad   :  { %8319 = vmatprep.subr.bf16.mxu0 %v8318_v40 }
0x25b0   :  { %8321 = vmatpush3.bf16.msra.mxu0 %v8318_v40 }
0x25b1   :  { %8024 = vmatprep.subr.mxu0 %v8658_v19 }
0x25b3   :  { %8012 = vmatmul.mubr.msk.f32.vlgmr.msra.gmra.mrb[62].mxu0 %vm290_vm3, %v9250_v24 }
0x25b4   :  { %8026 = vmatprep.mubr.msk.f32.mxu0 %vm8659_vm4, %v8658_v19  ;;  %8025 = vmatpush3.msra.mxu0 %v6184_v18 }
0x25b5   :  { %8034 = vmatprep.subr.mxu0 %v8658_v19 }
0x25c5   :  { %v5524_v41 = vpop.f32.mrb[56].mxu0 }
0x25c6   :  { %v9431_v43 = vadd.f32 %v5524_v41, %v9357_v5  ;;  %v7965_v48 = vpop.f32.mrb[57].mxu0  ;;  %v7157_v5 = vld [vmem:[%s9616_s2 + $0x7] ss:$0 sm:$0xff]  ;;  %s6990_s2 = sshll.u32 %s8661_s18, 4  ;;  %s6991_s2 = int_to_ptr.vmem [resolvable:$true] %s6990_s2 }
0x25c7   :  { %s8620_s7 = scalar_lea.vmem %s6991_s2, 32  ;;  %p8621_p1 = scmp.lt.s32.totalorder %s6991_s2, %s6991_s2 }
0x2676   :  { %v5683_v32 = vpop.f32.mrb[58].mxu0 }
0x2677   :  { %v7975_v44 = vpop.f32.mrb[59].mxu0  ;;  %7979 = vmatmul.mubr.msk.f32.vlgmr.msra.gmra.mrb[70].mxu1 %vm602_vm5, %v5683_v32 }
0x2678   :  { %8309 = vmatpush3.bf16.msra.mxu1 %v8306_v51  ;;  %8000 = vmatprep.mubr.msk.f32.mxu1 %vm290_vm3, %v9248_v34 }
0x2679   :  { %8311 = vmatprep.subr.bf16.mxu1 %v8310_v54 }
0x267c   :  { %8313 = vmatpush3.bf16.msra.mxu1 %v8310_v54 }
0x267d   :  { %8014 = vmatprep.subr.mxu1 %v8658_v19 }
0x267e   :  { %v7991_v56 = vpop.f32.mrb[60].mxu0 }
0x267f   :  { %v5846_v8 = vadd.f32 %v7991_v56, %v7157_v5  ;;  %v5840_v57 = vpop.f32.mrb[61].mxu0  ;;  %8001 = vmatmul.mubr.msk.f32.vlgmr.msra.gmra.mrb[72].mxu1 %vm290_vm3, %v9250_v24  ;;  %v7181_v56 = vld [vmem:[%s9575_s15 + $0x1] ss:$0 sm:$0xff] }
0x2680   :  { %8016 = vmatprep.mubr.msk.f32.mxu1 %vm8659_vm4, %v8658_v19  ;;  %v5841_v7 = vadd.f32 %v7157_v5, %v5840_v57 }
0x2686   :  { %v8013_v60 = vpop.f32.mrb[62].mxu0 }
0x2687   :  { %v6022_v61 = vadd.f32 %v8013_v60, %v7165_v58  ;;  %v6016_v59 = vpop.f32.mrb[63].mxu0 }
0x2688   :  { %v6017_v9 = vadd.f32 %v7165_v58, %v6016_v59 }
0x274a   :  { %v5756_v39 = vpop.f32.mrb[70].mxu1 }
0x274b   :  { %v9448_v62 = vadd.f32 %v5756_v39, %v9390_v55  ;;  %v7980_v63 = vpop.f32.mrb[71].mxu1 }
0x2752   :  { %v8002_v1 = vpop.f32.mrb[72].mxu1 }
0x2753   :  { %v5934_v2 = vadd.f32 %v8002_v1, %v7161_v0  ;;  %v5928_v4 = vpop.f32.mrb[73].mxu1 }
0x2754   :  { %v5929_v6 = vadd.f32 %v7161_v0, %v5928_v4 }
0x2756   :  { %8015 = vmatpush3.xpose.msk.msra.mxu1 %vm602_vm5, %v5929_v6 }
0x2757   :  { %8019 = vmatprep.subr.mxu1 %v8658_v19 }
0x2759   :  { %8017 = vmatmul.mubr.msk.f32.vlgmr.msra.gmra.mrb[74].mxu1 %vm602_vm5, %v5841_v7  ;;  %v7182_v7 = vld [vmem:[%s9576_s16 + $0x20] sm:$0xff] }
0x275a   :  { %8020 = vmatpush3.msra.mxu1 %v6017_v9  ;;  %8021 = vmatprep.mubr.msk.f32.mxu1 %vm8659_vm4, %v8658_v19 }
0x275b   :  { %8029 = vmatprep.subr.mxu1 %v8658_v19 }
0x282c   :  { %v6097_v55 = vpop.f32.mrb[74].mxu1 }
0x282d   :  { %v6101_v10 = vmul.f32 0.35355338, %v6097_v55  ;;  %v8018_v11 = vpop.f32.mrb[75].mxu1  ;;  %v7185_v55 = vld [vmem:[%s9576_s16 + $0x38] sm:$0xff] }
0x282f   :  { %v6102_v12 = vadd.f32 %v6101_v10, %v9014_v47 }
0x2831   :  { %v6103_v15 = vmul.f32 1.442695, %v6102_v12 }
0x2833   :  { %8440 = vpow2.f32 %v6103_v15 }
0x283d   :  { %v8441_v17 = vpop.eup %8440 }
0x283e   :  { %v6105_v14 = vsel %vm602_vm5, %v8441_v17, 0.0 }
0x283f   :  { %6106 = vadd.xlane.f32.xlu1 %v6105_v14 }
0x28cc   :  { %v6107_v20 = vpop.xlane.xlu1 %6106 }
0x28cd   :  { %8442 = vrcp.f32 %v6107_v20 }
0x28d7   :  { %v8443_v21 = vpop.eup %8442 }
0x28d8   :  { %v6109_v13 = vmul.f32 %v8443_v21, %v8441_v17  ;;  %v6662_v21 = vld [vmem:[#allocation13 + $0x40] sm:$0xff] }
0x28da   :  { %8022 = vmatmul.mubr.msk.f32.vlgmr.msra.gmra.mrb[76].mxu1 %vm602_vm5, %v6109_v13  ;;  %v6663_v13 = vld [vmem:[#allocation13 + $0x48] sm:$0xff] }
0x28db   :  { %8030 = vmatpush3.xpose.msk.msra.mxu1 %vm602_vm5, %v5934_v2  ;;  %8031 = vmatprep.mubr.msk.f32.mxu1 %vm8659_vm4, %v8658_v19 }
0x28dc   :  { %8039 = vmatprep.subr.mxu1 %v8658_v19 }
0x28de   :  { %8032 = vmatmul.mubr.msk.f32.vlgmr.msra.gmra.mrb[78].mxu1 %vm602_vm5, %v5846_v8 }
0x28df   :  { %8040 = vmatpush3.msra.mxu1 %v6184_v18  ;;  %8041 = vmatprep.mubr.msk.f32.mxu1 %vm8659_vm4, %v8658_v19 }
0x29ad   :  { %v6179_v47 = vpop.f32.mrb[76].mxu1 }
0x29ae   :  { %v8023_v22 = vpop.f32.mrb[77].mxu1  ;;  %8027 = vmatmul.mubr.msk.f32.vlgmr.msra.gmra.mrb[64].mxu0 %vm602_vm5, %v6179_v47  ;;  %v8330_v47 = vpack.c.bf16 %v6663_v13, %v6662_v21 }
0x29af   :  { %8035 = vmatpush3.msra.mxu0 %v6022_v61  ;;  %8036 = vmatprep.mubr.msk.f32.mxu0 %vm8659_vm4, %v8658_v19  ;;  %v6664_v22 = vld [vmem:[#allocation13 + $0x50] sm:$0xff] }
0x29b0   :  { %8331 = vmatprep.subr.bf16.mxu1 %v8330_v47 }
0x29b1   :  { %v6331_v23 = vpop.f32.mrb[78].mxu1 }
0x29b2   :  { %v6335_v25 = vmul.f32 0.35355338, %v6331_v23  ;;  %v8033_v26 = vpop.f32.mrb[79].mxu1  ;;  %v6665_v23 = vld [vmem:[#allocation13 + $0x58] sm:$0xff] }
0x29b3   :  { %v6666_v26 = vld [vmem:[#allocation13 + $0x60] sm:$0xff] }
0x29b4   :  { %v6336_v27 = vadd.f32 %v6335_v25, %v9010_v46  ;;  %v8334_v25 = vpack.c.bf16 %v6665_v23, %v6664_v22 }
0x29b6   :  { %v6337_v28 = vmul.f32 1.442695, %v6336_v27  ;;  %v6667_v27 = vld [vmem:[#allocation13 + $0x68] sm:$0xff] }
0x29b8   :  { %8444 = vpow2.f32 %v6337_v28  ;;  %v8338_v28 = vpack.c.bf16 %v6667_v27, %v6666_v26  ;;  %v7196_v27 = vld [vmem:[%s9580_s20 + $0x1] ss:$0 sm:$0xff] }
0x29c2   :  { %v8445_v29 = vpop.eup %8444 }
0x29c3   :  { %v6339_v30 = vsel %vm602_vm5, %v8445_v29, 0.0 }
0x29c4   :  { %6340 = vadd.xlane.f32.xlu0 %v6339_v30  ;;  %v6669_v30 = vld [vmem:[#allocation13 + $0x78] sm:$0xff] }
0x2a51   :  { %v6341_v31 = vpop.xlane.xlu0 %6340 }
0x2a52   :  { %8446 = vrcp.f32 %v6341_v31 }
0x2a5c   :  { %v8447_v33 = vpop.eup %8446 }
0x2a5d   :  { %v6343_v53 = vmul.f32 %v8447_v33, %v8445_v29  ;;  %v6668_v29 = vld [vmem:[#allocation13 + $0x70] sm:$0xff]  ;;  %v7187_v33 = vld [vmem:[%s9577_s17 + $0x1] ss:$0 sm:$0xff] }
0x2a5e   :  { %v8342_v31 = vpack.c.bf16 %v6669_v30, %v6668_v29  ;;  %v7197_v30 = vld [vmem:[%s9581_s21 + $0x1] ss:$0 sm:$0xff] }
0x2a5f   :  { %8037 = vmatmul.mubr.msk.f32.vlgmr.msra.gmra.mrb[66].mxu0 %vm602_vm5, %v6343_v53 }
0x2a81   :  { %v6254_v35 = vpop.f32.mrb[64].mxu0 }
0x2a82   :  { %v6258_v36 = vadd.f32 %v6254_v35, %v9431_v43  ;;  %v8028_v46 = vpop.f32.mrb[65].mxu0 }
0x2a84   :  { %v6499_v38 = vadd.f32 %v7177_v3, %v6258_v36 }
0x2a86   :  { %v6501_v37 = vadd.f32 %v6499_v38, %v9248_v34  ;;  %v7180_v34 = vld [vmem:[%s9574_s14 + $0x1] ss:$0 sm:$0xff] }
0x2a88   :  { %v6507_v40 = vsel %vm290_vm3, %v6501_v37, 0.0 }
0x2a89   :  { %6508 = vadd.xlane.f32.xlu1 %v6507_v40 }
0x2b16   :  { %v6509_v41 = vpop.xlane.xlu1 %6508 }
0x2b17   :  { %v6513_v48 = vmul.f32 0.03125, %v6509_v41 }
0x2b19   :  { %v6515_v49 = vsub.f32 %v6501_v37, %v6513_v48 }
0x2b1b   :  { %v6517_v50 = vmul.f32 %v6515_v49, %v6515_v49 }
0x2b1d   :  { %v6519_v51 = vsel %vm290_vm3, %v6517_v50, 0.0 }
0x2b1e   :  { %6520 = vadd.xlane.f32.xlu1 %v6519_v51 }
0x2b32   :  { %v6413_v52 = vpop.f32.mrb[66].mxu0 }
0x2b33   :  { %v8038_v16 = vpop.f32.mrb[67].mxu0  ;;  %8042 = vmatmul.mubr.msk.f32.vlgmr.msra.gmra.mrb[80].mxu1 %vm602_vm5, %v6413_v52 }
0x2b34   :  { %8333 = vmatpush3.bf16.msra.mxu1 %v8330_v47 }
0x2b35   :  { %8335 = vmatprep.subr.bf16.mxu1 %v8334_v25 }
0x2b38   :  { %8337 = vmatpush3.bf16.msra.mxu1 %v8334_v25 }
0x2b39   :  { %8339 = vmatprep.subr.bf16.mxu1 %v8338_v28 }
0x2b3c   :  { %8341 = vmatpush3.bf16.msra.mxu1 %v8338_v28 }
0x2b3d   :  { %8343 = vmatprep.subr.bf16.mxu1 %v8342_v31 }
0x2b40   :  { %8345 = vmatpush3.bf16.msra.mxu1 %v8342_v31 }
0x2bab   :  { %v6521_v54 = vpop.xlane.xlu1 %6520 }
0x2bac   :  { %v6525_v43 = vmul.f32 0.03125, %v6521_v54 }
0x2bae   :  { %v6527_v32 = vadd.f32 1e-12, %v6525_v43 }
0x2bb0   :  { %8448 = vrsqrt.f32 %v6527_v32 }
0x2bba   :  { %v8449_v44 = vpop.eup %8448 }
0x2bbb   :  { %v6531_v5 = vmul.f32 %v8449_v44, %v6515_v49 }
0x2bbd   :  { %v6539_v8 = vmul.f32 %v7180_v34, %v6531_v5 }
0x2bbf   :  { %v9490_v57 = vadd.f32 %v7181_v56, %v6539_v8  ;;  %v7191_v8 = vld [vmem:[%s9579_s19 + $0x1] ss:$0 sm:$0xff] }
0x2bc1   :  { %8052 = vmatprep.mubr.msk.f32.mxu0 %vm290_vm3, %v9490_v57 }
0x2c06   :  { %v6486_v58 = vpop.f32.mrb[80].mxu1 }
0x2c07   :  { %v6490_v60 = vadd.f32 %v6486_v58, %v9448_v62  ;;  %v8043_v61 = vpop.f32.mrb[81].mxu1  ;;  %v7183_v62 = vld [vmem:[%s9576_s16 + $0x28] sm:$0xff] }
0x2c08   :  { %v8322_v9 = vpack.c.bf16 %v7183_v62, %v7182_v7 }
0x2c09   :  { %v6500_v59 = vadd.f32 %v7177_v3, %v6490_v60 }
0x2c0a   :  { %8323 = vmatprep.subr.bf16.mxu0 %v8322_v9 }
0x2c0b   :  { %v6502_v39 = vadd.f32 %v6500_v59, %v9250_v24  ;;  %8325 = vmatpush3.bf16.msra.mxu0 %v8322_v9  ;;  %v7184_v24 = vld [vmem:[%s9576_s16 + $0x30] sm:$0xff] }
0x2c0c   :  { %v8326_v10 = vpack.c.bf16 %v7185_v55, %v7184_v24 }
0x2c0d   :  { %v6510_v63 = vsel %vm290_vm3, %v6502_v39, 0.0 }
0x2c0e   :  { %6511 = vadd.xlane.f32.xlu0 %v6510_v63  ;;  %8327 = vmatprep.subr.bf16.mxu0 %v8326_v10 }
0x2c0f   :  { %8329 = vmatpush3.bf16.msra.mxu0 %v8326_v10 }
0x2c9b   :  { %v6512_v0 = vpop.xlane.xlu0 %6511 }
0x2c9c   :  { %v6514_v1 = vmul.f32 0.03125, %v6512_v0 }
0x2c9e   :  { %v6516_v2 = vsub.f32 %v6502_v39, %v6514_v1 }
0x2ca0   :  { %v6518_v4 = vmul.f32 %v6516_v2, %v6516_v2 }
0x2ca2   :  { %v6522_v6 = vsel %vm290_vm3, %v6518_v4, 0.0 }
0x2ca3   :  { %6523 = vadd.xlane.f32.xlu0 %v6522_v6 }
0x2d30   :  { %v6524_v11 = vpop.xlane.xlu0 %6523 }
0x2d31   :  { %v6526_v12 = vmul.f32 0.03125, %v6524_v11 }
0x2d33   :  { %v6528_v15 = vadd.f32 1e-12, %v6526_v12  ;;  %v6811_v12 = vld [vmem:[#allocation15 + $0x8] sm:$0xff] }
0x2d35   :  { %8450 = vrsqrt.f32 %v6528_v15 }
0x2d3f   :  { %v8451_v17 = vpop.eup %8450 }
0x2d40   :  { %v6532_v14 = vmul.f32 %v8451_v17, %v6516_v2  ;;  %v6812_v17 = vld [vmem:[#allocation15 + $0x10] sm:$0xff] }
0x2d42   :  { %v6540_v18 = vmul.f32 %v7180_v34, %v6532_v14  ;;  %v6813_v14 = vld [vmem:[#allocation15 + $0x18] sm:$0xff] }
0x2d44   :  { %v6548_v20 = vadd.f32 %v7181_v56, %v6540_v18  ;;  %v8660_v18 = vmov 0.0|0.0  }
0x2d45   :  { %8346 = vmatprep.subr.bf16.mxu0 %v8660_v18 }
0x2d46   :  { %8053 = vmatmul.mubr.msk.f32.vlgmr.msra.gmra.mrb[68].mxu0 %vm290_vm3, %v6548_v20 }
0x2d47   :  { %8082 = vmatprep.mubr.msk.f32.mxu0 %vm8659_vm4, %v8658_v19 }
0x2e19   :  { %v8054_v53 = vpop.f32.mrb[68].mxu0 }
0x2e1a   :  { %v6640_v35 = vadd.f32 %v8054_v53, %v7187_v33  ;;  %v6634_v3 = vpop.f32.mrb[69].mxu0 }
0x2e1b   :  { %v6635_v36 = vadd.f32 %v7187_v33, %v6634_v3 }
0x2e1c   :  { %v6644_v46 = vmul.f32 %v6640_v35, %v6640_v35 }
0x2e1d   :  { %v6643_v38 = vmul.f32 %v6635_v36, %v6635_v36 }
0x2e1e   :  { %v6646_v37 = vmul.f32 %v6644_v46, %v6640_v35  ;;  %v6896_v46 = vld [vmem:[#allocation3] sm:$0x1] }
0x2e1f   :  { %v6645_v40 = vmul.f32 %v6643_v38, %v6635_v36  ;;  %v7198_v38 = vld [vmem:[%s9583_s23] ss:$0 sm:$0xff]  ;;  %s8616_s23 = scalar_lea.vmem %s6991_s2, 16 }
0x2e20   :  { %v6648_v41 = vmul.f32 0.044715, %v6646_v37  ;;  %p8617_p0 = scmp.ne.s32.totalorder %s6991_s2, %s8616_s23  ;;  %p8622_p2 = scmp.lt.s32.totalorder %s8620_s7, %s8616_s23 }
0x2e21   :  { %v6647_v48 = vmul.f32 0.044715, %v6645_v40 }
0x2e22   :  { %v6650_v49 = vadd.f32 %v6648_v41, %v6640_v35  ;;  %p8623_p3 = por %p8622_p2, %p8621_p1 }
0x2e23   :  { %v6649_v50 = vadd.f32 %v6647_v48, %v6635_v36 }
0x2e24   :  { %v6652_v51 = vmul.f32 0.7978846, %v6650_v49  ;;  %v6895_v49 = vld [vmem:[%s9584_s24] sm:$0x1]  ;;  %p8624_p4 = pnand %p8623_p3, %p8617_p0 }
0x2e25   :  { %v6651_v52 = vmul.f32 0.7978846, %v6649_v50 }
0x2e26   :  { %8452 = vtanh.f32 %v6652_v51 }
0x2e27   :  { %8454 = vtanh.f32 %v6651_v52 }
0x2e30   :  { %v8453_v16 = vpop.eup %8452 }
0x2e31   :  { %v8455_v54 = vpop.eup %8454  ;;  %v6656_v43 = vadd.f32 1.0, %v8453_v16 }
0x2e32   :  { %v6655_v32 = vadd.f32 1.0, %v8455_v54 }
0x2e33   :  { %v6658_v44 = vmul.f32 0.5, %v6656_v43 }
0x2e34   :  { %v6657_v34 = vmul.f32 0.5, %v6655_v32 }
0x2e35   :  { %v6660_v56 = vmul.f32 %v6658_v44, %v6640_v35 }
0x2e36   :  { %v6659_v5 = vmul.f32 %v6657_v34, %v6635_v36 }
0x2e38   :  { %8071 = vmatprep.mubr.msk.f32.mxu1 %vm206_vm0, %v6659_v5 }
0x2e39   :  { %8072 = vmatmul.mubr.msk.f32.vlgmr.msra.gmra.mrb[82].mxu1 %vm206_vm0, %v6660_v56 }
0x2f0c   :  { %v8073_v58 = vpop.f32.mrb[82].mxu1 }
0x2f0d   :  { %v6756_v60 = vadd.f32 %v8073_v58, %v7191_v8  ;;  %v6750_v61 = vpop.f32.mrb[83].mxu1 }
0x2f0e   :  { %v6751_v59 = vadd.f32 %v7191_v8, %v6750_v61 }
0x2f0f   :  { %v6760_v39 = vadd.f32 %v6756_v60, %v6548_v20  ;;  %v8350_v20 = vpack.c.bf16 %v6813_v14, %v6812_v17 }
0x2f10   :  { %v6759_v63 = vadd.f32 %v6751_v59, %v9490_v57  ;;  %v6810_v57 = vld [vmem:[#allocation15] sm:$0xff] }
0x2f11   :  { %v6768_v0 = vsel %vm290_vm3, %v6760_v39, 0.0  ;;  %v8347_v15 = vpack.c.bf16 %v6811_v12, %v6810_v57 }
0x2f12   :  { %6769 = vadd.xlane.f32.xlu0 %v6768_v0  ;;  %v6765_v1 = vsel %vm290_vm3, %v6759_v63, 0.0 }
0x2f13   :  { %6766 = vadd.xlane.f32.xlu1 %v6765_v1  ;;  %8348 = vmatpush3.bf16.msra.mxu0 %v8347_v15 }
0x2f14   :  { %8349 = vmatprep.subr.bf16.mxu0 %v8660_v18 }
0x2f17   :  { %8351 = vmatpush3.bf16.msra.mxu0 %v8350_v20 }
0x2f18   :  { %8085 = vmatprep.subr.mxu0 %v8658_v19 }
0x2f9f   :  { %v6770_v2 = vpop.xlane.xlu0 %6769 }
0x2fa0   :  { %v6772_v4 = vmul.f32 0.03125, %v6770_v2  ;;  %v6767_v6 = vpop.xlane.xlu1 %6766 }
0x2fa1   :  { %v6771_v7 = vmul.f32 0.03125, %v6767_v6 }
0x2fa2   :  { %v6774_v62 = vsub.f32 %v6760_v39, %v6772_v4 }
0x2fa3   :  { %v6773_v9 = vsub.f32 %v6759_v63, %v6771_v7 }
0x2fa4   :  { %v6776_v24 = vmul.f32 %v6774_v62, %v6774_v62 }
0x2fa5   :  { %v6775_v55 = vmul.f32 %v6773_v9, %v6773_v9 }
0x2fa6   :  { %v6780_v10 = vsel %vm290_vm3, %v6776_v24, 0.0 }
0x2fa7   :  { %6781 = vadd.xlane.f32.xlu0 %v6780_v10  ;;  %v6777_v11 = vsel %vm290_vm3, %v6775_v55, 0.0 }
0x2fa8   :  { %6778 = vadd.xlane.f32.xlu1 %v6777_v11 }
0x2fb9   :  { %6899 = vperm.xlu1 %8367, %v6896_v46  }
0x3034   :  { %v6782_v21 = vpop.xlane.xlu0 %6781 }
0x3035   :  { %v6784_v13 = vmul.f32 0.03125, %v6782_v21  ;;  %v6779_v47 = vpop.xlane.xlu1 %6778 }
0x3036   :  { %v6783_v22 = vmul.f32 0.03125, %v6779_v47 }
0x3037   :  { %v6786_v23 = vadd.f32 1e-12, %v6784_v13 }
0x3038   :  { %v6785_v25 = vadd.f32 1e-12, %v6783_v22 }
0x3039   :  { %8456 = vrsqrt.f32 %v6786_v23 }
0x303a   :  { %8458 = vrsqrt.f32 %v6785_v25 }
0x3043   :  { %v8457_v26 = vpop.eup %8456 }
0x3044   :  { %v8459_v28 = vpop.eup %8458  ;;  %v6790_v29 = vmul.f32 %v8457_v26, %v6774_v62 }
0x3045   :  { %v6789_v31 = vmul.f32 %v8459_v28, %v6773_v9 }
0x3046   :  { %v6798_v33 = vmul.f32 %v7196_v27, %v6790_v29 }
0x3047   :  { %v6797_v53 = vmul.f32 %v7196_v27, %v6789_v31 }
0x3048   :  { %v6806_v35 = vadd.f32 %v7197_v30, %v6798_v33 }
0x3049   :  { %v6805_v3 = vadd.f32 %v7197_v30, %v6797_v53 }
0x304a   :  { %6808 = vst.msk [vmem:[#allocation2 + $0x8] sm:$0xff] %vm290_vm3, %v6806_v35 }
0x304b   :  { %6807 = vst.msk [vmem:[#allocation2] sm:$0xff] %vm290_vm3, %v6805_v3 }
0x3052   :  { %v6809_v36 = vld [vmem:[#allocation2] ss:$8 sm:$0x3] }
0x3053   :  { %8083 = vmatmul.mubr.msk.f32.vlgmr.msra.gmra.mrb[70].mxu0 %vm290_vm3, %v6809_v36 }
0x3054   :  { %8087 = vmatprep.mubr.msk.f32.mxu0 %vm8659_vm4, %v8658_v19  ;;  %v6900_v19 = vpop.permute.xlu1 %6899 }
0x3055   :  { %v6905_v50 = vrot.slane %v6900_v19, %v682_v45 }
0x3126   :  { %v6890_v37 = vpop.f32.mrb[70].mxu0 }
0x3127   :  { %v6891_v40 = vadd.f32 %v7198_v38, %v6890_v37  ;;  %v8084_v41 = vpop.f32.mrb[71].mxu0 }
0x3129   :  { %8460 = vtanh.f32 %v6891_v40 }
0x3133   :  { %v8461_v48 = vpop.eup %8460 }
0x3134   :  { %8086 = vmatpush3.xpose.msk.msra.mxu0 %vm290_vm3, %v8461_v48 }
0x3137   :  { %8088 = vmatmul.mubr.msk.f32.vlgmr.msra.gmra.mrb[72].mxu0 %vm290_vm3, %v6895_v49 }
0x320a   :  { %v6978_v51 = vpop.f32.mrb[72].mxu0 }
0x320b   :  { %v6979_v52 = vadd.f32 %v6978_v51, %v6905_v50  ;;  %v8089_v16 = vpop.f32.mrb[73].mxu0 }
0x320d   :  { %6983 = vst.msk [vmem:[#allocation16] sm:$0x1] %vm6982_vm6, %v6979_v52 }
0x320e   :  { %8627 = shalt.err (!%p8624_p4)
}
0x320f   :  { %s9618_s12 = sld [smem:[#allocation33_spill]] }
0x3215   :  { %s8628_s13 = scalar_lea.hbm %s9618_s12, 16 }
0x3216   :  { %p8629_p5 = scmp.ne.s32.totalorder %s9618_s12, %s8628_s13  ;;  %p8632_p6 = scmp.lt.u32.totalorder %s8628_s13, %s9618_s12 }
0x3218   :  { %p8634_p7 = pnand %p8632_p6, %p8629_p5 }
0x321a   :  { %8637 = shalt.err (!%p8634_p7)
}
0x321b   :  { %6993 = dma.vmem_to_hbm [thread:$0]  %s6991_s2, 16, %s9618_s12, [#allocation6]  }
0x321c   :  { %8646 = dma.done.wait [#allocation6], 16  }
0x321d   :  { %8647 = vsyncadd [#allocation6], 4294967280 }
0x321e   :  { %6997 = vsyncpa [#allocation5], 1 }
0x321f   :  { %6998 = vsyncpa [#allocation8], 1 }
0x3220   :  { %6999 = vsyncpa [#allocation11], 1 }
0x3221   :  { %7000 = vsyncpa [#allocation14], 1 }
0x3222   :  { %7001 = vsyncpa [#allocation6], 1 }

</bundles_post_ra>
